<compile_context>
chip_gen: v7x
topology: tpu7x:2x2x1
jax: 0.10.0
libtpu: 0.0.40
codegen_flags: <defaults>
</compile_context>

<pallas_src>
import functools
import math

import jax
import jax.numpy as jnp
from jax import lax
from jax.experimental import pallas as pl
from jax.experimental.pallas import tpu as pltpu

NEG_SLOPE = 0.2                        # GATv2Conv default negative_slope
LIN_COEF = 0.5 * (1.0 + NEG_SLOPE)     # leaky_relu(z) = LIN*z + ABS*|z|
ABS_COEF = 0.5 * (1.0 - NEG_SLOPE)
LANES = 128
MASK_BIG = 1e30                        # additive mask must stay in f32


def _round_up(x, m):
    return (x + m - 1) // m * m


def _default_vmem_limit():
    """Generation-aware VMEM budget (v5e/v6e: 128 MiB physical, v7x: 64 MiB)."""
    try:
        cap = pltpu.get_tpu_info().vmem_capacity_bytes
    except Exception:
        cap = 64 * 1024 * 1024
    return int(min(cap - 16 * 1024 * 1024, 100 * 1024 * 1024))


# --------------------------------------------------------------------------
# Pallas kernel: one dense GATv2 layer for one tile of target-node rows.
# --------------------------------------------------------------------------
def _gatv2_layer_kernel(xlT_ref, xr_ref, alT_ref, ar_ref, adj_ref, att_abs_ref,
                        bias_ref, out_ref, *, heads, out_dim, concat,
                        activation, out_pad):
    f32 = jnp.float32
    bf16 = jnp.bfloat16

    adj = adj_ref[...].astype(f32)            # [T, N]  int8 {0,1} -> f32
    xlT = xlT_ref[...]                        # [heads*D, N]  source features
    xr = xr_ref[...]                          # [T, heads*D]  target features
    alT = alT_ref[...]                        # [heads, N]    LIN * (att . x_l)
    ar = ar_ref[...]                          # [T, heads]    LIN * (att . x_r)

    head_outs = []
    for k in range(heads):                    # static unroll (heads is tiny)
        xlT_k = xlT[k * out_dim:(k + 1) * out_dim, :]         # [D, N]
        xr_k = xr[:, k * out_dim:(k + 1) * out_dim]           # [T, D]

        # e[i,j] = mask + LIN*(att.x_l[j] + att.x_r[i])
        #               + ABS*sum_d att[k,d] * |x_l[j,d] + x_r[i,d]|
        # Mask recomputed per head (2 cheap VPU ops) -> no extra live [T,N]
        # f32 buffer across the statically-unrolled head loop (v7x VMEM).
        e = (adj - 1.0) * jnp.float32(MASK_BIG) + (alT[k:k + 1, :] + ar[:, k:k + 1])
        for d in range(out_dim):                               # static unroll
            z = xlT_k[d:d + 1, :] + xr_k[:, d:d + 1]           # [T, N]
            e = e + att_abs_ref[k, d] * jnp.abs(z)             # SMEM scalar

        # Masked softmax over incoming neighbours, normalization folded into
        # the aggregation (masked entries underflow to exactly 0 in exp).
        m = jnp.max(e, axis=1, keepdims=True)                  # [T, 1]
        p = jnp.exp(e - m)                                     # [T, N]
        denom = jnp.sum(p, axis=1, keepdims=True)              # [T, 1]

        acc = lax.dot_general(                                 # p @ x_l[k]
            p.astype(bf16), xlT_k.astype(bf16),
            dimension_numbers=(((1,), (1,)), ((), ())),
            preferred_element_type=f32)                        # [T, D]
        head_outs.append(acc * pl.reciprocal(denom, approx=True))

    if concat:
        vals = jnp.concatenate(head_outs, axis=1)              # [T, heads*D]
    else:
        vals = head_outs[0]
        for ho in head_outs[1:]:
            vals = vals + ho
        vals = vals * jnp.float32(1.0 / heads)                 # [T, D]

    vals = vals + bias_ref[...]

    if activation == "elu":
        vals = jnp.where(vals > 0, vals,
                         jnp.exp(jnp.minimum(vals, 0.0)) - 1.0)
    elif activation == "log_softmax":
        mx = jnp.max(vals, axis=1, keepdims=True)
        zc = vals - mx
        vals = zc - jnp.log(jnp.sum(jnp.exp(zc), axis=1, keepdims=True))

    # Pad to the lane-dense output width -> unmasked vector stores; the real
    # columns are sliced outside the kernel.
    width = vals.shape[1]
    if out_pad > width:
        vals = jnp.concatenate(
            [vals, jnp.zeros((vals.shape[0], out_pad - width), f32)], axis=1)
    out_ref[...] = vals.astype(out_ref.dtype)


# --------------------------------------------------------------------------
# pallas_call wrapper for one layer (grid over target-node row tiles).
# --------------------------------------------------------------------------
def _gatv2_layer_call(xlT, xr, alT, ar, adj_i8, att_abs, bias, *, heads,
                      out_dim, concat, activation, tile_i, out_pad, out_dtype,
                      vmem_limit):
    hd, n_pad = xlT.shape
    width = heads * out_dim if concat else out_dim

    kernel = functools.partial(
        _gatv2_layer_kernel, heads=heads, out_dim=out_dim, concat=concat,
        activation=activation, out_pad=out_pad)

    return pl.pallas_call(
        kernel,
        out_shape=jax.ShapeDtypeStruct((n_pad, out_pad), out_dtype),
        grid=(n_pad // tile_i,),
        in_specs=[
            pl.BlockSpec((hd, n_pad), lambda i: (0, 0)),        # x_l^T (resident)
            pl.BlockSpec((tile_i, hd), lambda i: (i, 0)),       # x_r target rows
            pl.BlockSpec((heads, n_pad), lambda i: (0, 0)),     # LIN*att.x_l (resident)
            pl.BlockSpec((tile_i, heads), lambda i: (i, 0)),    # LIN*att.x_r rows
            # Only O(N^2) HBM stream (int8).  If its DMA becomes exposed on
            # v5e after the VALU cuts, add pipeline_mode=pl.Buffered(3).
            pl.BlockSpec((tile_i, n_pad), lambda i: (i, 0)),    # adj rows (int8)
            pl.BlockSpec(memory_space=pltpu.MemorySpace.SMEM),  # ABS*att scalars
            pl.BlockSpec((1, width), lambda i: (0, 0)),         # bias
        ],
        out_specs=pl.BlockSpec((tile_i, out_pad), lambda i: (i, 0)),
        compiler_params=pltpu.CompilerParams(
            # Target-row axis is independent -> shards across v7x's 2 TCs;
            # measured no-op on v5e/v6e (single TC) but harmless.
            dimension_semantics=("parallel",),
            vmem_limit_bytes=vmem_limit),
    )(xlT, xr, alT, ar, adj_i8, att_abs, bias)


def _gatv2_layer(feat, adj_i8, wl, wr, att, bias, *, n_pad, heads, out_dim,
                 concat, activation, tile_i, out_pad, out_dtype, vmem_limit):
    """Hoisted projections + rank-1 attention terms, then the Pallas layer."""
    f32, bf16 = jnp.float32, jnp.bfloat16
    m = feat.shape[0]
    hd = heads * out_dim

    # Projections computed ONCE with plain XLA matmuls (not per grid step).
    xl = jnp.dot(feat.astype(bf16), wl.astype(bf16), preferred_element_type=f32)
    xr = jnp.dot(feat.astype(bf16), wr.astype(bf16), preferred_element_type=f32)
    if m < n_pad:                        # fake-node rows: zeros (masked anyway)
        pad = jnp.zeros((n_pad - m, hd), f32)
        xl = jnp.concatenate([xl, pad], axis=0)
        xr = jnp.concatenate([xr, pad], axis=0)

    # Rank-1 "linear" part of leaky_relu: LIN * (att . x) per node, per head.
    att_f = att.astype(f32)
    alT = (LIN_COEF * jnp.einsum(
        "nhd,hd->nh", xl.reshape(n_pad, heads, out_dim), att_f)).T   # [heads, N]
    ar = LIN_COEF * jnp.einsum(
        "nhd,hd->nh", xr.reshape(n_pad, heads, out_dim), att_f)      # [N, heads]
    att_abs = ABS_COEF * att_f                                       # [heads, D]

    width = hd if concat else out_dim
    bias2 = jnp.asarray(bias, f32).reshape(1, width)

    return _gatv2_layer_call(xl.T, xr, alT, ar, adj_i8, att_abs, bias2,
                             heads=heads, out_dim=out_dim, concat=concat,
                             activation=activation, tile_i=tile_i,
                             out_pad=out_pad, out_dtype=out_dtype,
                             vmem_limit=vmem_limit)


# --------------------------------------------------------------------------
# Full network: 2 GATv2 layers (ELU + log_softmax fused into the kernels).
# --------------------------------------------------------------------------
def gatv2_net(x, adj, params, *, heads1, hidden, heads2, num_classes,
              tile_i=128, vmem_limit_bytes=None):
    # int8 adjacency needs >= 32 sublanes per tile; keep N 128-lane aligned.
    assert tile_i % 32 == 0
    n = x.shape[0]
    step = (tile_i * LANES) // math.gcd(tile_i, LANES)
    n_pad = _round_up(n, step)
    h1 = heads1 * hidden
    h1_pad = _round_up(h1, LANES)
    c_pad = _round_up(num_classes, LANES)
    if vmem_limit_bytes is None:
        vmem_limit_bytes = _default_vmem_limit()

    # Dense mask (adj[i,j]=1 iff edge j->i) + self loops, padded, int8.
    # Padded (fake) nodes get a self loop so their row softmax stays finite;
    # their rows are sliced off and as sources they are masked for real rows.
    adj_p = jnp.zeros((n_pad, n_pad), jnp.float32).at[:n, :n].set(adj)
    adj_p = jnp.maximum(adj_p, jnp.eye(n_pad, dtype=jnp.float32))
    adj_i8 = adj_p.astype(jnp.int8)

    # TODO(synk): F.dropout / attention dropout in training mode not
    # implemented (identity in eval mode, which is the forward matched here).

    # ---- layer 1: F0 -> hidden per head, heads1 heads, concat, ELU ----
    h = _gatv2_layer(x, adj_i8, params["wl1"], params["wr1"], params["att1"],
                     params["b1"], n_pad=n_pad, heads=heads1, out_dim=hidden,
                     concat=True, activation="elu", tile_i=tile_i,
                     out_pad=h1_pad, out_dtype=jnp.bfloat16,
                     vmem_limit=vmem_limit_bytes)

    # ---- layer 2: h1 -> C, heads2 heads, head-mean, log_softmax ----
    out = _gatv2_layer(h[:, :h1], adj_i8, params["wl2"], params["wr2"],
                       params["att2"], params["b2"], n_pad=n_pad, heads=heads2,
                       out_dim=num_classes, concat=False,
                       activation="log_softmax", tile_i=tile_i,
                       out_pad=c_pad, out_dtype=jnp.float32,
                       vmem_limit=vmem_limit_bytes)
    return out[:n, :num_classes]


# --------------------------------------------------------------------------
# Pure-JAX reference (same math, incl. bf16 matmul inputs / bf16 h).
# --------------------------------------------------------------------------
def _gatv2_layer_ref(x, adj, wl, wr, att, bias, *, heads, out_dim, concat):
    bf16, f32 = jnp.bfloat16, jnp.float32
    xl = jnp.dot(x.astype(bf16), wl.astype(bf16), preferred_element_type=f32)
    xr = jnp.dot(x.astype(bf16), wr.astype(bf16), preferred_element_type=f32)
    mask_bias = (adj - 1.0) * jnp.float32(MASK_BIG)
    outs = []
    for k in range(heads):
        xl_k = xl[:, k * out_dim:(k + 1) * out_dim]
        xr_k = xr[:, k * out_dim:(k + 1) * out_dim]
        s = xl_k[None, :, :] + xr_k[:, None, :]
        s = jnp.maximum(s, NEG_SLOPE * s)
        e = jnp.einsum("ijd,d->ij", s, att[k]) + mask_bias
        m = jnp.max(e, axis=1, keepdims=True)
        p = jnp.exp(e - m)
        denom = jnp.sum(p, axis=1, keepdims=True)
        acc = jnp.dot(p.astype(bf16), xl_k.astype(bf16),
                      preferred_element_type=f32)
        outs.append(acc / denom)
    if concat:
        out = jnp.concatenate(outs, axis=1)
    else:
        out = outs[0]
        for o in outs[1:]:
            out = out + o
        out = out / jnp.float32(heads)
    return out + bias


def gatv2_net_ref(x, adj, params, *, heads1, hidden, heads2, num_classes):
    adj = jnp.maximum(adj, jnp.eye(x.shape[0], dtype=jnp.float32))
    h = _gatv2_layer_ref(x, adj, params["wl1"], params["wr1"], params["att1"],
                         params["b1"], heads=heads1, out_dim=hidden,
                         concat=True)
    h = jnp.where(h > 0, h, jnp.exp(jnp.minimum(h, 0.0)) - 1.0)
    h = h.astype(jnp.bfloat16).astype(jnp.float32)   # mirror bf16 intermediate
    logits = _gatv2_layer_ref(h, adj, params["wl2"], params["wr2"],
                              params["att2"], params["b2"], heads=heads2,
                              out_dim=num_classes, concat=False)
    return jax.nn.log_softmax(logits, axis=1)


def _glorot(key, shape):
    fan_in, fan_out = shape[0], shape[1]
    lim = jnp.sqrt(6.0 / (fan_in + fan_out))
    return jax.random.uniform(key, shape, jnp.float32, -lim, lim)


if __name__ == "__main__":
    # small shapes consistent with the module
    N = 48             # number of nodes
    F0 = 8             # dataset.num_features
    HIDDEN = 8         # args.hidden
    HEADS1 = 2         # args.heads
    CLASSES = 4        # dataset.num_classes
    HEADS2 = 1         # args.output_heads

    key = jax.random.PRNGKey(0)
    ks = jax.random.split(key, 8)

    # node features
    x = jax.random.normal(ks[0], (N, F0), jnp.float32)

    # deterministic sparse graph: bidirectional ring + a few extra edges
    src = jnp.concatenate([jnp.arange(N), (jnp.arange(N) + 1) % N,
                           jnp.array([0, 5, 11, 17, 23, 31])])
    dst = jnp.concatenate([(jnp.arange(N) + 1) % N, jnp.arange(N),
                           jnp.array([20, 33, 2, 40, 8, 14])])
    # dense adjacency mask: adj[i, j] = 1 iff edge j -> i (self loops added
    # inside gatv2_net / gatv2_net_ref, matching add_self_loops=True)
    adj = jnp.zeros((N, N), jnp.float32).at[dst, src].set(1.0)

    params = {
        # layer 1: F0 -> HIDDEN per head, HEADS1 heads, concat
        "wl1": _glorot(ks[1], (F0, HEADS1 * HIDDEN)),
        "wr1": _glorot(ks[2], (F0, HEADS1 * HIDDEN)),
        "att1": _glorot(ks[3], (HEADS1, HIDDEN)),
        "b1": jnp.zeros((1, HEADS1 * HIDDEN), jnp.float32),
        # layer 2: HEADS1*HIDDEN -> CLASSES, HEADS2 heads, mean (concat=False)
        "wl2": _glorot(ks[4], (HEADS1 * HIDDEN, HEADS2 * CLASSES)),
        "wr2": _glorot(ks[5], (HEADS1 * HIDDEN, HEADS2 * CLASSES)),
        "att2": _glorot(ks[6], (HEADS2, CLASSES)),
        "b2": jnp.zeros((1, CLASSES), jnp.float32),
    }

    out = gatv2_net(x, adj, params, heads1=HEADS1, hidden=HIDDEN,
                    heads2=HEADS2, num_classes=CLASSES, tile_i=128)
    out = jax.block_until_ready(out)

    ref = gatv2_net_ref(x, adj, params, heads1=HEADS1, hidden=HIDDEN,
                        heads2=HEADS2, num_classes=CLASSES)
    assert out.shape == (N, CLASSES)
    # bf16 matmuls / bf16 intermediate / approx reciprocal -> ~1e-3 deltas.
    assert bool(jnp.allclose(out, ref, atol=1e-2, rtol=1e-2))

    print("KERNEL_OK")
</pallas_src>

<mosaic_0001>
module attributes {stable_mosaic.version = 11 : i64} {
  func.func @_gatv2_layer_kernel(%arg0: i32, %arg1: memref<16x128xf32, #tpu.memory_space<vmem>>, %arg2: memref<128x16xf32, #tpu.memory_space<vmem>>, %arg3: memref<2x128xf32, #tpu.memory_space<vmem>>, %arg4: memref<128x2xf32, #tpu.memory_space<vmem>>, %arg5: memref<128x128xi8, #tpu.memory_space<vmem>>, %arg6: memref<2x8xf32, #tpu.memory_space<smem>>, %arg7: memref<1x16xf32, #tpu.memory_space<vmem>>, %arg8: memref<128x128xbf16, #tpu.memory_space<vmem>>) attributes {dimension_semantics = [#tpu.dimension_semantics<parallel>], iteration_bounds = array<i64: 1>, scalar_prefetch = 0 : i64, scratch_operands = 0 : i64, tpu.core_type = #tpu.core_type<tc>, window_params = [{pipeline_mode = #tpu.pipeline_mode<synchronous>, transform_indices = @transform_0, window_bounds = array<i64: 16, 128>}, {transform_indices = @transform_1, window_bounds = array<i64: 128, 16>}, {pipeline_mode = #tpu.pipeline_mode<synchronous>, transform_indices = @transform_2, window_bounds = array<i64: 2, 128>}, {transform_indices = @transform_3, window_bounds = array<i64: 128, 2>}, {transform_indices = @transform_4, window_bounds = array<i64: 128, 128>}, {transform_indices = @transform_5, window_bounds = array<i64: 2, 8>}, {pipeline_mode = #tpu.pipeline_mode<synchronous>, transform_indices = @transform_6, window_bounds = array<i64: 1, 16>}, {transform_indices = @transform_7, window_bounds = array<i64: 128, 128>}]} {
    %c0 = arith.constant 0 : index
    %c0_0 = arith.constant 0 : index
    %0 = vector.load %arg5[%c0, %c0_0] : memref<128x128xi8, #tpu.memory_space<vmem>>, vector<128x128xi8>
    %1 = arith.sitofp %0 : vector<128x128xi8> to vector<128x128xf32>
    %c0_1 = arith.constant 0 : index
    %c0_2 = arith.constant 0 : index
    %2 = vector.load %arg1[%c0_1, %c0_2] : memref<16x128xf32, #tpu.memory_space<vmem>>, vector<16x128xf32>
    %c0_3 = arith.constant 0 : index
    %c0_4 = arith.constant 0 : index
    %3 = vector.load %arg2[%c0_3, %c0_4] : memref<128x16xf32, #tpu.memory_space<vmem>>, vector<128x16xf32>
    %c0_5 = arith.constant 0 : index
    %c0_6 = arith.constant 0 : index
    %4 = vector.load %arg3[%c0_5, %c0_6] : memref<2x128xf32, #tpu.memory_space<vmem>>, vector<2x128xf32>
    %c0_7 = arith.constant 0 : index
    %c0_8 = arith.constant 0 : index
    %5 = vector.load %arg4[%c0_7, %c0_8] : memref<128x2xf32, #tpu.memory_space<vmem>>, vector<128x2xf32>
    %6 = vector.extract_strided_slice %2 {offsets = [0, 0], sizes = [8, 128], strides = [1, 1]} : vector<16x128xf32> to vector<8x128xf32>
    %7 = vector.extract_strided_slice %3 {offsets = [0, 0], sizes = [128, 8], strides = [1, 1]} : vector<128x16xf32> to vector<128x8xf32>
    %cst = arith.constant 1.000000e+00 : f32
    %8 = vector.broadcast %cst : f32 to vector<128x128xf32>
    %9 = arith.subf %1, %8 : vector<128x128xf32>
    %cst_9 = arith.constant 1.000000e+30 : f32
    %10 = vector.broadcast %cst_9 : f32 to vector<128x128xf32>
    %11 = arith.mulf %9, %10 : vector<128x128xf32>
    %12 = vector.extract_strided_slice %4 {offsets = [0, 0], sizes = [1, 128], strides = [1, 1]} : vector<2x128xf32> to vector<1x128xf32>
    %13 = vector.extract_strided_slice %5 {offsets = [0, 0], sizes = [128, 1], strides = [1, 1]} : vector<128x2xf32> to vector<128x1xf32>
    %14 = vector.broadcast %12 : vector<1x128xf32> to vector<128x128xf32>
    %15 = vector.broadcast %13 : vector<128x1xf32> to vector<128x128xf32>
    %16 = arith.addf %14, %15 : vector<128x128xf32>
    %17 = arith.addf %11, %16 : vector<128x128xf32>
    %18 = vector.extract_strided_slice %6 {offsets = [0, 0], sizes = [1, 128], strides = [1, 1]} : vector<8x128xf32> to vector<1x128xf32>
    %19 = vector.extract_strided_slice %7 {offsets = [0, 0], sizes = [128, 1], strides = [1, 1]} : vector<128x8xf32> to vector<128x1xf32>
    %20 = vector.broadcast %18 : vector<1x128xf32> to vector<128x128xf32>
    %21 = vector.broadcast %19 : vector<128x1xf32> to vector<128x128xf32>
    %22 = arith.addf %20, %21 : vector<128x128xf32>
    %c0_10 = arith.constant 0 : index
    %c0_11 = arith.constant 0 : index
    %23 = memref.load %arg6[%c0_10, %c0_11] : memref<2x8xf32, #tpu.memory_space<smem>>
    %24 = math.absf %22 : vector<128x128xf32>
    %25 = vector.broadcast %23 : f32 to vector<128x128xf32>
    %26 = arith.mulf %25, %24 : vector<128x128xf32>
    %27 = arith.addf %17, %26 : vector<128x128xf32>
    %28 = vector.extract_strided_slice %6 {offsets = [1, 0], sizes = [1, 128], strides = [1, 1]} : vector<8x128xf32> to vector<1x128xf32>
    %29 = vector.extract_strided_slice %7 {offsets = [0, 1], sizes = [128, 1], strides = [1, 1]} : vector<128x8xf32> to vector<128x1xf32>
    %30 = vector.broadcast %28 : vector<1x128xf32> to vector<128x128xf32>
    %31 = vector.broadcast %29 : vector<128x1xf32> to vector<128x128xf32>
    %32 = arith.addf %30, %31 : vector<128x128xf32>
    %c0_12 = arith.constant 0 : index
    %c1 = arith.constant 1 : index
    %33 = memref.load %arg6[%c0_12, %c1] : memref<2x8xf32, #tpu.memory_space<smem>>
    %34 = math.absf %32 : vector<128x128xf32>
    %35 = vector.broadcast %33 : f32 to vector<128x128xf32>
    %36 = arith.mulf %35, %34 : vector<128x128xf32>
    %37 = arith.addf %27, %36 : vector<128x128xf32>
    %38 = vector.extract_strided_slice %6 {offsets = [2, 0], sizes = [1, 128], strides = [1, 1]} : vector<8x128xf32> to vector<1x128xf32>
    %39 = vector.extract_strided_slice %7 {offsets = [0, 2], sizes = [128, 1], strides = [1, 1]} : vector<128x8xf32> to vector<128x1xf32>
    %40 = vector.broadcast %38 : vector<1x128xf32> to vector<128x128xf32>
    %41 = vector.broadcast %39 : vector<128x1xf32> to vector<128x128xf32>
    %42 = arith.addf %40, %41 : vector<128x128xf32>
    %c0_13 = arith.constant 0 : index
    %c2 = arith.constant 2 : index
    %43 = memref.load %arg6[%c0_13, %c2] : memref<2x8xf32, #tpu.memory_space<smem>>
    %44 = math.absf %42 : vector<128x128xf32>
    %45 = vector.broadcast %43 : f32 to vector<128x128xf32>
    %46 = arith.mulf %45, %44 : vector<128x128xf32>
    %47 = arith.addf %37, %46 : vector<128x128xf32>
    %48 = vector.extract_strided_slice %6 {offsets = [3, 0], sizes = [1, 128], strides = [1, 1]} : vector<8x128xf32> to vector<1x128xf32>
    %49 = vector.extract_strided_slice %7 {offsets = [0, 3], sizes = [128, 1], strides = [1, 1]} : vector<128x8xf32> to vector<128x1xf32>
    %50 = vector.broadcast %48 : vector<1x128xf32> to vector<128x128xf32>
    %51 = vector.broadcast %49 : vector<128x1xf32> to vector<128x128xf32>
    %52 = arith.addf %50, %51 : vector<128x128xf32>
    %c0_14 = arith.constant 0 : index
    %c3 = arith.constant 3 : index
    %53 = memref.load %arg6[%c0_14, %c3] : memref<2x8xf32, #tpu.memory_space<smem>>
    %54 = math.absf %52 : vector<128x128xf32>
    %55 = vector.broadcast %53 : f32 to vector<128x128xf32>
    %56 = arith.mulf %55, %54 : vector<128x128xf32>
    %57 = arith.addf %47, %56 : vector<128x128xf32>
    %58 = vector.extract_strided_slice %6 {offsets = [4, 0], sizes = [1, 128], strides = [1, 1]} : vector<8x128xf32> to vector<1x128xf32>
    %59 = vector.extract_strided_slice %7 {offsets = [0, 4], sizes = [128, 1], strides = [1, 1]} : vector<128x8xf32> to vector<128x1xf32>
    %60 = vector.broadcast %58 : vector<1x128xf32> to vector<128x128xf32>
    %61 = vector.broadcast %59 : vector<128x1xf32> to vector<128x128xf32>
    %62 = arith.addf %60, %61 : vector<128x128xf32>
    %c0_15 = arith.constant 0 : index
    %c4 = arith.constant 4 : index
    %63 = memref.load %arg6[%c0_15, %c4] : memref<2x8xf32, #tpu.memory_space<smem>>
    %64 = math.absf %62 : vector<128x128xf32>
    %65 = vector.broadcast %63 : f32 to vector<128x128xf32>
    %66 = arith.mulf %65, %64 : vector<128x128xf32>
    %67 = arith.addf %57, %66 : vector<128x128xf32>
    %68 = vector.extract_strided_slice %6 {offsets = [5, 0], sizes = [1, 128], strides = [1, 1]} : vector<8x128xf32> to vector<1x128xf32>
    %69 = vector.extract_strided_slice %7 {offsets = [0, 5], sizes = [128, 1], strides = [1, 1]} : vector<128x8xf32> to vector<128x1xf32>
    %70 = vector.broadcast %68 : vector<1x128xf32> to vector<128x128xf32>
    %71 = vector.broadcast %69 : vector<128x1xf32> to vector<128x128xf32>
    %72 = arith.addf %70, %71 : vector<128x128xf32>
    %c0_16 = arith.constant 0 : index
    %c5 = arith.constant 5 : index
    %73 = memref.load %arg6[%c0_16, %c5] : memref<2x8xf32, #tpu.memory_space<smem>>
    %74 = math.absf %72 : vector<128x128xf32>
    %75 = vector.broadcast %73 : f32 to vector<128x128xf32>
    %76 = arith.mulf %75, %74 : vector<128x128xf32>
    %77 = arith.addf %67, %76 : vector<128x128xf32>
    %78 = vector.extract_strided_slice %6 {offsets = [6, 0], sizes = [1, 128], strides = [1, 1]} : vector<8x128xf32> to vector<1x128xf32>
    %79 = vector.extract_strided_slice %7 {offsets = [0, 6], sizes = [128, 1], strides = [1, 1]} : vector<128x8xf32> to vector<128x1xf32>
    %80 = vector.broadcast %78 : vector<1x128xf32> to vector<128x128xf32>
    %81 = vector.broadcast %79 : vector<128x1xf32> to vector<128x128xf32>
    %82 = arith.addf %80, %81 : vector<128x128xf32>
    %c0_17 = arith.constant 0 : index
    %c6 = arith.constant 6 : index
    %83 = memref.load %arg6[%c0_17, %c6] : memref<2x8xf32, #tpu.memory_space<smem>>
    %84 = math.absf %82 : vector<128x128xf32>
    %85 = vector.broadcast %83 : f32 to vector<128x128xf32>
    %86 = arith.mulf %85, %84 : vector<128x128xf32>
    %87 = arith.addf %77, %86 : vector<128x128xf32>
    %88 = vector.extract_strided_slice %6 {offsets = [7, 0], sizes = [1, 128], strides = [1, 1]} : vector<8x128xf32> to vector<1x128xf32>
    %89 = vector.extract_strided_slice %7 {offsets = [0, 7], sizes = [128, 1], strides = [1, 1]} : vector<128x8xf32> to vector<128x1xf32>
    %90 = vector.broadcast %88 : vector<1x128xf32> to vector<128x128xf32>
    %91 = vector.broadcast %89 : vector<128x1xf32> to vector<128x128xf32>
    %92 = arith.addf %90, %91 : vector<128x128xf32>
    %c0_18 = arith.constant 0 : index
    %c7 = arith.constant 7 : index
    %93 = memref.load %arg6[%c0_18, %c7] : memref<2x8xf32, #tpu.memory_space<smem>>
    %94 = math.absf %92 : vector<128x128xf32>
    %95 = vector.broadcast %93 : f32 to vector<128x128xf32>
    %96 = arith.mulf %95, %94 : vector<128x128xf32>
    %97 = arith.addf %87, %96 : vector<128x128xf32>
    %cst_19 = arith.constant dense<0xFF800000> : vector<128xf32>
    %98 = vector.multi_reduction <maximumf>, %97, %cst_19 [1] : vector<128x128xf32> to vector<128xf32>
    %99 = vector.shape_cast %98 : vector<128xf32> to vector<128x1xf32>
    %100 = vector.broadcast %99 : vector<128x1xf32> to vector<128x128xf32>
    %101 = arith.subf %97, %100 : vector<128x128xf32>
    %102 = math.exp %101 : vector<128x128xf32>
    %cst_20 = arith.constant dense<0.000000e+00> : vector<128xf32>
    %103 = vector.multi_reduction <add>, %102, %cst_20 [1] : vector<128x128xf32> to vector<128xf32>
    %104 = vector.shape_cast %103 : vector<128xf32> to vector<128x1xf32>
    %105 = arith.truncf %102 : vector<128x128xf32> to vector<128x128xbf16>
    %106 = arith.truncf %6 : vector<8x128xf32> to vector<8x128xbf16>
    %cst_21 = arith.constant dense<0.000000e+00> : vector<128x8xf32>
    %107 = tpu.matmul %105, %106, %cst_21 {dimension_numbers = #tpu.dot_dimension_numbers<[1], [1], [0], [0], [0, 0, 1, 0], [], []>} : vector<128x128xbf16>, vector<8x128xbf16>, vector<128x8xf32> -> vector<128x8xf32>
    %108 = tpu.reciprocal %104 {approx = true} : vector<128x1xf32> -> vector<128x1xf32>
    %109 = vector.broadcast %108 : vector<128x1xf32> to vector<128x8xf32>
    %110 = arith.mulf %107, %109 : vector<128x8xf32>
    %111 = vector.extract_strided_slice %2 {offsets = [8, 0], sizes = [8, 128], strides = [1, 1]} : vector<16x128xf32> to vector<8x128xf32>
    %112 = vector.extract_strided_slice %3 {offsets = [0, 8], sizes = [128, 8], strides = [1, 1]} : vector<128x16xf32> to vector<128x8xf32>
    %cst_22 = arith.constant 1.000000e+00 : f32
    %113 = vector.broadcast %cst_22 : f32 to vector<128x128xf32>
    %114 = arith.subf %1, %113 : vector<128x128xf32>
    %cst_23 = arith.constant 1.000000e+30 : f32
    %115 = vector.broadcast %cst_23 : f32 to vector<128x128xf32>
    %116 = arith.mulf %114, %115 : vector<128x128xf32>
    %117 = vector.extract_strided_slice %4 {offsets = [1, 0], sizes = [1, 128], strides = [1, 1]} : vector<2x128xf32> to vector<1x128xf32>
    %118 = vector.extract_strided_slice %5 {offsets = [0, 1], sizes = [128, 1], strides = [1, 1]} : vector<128x2xf32> to vector<128x1xf32>
    %119 = vector.broadcast %117 : vector<1x128xf32> to vector<128x128xf32>
    %120 = vector.broadcast %118 : vector<128x1xf32> to vector<128x128xf32>
    %121 = arith.addf %119, %120 : vector<128x128xf32>
    %122 = arith.addf %116, %121 : vector<128x128xf32>
    %123 = vector.extract_strided_slice %111 {offsets = [0, 0], sizes = [1, 128], strides = [1, 1]} : vector<8x128xf32> to vector<1x128xf32>
    %124 = vector.extract_strided_slice %112 {offsets = [0, 0], sizes = [128, 1], strides = [1, 1]} : vector<128x8xf32> to vector<128x1xf32>
    %125 = vector.broadcast %123 : vector<1x128xf32> to vector<128x128xf32>
    %126 = vector.broadcast %124 : vector<128x1xf32> to vector<128x128xf32>
    %127 = arith.addf %125, %126 : vector<128x128xf32>
    %c1_24 = arith.constant 1 : index
    %c0_25 = arith.constant 0 : index
    %128 = memref.load %arg6[%c1_24, %c0_25] : memref<2x8xf32, #tpu.memory_space<smem>>
    %129 = math.absf %127 : vector<128x128xf32>
    %130 = vector.broadcast %128 : f32 to vector<128x128xf32>
    %131 = arith.mulf %130, %129 : vector<128x128xf32>
    %132 = arith.addf %122, %131 : vector<128x128xf32>
    %133 = vector.extract_strided_slice %111 {offsets = [1, 0], sizes = [1, 128], strides = [1, 1]} : vector<8x128xf32> to vector<1x128xf32>
    %134 = vector.extract_strided_slice %112 {offsets = [0, 1], sizes = [128, 1], strides = [1, 1]} : vector<128x8xf32> to vector<128x1xf32>
    %135 = vector.broadcast %133 : vector<1x128xf32> to vector<128x128xf32>
    %136 = vector.broadcast %134 : vector<128x1xf32> to vector<128x128xf32>
    %137 = arith.addf %135, %136 : vector<128x128xf32>
    %c1_26 = arith.constant 1 : index
    %c1_27 = arith.constant 1 : index
    %138 = memref.load %arg6[%c1_26, %c1_27] : memref<2x8xf32, #tpu.memory_space<smem>>
    %139 = math.absf %137 : vector<128x128xf32>
    %140 = vector.broadcast %138 : f32 to vector<128x128xf32>
    %141 = arith.mulf %140, %139 : vector<128x128xf32>
    %142 = arith.addf %132, %141 : vector<128x128xf32>
    %143 = vector.extract_strided_slice %111 {offsets = [2, 0], sizes = [1, 128], strides = [1, 1]} : vector<8x128xf32> to vector<1x128xf32>
    %144 = vector.extract_strided_slice %112 {offsets = [0, 2], sizes = [128, 1], strides = [1, 1]} : vector<128x8xf32> to vector<128x1xf32>
    %145 = vector.broadcast %143 : vector<1x128xf32> to vector<128x128xf32>
    %146 = vector.broadcast %144 : vector<128x1xf32> to vector<128x128xf32>
    %147 = arith.addf %145, %146 : vector<128x128xf32>
    %c1_28 = arith.constant 1 : index
    %c2_29 = arith.constant 2 : index
    %148 = memref.load %arg6[%c1_28, %c2_29] : memref<2x8xf32, #tpu.memory_space<smem>>
    %149 = math.absf %147 : vector<128x128xf32>
    %150 = vector.broadcast %148 : f32 to vector<128x128xf32>
    %151 = arith.mulf %150, %149 : vector<128x128xf32>
    %152 = arith.addf %142, %151 : vector<128x128xf32>
    %153 = vector.extract_strided_slice %111 {offsets = [3, 0], sizes = [1, 128], strides = [1, 1]} : vector<8x128xf32> to vector<1x128xf32>
    %154 = vector.extract_strided_slice %112 {offsets = [0, 3], sizes = [128, 1], strides = [1, 1]} : vector<128x8xf32> to vector<128x1xf32>
    %155 = vector.broadcast %153 : vector<1x128xf32> to vector<128x128xf32>
    %156 = vector.broadcast %154 : vector<128x1xf32> to vector<128x128xf32>
    %157 = arith.addf %155, %156 : vector<128x128xf32>
    %c1_30 = arith.constant 1 : index
    %c3_31 = arith.constant 3 : index
    %158 = memref.load %arg6[%c1_30, %c3_31] : memref<2x8xf32, #tpu.memory_space<smem>>
    %159 = math.absf %157 : vector<128x128xf32>
    %160 = vector.broadcast %158 : f32 to vector<128x128xf32>
    %161 = arith.mulf %160, %159 : vector<128x128xf32>
    %162 = arith.addf %152, %161 : vector<128x128xf32>
    %163 = vector.extract_strided_slice %111 {offsets = [4, 0], sizes = [1, 128], strides = [1, 1]} : vector<8x128xf32> to vector<1x128xf32>
    %164 = vector.extract_strided_slice %112 {offsets = [0, 4], sizes = [128, 1], strides = [1, 1]} : vector<128x8xf32> to vector<128x1xf32>
    %165 = vector.broadcast %163 : vector<1x128xf32> to vector<128x128xf32>
    %166 = vector.broadcast %164 : vector<128x1xf32> to vector<128x128xf32>
    %167 = arith.addf %165, %166 : vector<128x128xf32>
    %c1_32 = arith.constant 1 : index
    %c4_33 = arith.constant 4 : index
    %168 = memref.load %arg6[%c1_32, %c4_33] : memref<2x8xf32, #tpu.memory_space<smem>>
    %169 = math.absf %167 : vector<128x128xf32>
    %170 = vector.broadcast %168 : f32 to vector<128x128xf32>
    %171 = arith.mulf %170, %169 : vector<128x128xf32>
    %172 = arith.addf %162, %171 : vector<128x128xf32>
    %173 = vector.extract_strided_slice %111 {offsets = [5, 0], sizes = [1, 128], strides = [1, 1]} : vector<8x128xf32> to vector<1x128xf32>
    %174 = vector.extract_strided_slice %112 {offsets = [0, 5], sizes = [128, 1], strides = [1, 1]} : vector<128x8xf32> to vector<128x1xf32>
    %175 = vector.broadcast %173 : vector<1x128xf32> to vector<128x128xf32>
    %176 = vector.broadcast %174 : vector<128x1xf32> to vector<128x128xf32>
    %177 = arith.addf %175, %176 : vector<128x128xf32>
    %c1_34 = arith.constant 1 : index
    %c5_35 = arith.constant 5 : index
    %178 = memref.load %arg6[%c1_34, %c5_35] : memref<2x8xf32, #tpu.memory_space<smem>>
    %179 = math.absf %177 : vector<128x128xf32>
    %180 = vector.broadcast %178 : f32 to vector<128x128xf32>
    %181 = arith.mulf %180, %179 : vector<128x128xf32>
    %182 = arith.addf %172, %181 : vector<128x128xf32>
    %183 = vector.extract_strided_slice %111 {offsets = [6, 0], sizes = [1, 128], strides = [1, 1]} : vector<8x128xf32> to vector<1x128xf32>
    %184 = vector.extract_strided_slice %112 {offsets = [0, 6], sizes = [128, 1], strides = [1, 1]} : vector<128x8xf32> to vector<128x1xf32>
    %185 = vector.broadcast %183 : vector<1x128xf32> to vector<128x128xf32>
    %186 = vector.broadcast %184 : vector<128x1xf32> to vector<128x128xf32>
    %187 = arith.addf %185, %186 : vector<128x128xf32>
    %c1_36 = arith.constant 1 : index
    %c6_37 = arith.constant 6 : index
    %188 = memref.load %arg6[%c1_36, %c6_37] : memref<2x8xf32, #tpu.memory_space<smem>>
    %189 = math.absf %187 : vector<128x128xf32>
    %190 = vector.broadcast %188 : f32 to vector<128x128xf32>
    %191 = arith.mulf %190, %189 : vector<128x128xf32>
    %192 = arith.addf %182, %191 : vector<128x128xf32>
    %193 = vector.extract_strided_slice %111 {offsets = [7, 0], sizes = [1, 128], strides = [1, 1]} : vector<8x128xf32> to vector<1x128xf32>
    %194 = vector.extract_strided_slice %112 {offsets = [0, 7], sizes = [128, 1], strides = [1, 1]} : vector<128x8xf32> to vector<128x1xf32>
    %195 = vector.broadcast %193 : vector<1x128xf32> to vector<128x128xf32>
    %196 = vector.broadcast %194 : vector<128x1xf32> to vector<128x128xf32>
    %197 = arith.addf %195, %196 : vector<128x128xf32>
    %c1_38 = arith.constant 1 : index
    %c7_39 = arith.constant 7 : index
    %198 = memref.load %arg6[%c1_38, %c7_39] : memref<2x8xf32, #tpu.memory_space<smem>>
    %199 = math.absf %197 : vector<128x128xf32>
    %200 = vector.broadcast %198 : f32 to vector<128x128xf32>
    %201 = arith.mulf %200, %199 : vector<128x128xf32>
    %202 = arith.addf %192, %201 : vector<128x128xf32>
    %cst_40 = arith.constant dense<0xFF800000> : vector<128xf32>
    %203 = vector.multi_reduction <maximumf>, %202, %cst_40 [1] : vector<128x128xf32> to vector<128xf32>
    %204 = vector.shape_cast %203 : vector<128xf32> to vector<128x1xf32>
    %205 = vector.broadcast %204 : vector<128x1xf32> to vector<128x128xf32>
    %206 = arith.subf %202, %205 : vector<128x128xf32>
    %207 = math.exp %206 : vector<128x128xf32>
    %cst_41 = arith.constant dense<0.000000e+00> : vector<128xf32>
    %208 = vector.multi_reduction <add>, %207, %cst_41 [1] : vector<128x128xf32> to vector<128xf32>
    %209 = vector.shape_cast %208 : vector<128xf32> to vector<128x1xf32>
    %210 = arith.truncf %207 : vector<128x128xf32> to vector<128x128xbf16>
    %211 = arith.truncf %111 : vector<8x128xf32> to vector<8x128xbf16>
    %cst_42 = arith.constant dense<0.000000e+00> : vector<128x8xf32>
    %212 = tpu.matmul %210, %211, %cst_42 {dimension_numbers = #tpu.dot_dimension_numbers<[1], [1], [0], [0], [0, 0, 1, 0], [], []>} : vector<128x128xbf16>, vector<8x128xbf16>, vector<128x8xf32> -> vector<128x8xf32>
    %213 = tpu.reciprocal %209 {approx = true} : vector<128x1xf32> -> vector<128x1xf32>
    %214 = vector.broadcast %213 : vector<128x1xf32> to vector<128x8xf32>
    %215 = arith.mulf %212, %214 : vector<128x8xf32>
    %216 = tpu.concatenate %110, %215 in 1 : vector<128x8xf32>, vector<128x8xf32> -> vector<128x16xf32>
    %c0_43 = arith.constant 0 : index
    %c0_44 = arith.constant 0 : index
    %217 = vector.load %arg7[%c0_43, %c0_44] : memref<1x16xf32, #tpu.memory_space<vmem>>, vector<1x16xf32>
    %218 = vector.broadcast %217 : vector<1x16xf32> to vector<128x16xf32>
    %219 = arith.addf %216, %218 : vector<128x16xf32>
    %cst_45 = arith.constant 0.000000e+00 : f32
    %220 = vector.broadcast %cst_45 : f32 to vector<128x16xf32>
    %221 = arith.cmpf ogt, %219, %220 : vector<128x16xf32>
    %cst_46 = arith.constant 0.000000e+00 : f32
    %222 = vector.broadcast %cst_46 : f32 to vector<128x16xf32>
    %223 = arith.minimumf %219, %222 : vector<128x16xf32>
    %224 = math.exp %223 : vector<128x16xf32>
    %cst_47 = arith.constant 1.000000e+00 : f32
    %225 = vector.broadcast %cst_47 : f32 to vector<128x16xf32>
    %226 = arith.subf %224, %225 : vector<128x16xf32>
    %227 = arith.select %221, %219, %226 : vector<128x16xi1>, vector<128x16xf32>
    %cst_48 = arith.constant 0.000000e+00 : f32
    %228 = vector.broadcast %cst_48 : f32 to vector<128x112xf32>
    %229 = tpu.concatenate %227, %228 in 1 : vector<128x16xf32>, vector<128x112xf32> -> vector<128x128xf32>
    %230 = arith.truncf %229 : vector<128x128xf32> to vector<128x128xbf16>
    %c0_49 = arith.constant 0 : index
    %c0_50 = arith.constant 0 : index
    %231 = vector.load %arg8[%c0_49, %c0_50] : memref<128x128xbf16, #tpu.memory_space<vmem>>, vector<128x128xbf16>
    tpu.vector_store %arg8[%c0_49, %c0_50], %230 {strides = array<i32>} : memref<128x128xbf16, #tpu.memory_space<vmem>>, vector<128x128xbf16>,
    return
  }
  func.func @transform_0(%arg0: i32) -> (i32, i32) {
    %c0_i32 = arith.constant 0 : i32
    %c0_i32_0 = arith.constant 0 : i32
    %c0_i32_1 = arith.constant 0 : i32
    return %c0_i32, %c0_i32_0 : i32, i32
  }
  func.func @transform_1(%arg0: i32) -> (i32, i32) {
    %c0_i32 = arith.constant 0 : i32
    %c0_i32_0 = arith.constant 0 : i32
    return %arg0, %c0_i32 : i32, i32
  }
  func.func @transform_2(%arg0: i32) -> (i32, i32) {
    %c0_i32 = arith.constant 0 : i32
    %c0_i32_0 = arith.constant 0 : i32
    %c0_i32_1 = arith.constant 0 : i32
    return %c0_i32, %c0_i32_0 : i32, i32
  }
  func.func @transform_3(%arg0: i32) -> (i32, i32) {
    %c0_i32 = arith.constant 0 : i32
    %c0_i32_0 = arith.constant 0 : i32
    return %arg0, %c0_i32 : i32, i32
  }
  func.func @transform_4(%arg0: i32) -> (i32, i32) {
    %c0_i32 = arith.constant 0 : i32
    %c0_i32_0 = arith.constant 0 : i32
    return %arg0, %c0_i32 : i32, i32
  }
  func.func @transform_5(%arg0: i32) -> (i32, i32) {
    %c0_i32 = arith.constant 0 : i32
    %c0_i32_0 = arith.constant 0 : i32
    %c0_i32_1 = arith.constant 0 : i32
    return %c0_i32, %c0_i32_0 : i32, i32
  }
  func.func @transform_6(%arg0: i32) -> (i32, i32) {
    %c0_i32 = arith.constant 0 : i32
    %c0_i32_0 = arith.constant 0 : i32
    %c0_i32_1 = arith.constant 0 : i32
    return %c0_i32, %c0_i32_0 : i32, i32
  }
  func.func @transform_7(%arg0: i32) -> (i32, i32) {
    %c0_i32 = arith.constant 0 : i32
    %c0_i32_0 = arith.constant 0 : i32
    return %arg0, %c0_i32 : i32, i32
  }
}

</mosaic_0001>

<bundles_post_ra>
// kernel: tpu_custom_call.1
= control target key start
LH: loop header
LB: loop body
LE: loop exit
PB: predicated region body
PF: predicated region fallthrough
CT: control target
= control target key end

     0   :  { %12 = vsyncpa [#allocation4], 0  ;;  %s6493_s0 = inlined_call_operand.vmem [shape: f32[16,128], index: 0, kind: input, shape index: {}]   ;;  %s6494_s1 = inlined_call_operand.vmem [shape: f32[128,16], index: 1, kind: input, shape index: {}]   ;;  %s6495_s2 = inlined_call_operand.vmem [shape: f32[2,128], index: 2, kind: input, shape index: {}]   ;;  %s6496_s3 = inlined_call_operand.vmem [shape: f32[128,2], index: 3, kind: input, shape index: {}]   ;;  %s6497_s4 = inlined_call_operand.vmem [shape: s8[128,128], index: 4, kind: input, shape index: {}]   ;;  %s6498_s5 = inlined_call_operand.vmem [shape: f32[2,8], index: 5, kind: input, shape index: {}]   ;;  %s6499_s6 = inlined_call_operand.vmem [shape: f32[1,16], index: 6, kind: input, shape index: {}]   ;;  %s6500_s7 = inlined_call_operand.hbm [shape: bf16[128,128], index: 7, kind: output, shape index: {}]  }
   0x1   :  { %13 = vsyncpa [#allocation3], 0  ;;  %s30_s26 = sshll.u32 %s6498_s5, 4  ;;  %s31_s26 = int_to_ptr.vmem [resolvable:$true] %s30_s26 }
   0x2   :  { %s3802_s27 = scalar_lea.vmem %s31_s26, 32  ;;  %p3807_p1 = scmp.lt.s32.totalorder %s31_s26, %s31_s26 }
   0x3   :  { %p3803_p0 = scmp.ne.s32.totalorder %s31_s26, %s3802_s27  ;;  %p3808_p2 = scmp.lt.s32.totalorder %s3802_s27, %s3802_s27 }
   0x5   :  { %p3809_p3 = por %p3808_p2, %p3807_p1 }
   0x7   :  { %p3810_p4 = pnand %p3809_p3, %p3803_p0 }
   0x9   :  { %3813 = shalt.err (!%p3810_p4)
}
   0xa   :  { %s3840_s28 = smov [#allocation2]  }
   0xb   :  { %33 = dma.vmem_to_smem %s31_s26, 32, %s3840_s28, [#allocation4]  }
   0xc   :  { %3836 = dma.done.wait [#allocation4], 32  }
   0xd   :  { %3837 = vsyncadd [#allocation4], 4294967264 }
   0xe   :  { %39 = sfence }
   0xf   :  { %v98_v0 = vld [vmem:[%s6496_s3 + $0x10] sm:$0xff]  ;;  %v96_v1 = vld [vmem:[%s6496_s3] sm:$0xff]  ;;  %v3841_v2 = vmov 0   ;;  %v99_v3 = vld [vmem:[%s6496_s3 + $0x18] sm:$0xff]  ;;  %v6501_v33 = vmov 1   ;;  %v3843_v34 = vmov 2  }
  0x10   :  { %3537 = vset.pattern.permute.xlu1 %v3841_v2  ;;  %3536 = vset.pattern.permute.xlu0 %v3841_v2  ;;  %v97_v4 = vld [vmem:[%s6496_s3 + $0x8] sm:$0xff]  ;;  %v100_v6 = vld [vmem:[%s6496_s3 + $0x20] sm:$0xff]  ;;  %v103_v7 = vld [vmem:[%s6496_s3 + $0x38] sm:$0xff]  ;;  %v3844_v35 = vmov 3   ;;  %v3845_v36 = vmov 4   ;;  %v3846_v53 = vmov 5  }
  0x11   :  { %160 = vperm.xlu1 %3537, %v98_v0   ;;  %150 = vperm.xlu0 %3536, %v96_v1   ;;  %v101_v5 = vld [vmem:[%s6496_s3 + $0x28] sm:$0xff]  ;;  %v102_v8 = vld [vmem:[%s6496_s3 + $0x30] sm:$0xff]  ;;  %v104_v10 = vld [vmem:[%s6496_s3 + $0x40] sm:$0xff]  ;;  %s4337_s30 = sld [smem:[#allocation2]]  ;;  %s4351_s8 = sld [smem:[#allocation2 + $0x1]]  ;;  %vm3084_vm0 = vcmask 64512  }
  0x12   :  { %v105_v9 = vld [vmem:[%s6496_s3 + $0x48] sm:$0xff]  ;;  %v107_v11 = vld [vmem:[%s6496_s3 + $0x58] sm:$0xff]  ;;  %v106_v12 = vld [vmem:[%s6496_s3 + $0x50] sm:$0xff]  ;;  %s4355_s9 = sld [smem:[#allocation2 + $0x2]]  ;;  %s4359_s5 = sld [smem:[#allocation2 + $0x3]]  ;;  %vm3220_vm2 = vcmask 130048  }
  0x13   :  { %v109_v13 = vld [vmem:[%s6496_s3 + $0x68] sm:$0xff]  ;;  %v108_v14 = vld [vmem:[%s6496_s3 + $0x60] sm:$0xff]  ;;  %v111_v15 = vld [vmem:[%s6496_s3 + $0x78] sm:$0xff]  ;;  %s4389_s12 = sld [smem:[#allocation2 + $0x4]]  ;;  %s4541_s13 = sld [smem:[#allocation2 + $0x5]] }
  0x14   :  { %v110_v16 = vld [vmem:[%s6496_s3 + $0x70] sm:$0xff]  ;;  %v3955_v17 = vld [vmem:[%s6494_s1 + $0x8] sm:$0xff]  ;;  %v3960_v18 = vld [vmem:[%s6494_s1] sm:$0xff]  ;;  %s4661_s14 = sld [smem:[#allocation2 + $0x6]]  ;;  %s4717_s15 = sld [smem:[#allocation2 + $0x7]] }
  0x15   :  { %165 = vperm.xlu1 %3537, %v99_v3   ;;  %155 = vperm.xlu0 %3536, %v97_v4   ;;  %v3967_v19 = vld [vmem:[%s6494_s1 + $0x18] sm:$0xff]  ;;  %v3972_v20 = vld [vmem:[%s6494_s1 + $0x10] sm:$0xff]  ;;  %v3979_v21 = vld [vmem:[%s6494_s1 + $0x28] sm:$0xff]  ;;  %s3359_s11 = sld [smem:[#allocation2 + $0x82]]  ;;  %s3363_s16 = sld [smem:[#allocation2 + $0x86]] }
  0x16   :  { %v3984_v22 = vld [vmem:[%s6494_s1 + $0x20] sm:$0xff]  ;;  %v3991_v23 = vld [vmem:[%s6494_s1 + $0x38] sm:$0xff]  ;;  %v3996_v24 = vld [vmem:[%s6494_s1 + $0x30] sm:$0xff]  ;;  %s3364_s19 = sld [smem:[#allocation2 + $0x87]] }
  0x17   :  { %v4003_v25 = vld [vmem:[%s6494_s1 + $0x48] sm:$0xff]  ;;  %v4008_v26 = vld [vmem:[%s6494_s1 + $0x40] sm:$0xff]  ;;  %v4015_v27 = vld [vmem:[%s6494_s1 + $0x58] sm:$0xff] }
  0x18   :  { %v4020_v28 = vld [vmem:[%s6494_s1 + $0x50] sm:$0xff]  ;;  %v4027_v29 = vld [vmem:[%s6494_s1 + $0x68] sm:$0xff]  ;;  %v4032_v30 = vld [vmem:[%s6494_s1 + $0x60] sm:$0xff] }
  0x19   :  { %175 = vperm.xlu1 %3537, %v101_v5   ;;  %170 = vperm.xlu0 %3536, %v100_v6   ;;  %v4039_v31 = vld [vmem:[%s6494_s1 + $0x78] sm:$0xff]  ;;  %v4044_v32 = vld [vmem:[%s6494_s1 + $0x70] sm:$0xff]  ;;  %v3847_v6 = vmov 6  }
  0x1d   :  { %185 = vperm.xlu1 %3537, %v103_v7   ;;  %180 = vperm.xlu0 %3536, %v102_v8  }
  0x21   :  { %195 = vperm.xlu1 %3537, %v105_v9   ;;  %190 = vperm.xlu0 %3536, %v104_v10  }
  0x25   :  { %205 = vperm.xlu1 %3537, %v107_v11   ;;  %200 = vperm.xlu0 %3536, %v106_v12  }
  0x29   :  { %215 = vperm.xlu1 %3537, %v109_v13   ;;  %210 = vperm.xlu0 %3536, %v108_v14  }
  0x2d   :  { %225 = vperm.xlu1 %3537, %v111_v15   ;;  %220 = vperm.xlu0 %3536, %v110_v16  }
  0x31   :  { %271 = vperm.xlu1 %3537, %v3955_v17   ;;  %266 = vperm.xlu0 %3536, %v3960_v18  }
  0x35   :  { %281 = vperm.xlu1 %3537, %v3967_v19   ;;  %276 = vperm.xlu0 %3536, %v3972_v20  }
  0x39   :  { %291 = vperm.xlu1 %3537, %v3979_v21   ;;  %286 = vperm.xlu0 %3536, %v3984_v22  }
  0x3d   :  { %301 = vperm.xlu1 %3537, %v3991_v23   ;;  %296 = vperm.xlu0 %3536, %v3996_v24  }
  0x41   :  { %311 = vperm.xlu1 %3537, %v4003_v25   ;;  %306 = vperm.xlu0 %3536, %v4008_v26  }
  0x45   :  { %321 = vperm.xlu1 %3537, %v4015_v27   ;;  %316 = vperm.xlu0 %3536, %v4020_v28  }
  0x49   :  { %331 = vperm.xlu1 %3537, %v4027_v29   ;;  %326 = vperm.xlu0 %3536, %v4032_v30  }
  0x4d   :  { %341 = vperm.xlu1 %3537, %v4039_v31   ;;  %336 = vperm.xlu0 %3536, %v4044_v32  }
  0x51   :  { %3538 = vset.pattern.permute.xlu1 %v6501_v33  ;;  %3540 = vset.pattern.permute.xlu0 %v3843_v34  ;;  %v6503_v33 = vmov 7  }
  0x52   :  { %419 = vperm.xlu1 %3538, %v3955_v17   ;;  %553 = vperm.xlu0 %3540, %v3955_v17  }
  0x56   :  { %423 = vperm.xlu1 %3538, %v3972_v20   ;;  %565 = vperm.xlu0 %3540, %v3984_v22  }
  0x5a   :  { %431 = vperm.xlu1 %3538, %v3984_v22   ;;  %573 = vperm.xlu0 %3540, %v3996_v24  }
  0x5e   :  { %439 = vperm.xlu1 %3538, %v3996_v24   ;;  %581 = vperm.xlu0 %3540, %v4008_v26  }
  0x62   :  { %447 = vperm.xlu1 %3538, %v4008_v26   ;;  %589 = vperm.xlu0 %3540, %v4020_v28  }
  0x66   :  { %455 = vperm.xlu1 %3538, %v4020_v28   ;;  %597 = vperm.xlu0 %3540, %v4032_v30  }
  0x6a   :  { %463 = vperm.xlu1 %3538, %v4032_v30   ;;  %605 = vperm.xlu0 %3540, %v4044_v32  }
  0x6e   :  { %471 = vperm.xlu1 %3538, %v4044_v32   ;;  %3541 = vset.pattern.permute.xlu0 %v3844_v35 }
  0x6f   :  { %683 = vperm.xlu0 %3541, %v3960_v18  }
  0x72   :  { %3539 = vset.pattern.permute.xlu1 %v3843_v34 }
  0x73   :  { %549 = vperm.xlu1 %3539, %v3960_v18   ;;  %695 = vperm.xlu0 %3541, %v3967_v19  }
  0x77   :  { %557 = vperm.xlu1 %3539, %v3972_v20   ;;  %703 = vperm.xlu0 %3541, %v3979_v21  }
  0x7b   :  { %561 = vperm.xlu1 %3539, %v3967_v19   ;;  %711 = vperm.xlu0 %3541, %v3991_v23  }
  0x7f   :  { %569 = vperm.xlu1 %3539, %v3979_v21   ;;  %719 = vperm.xlu0 %3541, %v4003_v25  }
  0x83   :  { %577 = vperm.xlu1 %3539, %v3991_v23   ;;  %727 = vperm.xlu0 %3541, %v4015_v27  }
  0x87   :  { %585 = vperm.xlu1 %3539, %v4003_v25   ;;  %735 = vperm.xlu0 %3541, %v4027_v29  }
  0x8b   :  { %593 = vperm.xlu1 %3539, %v4015_v27   ;;  %743 = vperm.xlu0 %3541, %v4039_v31  }
  0x8f   :  { %601 = vperm.xlu1 %3539, %v4027_v29   ;;  %3544 = vset.pattern.permute.xlu0 %v3845_v36 }
  0x90   :  { %v4080_v37 = vpop.permute.xlu1 %160  ;;  %v4082_v38 = vpop.permute.xlu0 %150  ;;  %821 = vperm.xlu0 %3544, %v3955_v17  }
  0x93   :  { %609 = vperm.xlu1 %3539, %v4039_v31  }
  0x94   :  { %v4086_v39 = vpop.permute.xlu1 %165  ;;  %v4088_v40 = vpop.permute.xlu0 %155  ;;  %833 = vperm.xlu0 %3544, %v3984_v22  }
  0x97   :  { %3542 = vset.pattern.permute.xlu1 %v3844_v35 }
  0x98   :  { %v4091_v41 = vpop.permute.xlu1 %175  ;;  %v4093_v42 = vpop.permute.xlu0 %170  ;;  %687 = vperm.xlu1 %3542, %v3955_v17   ;;  %841 = vperm.xlu0 %3544, %v3996_v24  }
  0x9c   :  { %v4097_v43 = vpop.permute.xlu1 %185  ;;  %v4099_v44 = vpop.permute.xlu0 %180  ;;  %691 = vperm.xlu1 %3542, %v3972_v20   ;;  %849 = vperm.xlu0 %3544, %v4008_v26  }
  0xa0   :  { %v4103_v45 = vpop.permute.xlu1 %195  ;;  %v4105_v46 = vpop.permute.xlu0 %190  ;;  %699 = vperm.xlu1 %3542, %v3984_v22   ;;  %857 = vperm.xlu0 %3544, %v4020_v28  }
  0xa4   :  { %v4109_v47 = vpop.permute.xlu1 %205  ;;  %v4111_v48 = vpop.permute.xlu0 %200  ;;  %707 = vperm.xlu1 %3542, %v3996_v24   ;;  %865 = vperm.xlu0 %3544, %v4032_v30  }
  0xa8   :  { %v4115_v49 = vpop.permute.xlu1 %215  ;;  %v4117_v50 = vpop.permute.xlu0 %210  ;;  %715 = vperm.xlu1 %3542, %v4008_v26   ;;  %873 = vperm.xlu0 %3544, %v4044_v32  }
  0xac   :  { %v4121_v51 = vpop.permute.xlu1 %225  ;;  %v4123_v52 = vpop.permute.xlu0 %220  ;;  %723 = vperm.xlu1 %3542, %v4020_v28   ;;  %3545 = vset.pattern.permute.xlu0 %v3846_v53 }
  0xad   :  { %951 = vperm.xlu0 %3545, %v3960_v18  }
  0xb0   :  { %v4127_v54 = vpop.permute.xlu1 %271  ;;  %731 = vperm.xlu1 %3542, %v4032_v30   ;;  %v4130_v55 = vpop.permute.xlu0 %266 }
  0xb1   :  { %963 = vperm.xlu0 %3545, %v3967_v19  }
  0xb4   :  { %v4133_v56 = vpop.permute.xlu1 %281  ;;  %739 = vperm.xlu1 %3542, %v4044_v32   ;;  %v4136_v57 = vpop.permute.xlu0 %276 }
  0xb5   :  { %971 = vperm.xlu0 %3545, %v3979_v21  }
  0xb8   :  { %v4139_v58 = vpop.permute.xlu1 %291  ;;  %3543 = vset.pattern.permute.xlu1 %v3845_v36  ;;  %v4141_v59 = vpop.permute.xlu0 %286 }
  0xb9   :  { %817 = vperm.xlu1 %3543, %v3960_v18   ;;  %979 = vperm.xlu0 %3545, %v3991_v23  }
  0xbc   :  { %v4145_v60 = vpop.permute.xlu1 %301  ;;  %v4147_v61 = vpop.permute.xlu0 %296 }
  0xbd   :  { %825 = vperm.xlu1 %3543, %v3972_v20   ;;  %987 = vperm.xlu0 %3545, %v4003_v25  }
  0xc0   :  { %v4151_v62 = vpop.permute.xlu1 %311  ;;  %v4153_v63 = vpop.permute.xlu0 %306 }
  0xc1   :  { %829 = vperm.xlu1 %3543, %v3967_v19   ;;  %995 = vperm.xlu0 %3545, %v4015_v27  }
  0xc4   :  { %v4157_v0 = vpop.permute.xlu1 %321  ;;  %v4159_v1 = vpop.permute.xlu0 %316 }
  0xc5   :  { %6548 = vst [vmem:[#allocation8_spill] sm:$0xff] %v4157_v0  ;;  %6549 = vst [vmem:[#allocation9_spill] sm:$0xff] %v4159_v1  ;;  %837 = vperm.xlu1 %3543, %v3979_v21   ;;  %1003 = vperm.xlu0 %3545, %v4027_v29  }
  0xc8   :  { %v4163_v2 = vpop.permute.xlu1 %331  ;;  %v4165_v3 = vpop.permute.xlu0 %326 }
  0xc9   :  { %6550 = vst [vmem:[#allocation10_spill] sm:$0xff] %v4163_v2  ;;  %6551 = vst [vmem:[#allocation11_spill] sm:$0xff] %v4165_v3  ;;  %845 = vperm.xlu1 %3543, %v3991_v23   ;;  %1011 = vperm.xlu0 %3545, %v4039_v31  }
  0xcc   :  { %v4169_v4 = vpop.permute.xlu1 %341  ;;  %v4171_v5 = vpop.permute.xlu0 %336 }
  0xcd   :  { %6552 = vst [vmem:[#allocation12_spill] sm:$0xff] %v4169_v4  ;;  %6553 = vst [vmem:[#allocation13_spill] sm:$0xff] %v4171_v5  ;;  %853 = vperm.xlu1 %3543, %v4003_v25   ;;  %3548 = vset.pattern.permute.xlu0 %v3847_v6 }
  0xce   :  { %1089 = vperm.xlu0 %3548, %v3955_v17  }
  0xd1   :  { %v4175_v7 = vpop.permute.xlu1 %419  ;;  %861 = vperm.xlu1 %3543, %v4015_v27   ;;  %v4178_v8 = vpop.permute.xlu0 %553 }
  0xd2   :  { %6554 = vst [vmem:[#allocation14_spill] sm:$0xff] %v4175_v7  ;;  %6555 = vst [vmem:[#allocation15_spill] sm:$0xff] %v4178_v8  ;;  %1101 = vperm.xlu0 %3548, %v3984_v22  }
  0xd5   :  { %v4181_v9 = vpop.permute.xlu1 %423  ;;  %869 = vperm.xlu1 %3543, %v4027_v29   ;;  %v4184_v10 = vpop.permute.xlu0 %565 }
  0xd6   :  { %6556 = vst [vmem:[#allocation16_spill] sm:$0xff] %v4181_v9  ;;  %6557 = vst [vmem:[#allocation17_spill] sm:$0xff] %v4184_v10  ;;  %1109 = vperm.xlu0 %3548, %v3996_v24  }
  0xd9   :  { %v4187_v11 = vpop.permute.xlu1 %431  ;;  %877 = vperm.xlu1 %3543, %v4039_v31   ;;  %v4190_v12 = vpop.permute.xlu0 %573 }
  0xda   :  { %6558 = vst [vmem:[#allocation18_spill] sm:$0xff] %v4187_v11  ;;  %6559 = vst [vmem:[#allocation19_spill] sm:$0xff] %v4190_v12  ;;  %1117 = vperm.xlu0 %3548, %v4008_v26   ;;  %v6596_v11 = vmov 7  }
  0xdd   :  { %v4193_v13 = vpop.permute.xlu1 %439  ;;  %3546 = vset.pattern.permute.xlu1 %v3846_v53  ;;  %v4195_v14 = vpop.permute.xlu0 %581 }
  0xde   :  { %6560 = vst [vmem:[#allocation20_spill] sm:$0xff] %v4193_v13  ;;  %6561 = vst [vmem:[#allocation21_spill] sm:$0xff] %v4195_v14  ;;  %955 = vperm.xlu1 %3546, %v3955_v17   ;;  %1125 = vperm.xlu0 %3548, %v4020_v28   ;;  %v44_v13 = vld [vmem:[%s6497_s4 + $0x18] sm:$0xff] }
  0xdf   :  { %v60_v0 = vunpack.c.3.s8 %v44_v13 }
  0xe1   :  { %v4199_v15 = vpop.permute.xlu1 %447  ;;  %v4201_v16 = vpop.permute.xlu0 %589 }
  0xe2   :  { %6562 = vst [vmem:[#allocation22_spill] sm:$0xff] %v4199_v15  ;;  %6563 = vst [vmem:[#allocation23_spill] sm:$0xff] %v4201_v16  ;;  %959 = vperm.xlu1 %3546, %v3972_v20   ;;  %1133 = vperm.xlu0 %3548, %v4032_v30   ;;  %v43_v15 = vld [vmem:[%s6497_s4 + $0x10] sm:$0xff] }
  0xe3   :  { %v55_v3 = vunpack.c.2.s8 %v43_v15 }
  0xe5   :  { %v4205_v34 = vpop.permute.xlu1 %455  ;;  %v4207_v35 = vpop.permute.xlu0 %597 }
  0xe6   :  { %6564 = vst [vmem:[#allocation24_spill] sm:$0xff] %v4205_v34  ;;  %6565 = vst [vmem:[#allocation25_spill] sm:$0xff] %v4207_v35  ;;  %967 = vperm.xlu1 %3546, %v3984_v22   ;;  %1141 = vperm.xlu0 %3548, %v4044_v32  }
  0xe9   :  { %v4211_v36 = vpop.permute.xlu1 %463  ;;  %v4213_v53 = vpop.permute.xlu0 %605 }
  0xea   :  { %6566 = vst [vmem:[#allocation26_spill] sm:$0xff] %v4211_v36  ;;  %6567 = vst [vmem:[#allocation27_spill] sm:$0xff] %v4213_v53  ;;  %975 = vperm.xlu1 %3546, %v3996_v24   ;;  %3549 = vset.pattern.permute.xlu0 %v6503_v33 }
  0xeb   :  { %1219 = vperm.xlu0 %3549, %v3960_v18  }
  0xed   :  { %v4218_v16 = vpop.permute.xlu1 %471 }
  0xee   :  { %6568 = vst [vmem:[#allocation28_spill] sm:$0xff] %v4218_v16  ;;  %983 = vperm.xlu1 %3546, %v4008_v26   ;;  %v4221_v35 = vpop.permute.xlu0 %683 }
  0xef   :  { %6569 = vst [vmem:[#allocation29_spill] sm:$0xff] %v4221_v35  ;;  %1231 = vperm.xlu0 %3549, %v3967_v19  }
  0xf2   :  { %991 = vperm.xlu1 %3546, %v4020_v28   ;;  %v4225_v14 = vpop.permute.xlu1 %549  ;;  %v4227_v53 = vpop.permute.xlu0 %695 }
  0xf3   :  { %6570 = vst [vmem:[#allocation30_spill] sm:$0xff] %v4225_v14  ;;  %6571 = vst [vmem:[#allocation31_spill] sm:$0xff] %v4227_v53  ;;  %1239 = vperm.xlu0 %3549, %v3979_v21  }
  0xf6   :  { %999 = vperm.xlu1 %3546, %v4032_v30   ;;  %v4231_v33 = vpop.permute.xlu1 %557  ;;  %v4233_v12 = vpop.permute.xlu0 %703 }
  0xf7   :  { %6572 = vst [vmem:[#allocation32_spill] sm:$0xff] %v4231_v33  ;;  %6573 = vst [vmem:[#allocation33_spill] sm:$0xff] %v4233_v12  ;;  %1247 = vperm.xlu0 %3549, %v3991_v23  }
  0xfa   :  { %1007 = vperm.xlu1 %3546, %v4044_v32   ;;  %v4237_v35 = vpop.permute.xlu1 %561  ;;  %v4239_v16 = vpop.permute.xlu0 %711 }
  0xfb   :  { %6574 = vst [vmem:[#allocation34_spill] sm:$0xff] %v4237_v35  ;;  %6575 = vst [vmem:[#allocation35_spill] sm:$0xff] %v4239_v16  ;;  %1255 = vperm.xlu0 %3549, %v4003_v25  }
  0xfe   :  { %3547 = vset.pattern.permute.xlu1 %v3847_v6  ;;  %v4242_v53 = vpop.permute.xlu1 %569  ;;  %v4244_v14 = vpop.permute.xlu0 %719 }
  0xff   :  { %6576 = vst [vmem:[#allocation36_spill] sm:$0xff] %v4242_v53  ;;  %6577 = vst [vmem:[#allocation37_spill] sm:$0xff] %v4244_v14  ;;  %1085 = vperm.xlu1 %3547, %v3960_v18   ;;  %1263 = vperm.xlu0 %3549, %v4015_v27   ;;  %v144_v53 = vlaneseq }
 0x102   :  { %v4248_v12 = vpop.permute.xlu1 %577  ;;  %v4250_v33 = vpop.permute.xlu0 %727 }
 0x103   :  { %6578 = vst [vmem:[#allocation38_spill] sm:$0xff] %v4248_v12  ;;  %6579 = vst [vmem:[#allocation39_spill] sm:$0xff] %v4250_v33  ;;  %1093 = vperm.xlu1 %3547, %v3972_v20   ;;  %1271 = vperm.xlu0 %3549, %v4027_v29   ;;  %v6584_v12 = vmov 1  }
 0x106   :  { %v4254_v16 = vpop.permute.xlu1 %585  ;;  %v4256_v35 = vpop.permute.xlu0 %735 }
 0x107   :  { %6580 = vst [vmem:[#allocation40_spill] sm:$0xff] %v4254_v16  ;;  %6581 = vst [vmem:[#allocation41_spill] sm:$0xff] %v4256_v35  ;;  %1097 = vperm.xlu1 %3547, %v3967_v19   ;;  %1279 = vperm.xlu0 %3549, %v4039_v31  }
 0x10a   :  { %v4260_v6 = vpop.permute.xlu1 %593  ;;  %v4262_v14 = vpop.permute.xlu0 %743 }
 0x10b   :  { %6582 = vst [vmem:[#allocation42_spill] sm:$0xff] %v4260_v6  ;;  %6583 = vst [vmem:[#allocation43_spill] sm:$0xff] %v4262_v14  ;;  %1105 = vperm.xlu1 %3547, %v3979_v21   ;;  %3551 = vset.pattern.permute.xlu0 %v6584_v12  ;;  %v58_v12 = vunpack.c.1.s8 %v44_v13 }
 0x10c   :  { %415 = vperm.xlu0 %3551, %v3960_v18  }
 0x10e   :  { %v4267_v33 = vpop.permute.xlu1 %601 }
 0x10f   :  { %6585 = vst [vmem:[#allocation44_spill] sm:$0xff] %v4267_v33  ;;  %1113 = vperm.xlu1 %3547, %v3991_v23   ;;  %v4270_v16 = vpop.permute.xlu0 %821  ;;  %v41_v33 = vld [vmem:[%s6497_s4] sm:$0xff] }
 0x110   :  { %6586 = vst [vmem:[#allocation45_spill] sm:$0xff] %v4270_v16  ;;  %427 = vperm.xlu0 %3551, %v3967_v19   ;;  %v45_v16 = vunpack.c.0.s8 %v41_v33 }
 0x112   :  { %v4273_v35 = vpop.permute.xlu1 %609  ;;  %v61_v9 = vcvt.s32.f32 %v45_v16 }
 0x113   :  { %6587 = vst [vmem:[#allocation46_spill] sm:$0xff] %v4273_v35  ;;  %1121 = vperm.xlu1 %3547, %v4003_v25   ;;  %v4276_v6 = vpop.permute.xlu0 %833 }
 0x114   :  { %6588 = vst [vmem:[#allocation47_spill] sm:$0xff] %v4276_v6  ;;  %435 = vperm.xlu0 %3551, %v3979_v21   ;;  %v47_v6 = vunpack.c.2.s8 %v41_v33  ;;  %v42_v21 = vld [vmem:[%s6497_s4 + $0x8] sm:$0xff] }
 0x115   :  { %v50_v36 = vunpack.c.1.s8 %v42_v21  ;;  %v52_v10 = vunpack.c.3.s8 %v42_v21  ;;  %v51_v8 = vunpack.c.2.s8 %v42_v21 }
 0x117   :  { %1129 = vperm.xlu1 %3547, %v4015_v27   ;;  %v4280_v14 = vpop.permute.xlu1 %687  ;;  %v4282_v18 = vpop.permute.xlu0 %841  ;;  %v67_v2 = vcvt.s32.f32 %v51_v8  ;;  %v71_v8 = vcvt.s32.f32 %v55_v3 }
 0x118   :  { %6589 = vst [vmem:[#allocation48_spill] sm:$0xff] %v4280_v14  ;;  %6590 = vst [vmem:[#allocation49_spill] sm:$0xff] %v4282_v18  ;;  %443 = vperm.xlu0 %3551, %v3991_v23   ;;  %v48_v18 = vunpack.c.3.s8 %v41_v33  ;;  %v46_v14 = vunpack.c.1.s8 %v41_v33 }
 0x11a   :  { %v62_v33 = vcvt.s32.f32 %v46_v14  ;;  %v3334_v14 = vadd.f32 -1.0, %v61_v9 }
 0x11b   :  { %1137 = vperm.xlu1 %3547, %v4027_v29   ;;  %v4289_v19 = vpop.permute.xlu1 %691  ;;  %v4291_v35 = vpop.permute.xlu0 %849 }
 0x11c   :  { %6591 = vst [vmem:[#allocation50_spill] sm:$0xff] %v4289_v19  ;;  %6592 = vst [vmem:[#allocation51_spill] sm:$0xff] %v4291_v35  ;;  %451 = vperm.xlu0 %3551, %v4003_v25   ;;  %v63_v19 = vcvt.s32.f32 %v47_v6  ;;  %v49_v35 = vunpack.c.0.s8 %v42_v21  ;;  %v64_v25 = vcvt.s32.f32 %v48_v18  ;;  %v54_v6 = vunpack.c.1.s8 %v43_v15 }
 0x11d   :  { %v53_v18 = vunpack.c.0.s8 %v43_v15  ;;  %v56_v21 = vunpack.c.3.s8 %v43_v15 }
 0x11e   :  { %v3336_v16 = vadd.f32 -1.0, %v63_v19  ;;  %v65_v4 = vcvt.s32.f32 %v49_v35 }
 0x11f   :  { %1145 = vperm.xlu1 %3547, %v4039_v31   ;;  %v4298_v23 = vpop.permute.xlu1 %699  ;;  %v4300_v34 = vpop.permute.xlu0 %857  ;;  %v69_v15 = vcvt.s32.f32 %v53_v18 }
 0x120   :  { %6593 = vst [vmem:[#allocation52_spill] sm:$0xff] %v4298_v23  ;;  %6594 = vst [vmem:[#allocation53_spill] sm:$0xff] %v4300_v34  ;;  %459 = vperm.xlu0 %3551, %v4015_v27   ;;  %v4309_v23 = vshrl.u32 %v144_v53, 7  ;;  %v66_v34 = vcvt.s32.f32 %v50_v36  ;;  %v68_v27 = vcvt.s32.f32 %v52_v10  ;;  %v3337_v36 = vadd.f32 -1.0, %v64_v25 }
 0x121   :  { %v3335_v53 = vadd.f32 -1.0, %v62_v33  ;;  %v4322_v35 = vmul.f32 1e+30, %v3336_v16  ;;  %v72_v25 = vcvt.s32.f32 %v56_v21  ;;  %v74_v33 = vcvt.s32.f32 %v58_v12 }
 0x122   :  { %6595 = vst [vmem:[#allocation54_spill] sm:$0xff] %v4309_v23  ;;  %v3339_v1 = vadd.f32 -1.0, %v66_v34  ;;  %v3341_v9 = vadd.f32 -1.0, %v68_v27  ;;  %v4328_v34 = vmul.f32 1e+30, %v3337_v36  ;;  %v76_v27 = vcvt.s32.f32 %v60_v0 }
 0x123   :  { %3550 = vset.pattern.permute.xlu1 %v6596_v11  ;;  %v4312_v7 = vpop.permute.xlu1 %707  ;;  %v4314_v5 = vpop.permute.xlu0 %865  ;;  %v57_v11 = vunpack.c.0.s8 %v44_v13  ;;  %6600 = vst [vmem:[#allocation58_spill] sm:$0xff] %v4322_v35  ;;  %v3347_v0 = vadd.f32 -1.0, %v74_v33 }
 0x124   :  { %6597 = vst [vmem:[#allocation55_spill] sm:$0xff] %v4312_v7  ;;  %6598 = vst [vmem:[#allocation56_spill] sm:$0xff] %v4314_v5  ;;  %1223 = vperm.xlu1 %3550, %v3955_v17   ;;  %467 = vperm.xlu0 %3551, %v4027_v29   ;;  %v70_v7 = vcvt.s32.f32 %v54_v6  ;;  %v59_v5 = vunpack.c.2.s8 %v44_v13  ;;  %v3338_v17 = vadd.f32 -1.0, %v65_v4  ;;  %v4325_v29 = vmul.f32 1e+30, %v3334_v14 }
 0x125   :  { %6602 = vst [vmem:[#allocation60_spill] sm:$0xff] %v4328_v34  ;;  %v4330_v13 = vmul.f32 1e+30, %v3335_v53  ;;  %v3340_v6 = vadd.f32 -1.0, %v67_v2  ;;  %v95_v4 = vld [vmem:[%s6495_s2] sm:$0x3] }
 0x126   :  { %6601 = vst [vmem:[#allocation59_spill] sm:$0xff] %v4325_v29  ;;  %v4335_v16 = vmul.f32 1e+30, %v3339_v1  ;;  %v75_v18 = vcvt.s32.f32 %v59_v5  ;;  %v4344_v12 = vmul.f32 1e+30, %v3338_v17  ;;  %v3342_v14 = vadd.f32 -1.0, %v69_v15 }
 0x127   :  { %v4318_v19 = vpop.permute.xlu1 %715  ;;  %v4320_v10 = vpop.permute.xlu0 %873  ;;  %6603 = vst [vmem:[#allocation61_spill] sm:$0xff] %v4330_v13  ;;  %v4346_v2 = vmul.f32 1e+30, %v3341_v9  ;;  %v3345_v1 = vadd.f32 -1.0, %v72_v25  ;;  %v4353_v5 = vmul.f32 1e+30, %v3340_v6 }
 0x128   :  { %6599 = vst [vmem:[#allocation57_spill] sm:$0xff] %v4320_v10  ;;  %1227 = vperm.xlu1 %3550, %v3972_v20   ;;  %475 = vperm.xlu0 %3551, %v4039_v31   ;;  %v73_v10 = vcvt.s32.f32 %v57_v11  ;;  %6604 = vst [vmem:[#allocation62_spill] sm:$0xff] %v4335_v16  ;;  %v3343_v20 = vadd.f32 -1.0, %v70_v7  ;;  %v4342_v31 = vsub.s32 0, %v4309_v23  ;;  %v3344_v7 = vadd.f32 -1.0, %v71_v8 }
 0x129   :  { %6607 = vst [vmem:[#allocation65_spill] sm:$0xff] %v4344_v12  ;;  %6608 = vst [vmem:[#allocation66_spill] sm:$0xff] %v4346_v2  ;;  %v3349_v11 = vadd.f32 -1.0, %v76_v27  ;;  %v3348_v17 = vadd.f32 -1.0, %v75_v18  ;;  %v4366_v15 = vmul.f32 1e+30, %v3342_v14 }
 0x12a   :  { %6606 = vst [vmem:[#allocation64_spill] sm:$0xff] %v4342_v31  ;;  %6610 = vst [vmem:[#allocation68_spill] sm:$0xff] %v4353_v5  ;;  %v3346_v36 = vadd.f32 -1.0, %v73_v10  ;;  %v4357_v53 = vmul.f32 1e+30, %v3343_v20  ;;  %v4371_v10 = vld [vmem:[%s6493_s0] sm:$0xff] }
 0x12b   :  { %v4339_v3 = vpop.permute.xlu1 %723  ;;  %6613 = vst [vmem:[#allocation71_spill] sm:$0xff] %v4366_v15  ;;  %v4374_v25 = vsub.s32 1, %v4309_v23  ;;  %v4380_v6 = vmul.f32 1e+30, %v3345_v1  ;;  %v4384_v20 = vmul.f32 1e+30, %v3347_v0  ;;  %v4400_v1 = vrot.slane %v4371_v10, %v4342_v31 }
 0x12c   :  { %6605 = vst [vmem:[#allocation63_spill] sm:$0xff] %v4339_v3  ;;  %1235 = vperm.xlu1 %3550, %v3984_v22   ;;  %v4349_v21 = vpop.permute.xlu0 %951  ;;  %6611 = vst [vmem:[#allocation69_spill] sm:$0xff] %v4357_v53  ;;  %v4364_v22 = vrot.slane %v95_v4, %v4342_v31  ;;  %v4382_v4 = vmul.f32 1e+30, %v3344_v7  ;;  %v4386_v27 = vmul.f32 1e+30, %v3346_v36 }
 0x12d   :  { %6609 = vst [vmem:[#allocation67_spill] sm:$0xff] %v4349_v21  ;;  %6614 = vst [vmem:[#allocation72_spill] sm:$0xff] %v4374_v25  ;;  %v4391_v14 = vmul.f32 1e+30, %v3349_v11  ;;  %v4393_v8 = vmul.f32 1e+30, %v3348_v17  ;;  %v4410_v11 = vrot.slane %v4371_v10, %v4374_v25  ;;  %v4433_v21 = vstv %s4355_s9 }
 0x12e   :  { %6616 = vst [vmem:[#allocation74_spill] sm:$0xff] %v4380_v6  ;;  %6617 = vst [vmem:[#allocation75_spill] sm:$0xff] %v4382_v4  ;;  %v230_v0 = vadd.f32 %v4080_v37, %v4364_v22  ;;  %v228_v36 = vadd.f32 %v4082_v38, %v4364_v22  ;;  %v6624_v17 = vsub.s32 2, %v4309_v23  ;;  %v231_v37 = vadd.f32 %v4086_v39, %v4364_v22  ;;  %s3357_s9 = sld [smem:[#allocation2 + $0x80]] }
 0x12f   :  { %v4361_v9 = vpop.permute.xlu1 %731  ;;  %6618 = vst [vmem:[#allocation76_spill] sm:$0xff] %v4384_v20  ;;  %6619 = vst [vmem:[#allocation77_spill] sm:$0xff] %v4386_v27  ;;  %v229_v38 = vadd.f32 %v4088_v40, %v4364_v22  ;;  %v235_v39 = vadd.f32 %v4097_v43, %v4364_v22  ;;  %v234_v40 = vadd.f32 %v4099_v44, %v4364_v22 }
 0x130   :  { %6612 = vst [vmem:[#allocation70_spill] sm:$0xff] %v4361_v9  ;;  %1243 = vperm.xlu1 %3550, %v3996_v24   ;;  %v4378_v33 = vpop.permute.xlu0 %963  ;;  %6620 = vst [vmem:[#allocation78_spill] sm:$0xff] %v4391_v14  ;;  %v4396_v24 = vstv %s4337_s30  ;;  %v4415_v18 = vrot.slane %v4371_v10, %v6624_v17  ;;  %v232_v17 = vadd.f32 %v4093_v42, %v4364_v22 }
 0x131   :  { %6615 = vst [vmem:[#allocation73_spill] sm:$0xff] %v4378_v33  ;;  %6621 = vst [vmem:[#allocation79_spill] sm:$0xff] %v4393_v8  ;;  %v233_v33 = vadd.f32 %v4091_v41, %v4364_v22  ;;  %v237_v25 = vadd.f32 %v4103_v45, %v4364_v22  ;;  %v4447_v41 = vstv %s4359_s5  ;;  %v4450_v42 = vadd.f32 %v230_v0, %v4322_v35 }
 0x132   :  { %6623 = vst [vmem:[#allocation81_spill] sm:$0xff] %v4410_v11  ;;  %v4453_v9 = vadd.f32 %v228_v36, %v4325_v29  ;;  %v345_v43 = vadd.f32 %v4127_v54, %v4400_v1  ;;  %v4463_v45 = vadd.f32 %v231_v37, %v4328_v34  ;;  %v245_v3 = vadd.f32 %v229_v38, %v4330_v13  ;;  %v6630_v34 = vld [vmem:[#allocation8_spill] sm:$0xff] }
 0x133   :  { %v4402_v7 = vpop.permute.xlu1 %739  ;;  %v239_v0 = vadd.f32 %v4109_v47, %v4364_v22  ;;  %v6628_v36 = vsub.s32 4, %v4309_v23  ;;  %v4476_v54 = vadd.f32 %v233_v33, %v4335_v16  ;;  %v344_v37 = vadd.f32 %v4130_v55, %v4400_v1 }
 0x134   :  { %6622 = vst [vmem:[#allocation80_spill] sm:$0xff] %v4402_v7  ;;  %1251 = vperm.xlu1 %3550, %v4008_v26   ;;  %v4418_v31 = vpop.permute.xlu0 %971  ;;  %v4425_v7 = vstv %s4351_s8  ;;  %v6627_v26 = vsub.s32 3, %v4309_v23  ;;  %v4484_v38 = vstv %s4389_s12  ;;  %v4487_v47 = vadd.f32 %v235_v39, %v4346_v2  ;;  %s3360_s12 = sld [smem:[#allocation2 + $0x83]] }
 0x135   :  { %6625 = vst [vmem:[#allocation82_spill] sm:$0xff] %v4418_v31  ;;  %6626 = vst [vmem:[#allocation83_spill] sm:$0xff] %v4425_v7  ;;  %v4471_v35 = vrot.slane %v4371_v10, %v6628_v36  ;;  %v4490_v13 = vadd.f32 %v234_v40, %v4353_v5  ;;  %v4493_v36 = vadd.f32 %v237_v25, %v4357_v53  ;;  %v362_v39 = vand.u32 2147483647, %v345_v43 }
 0x136   :  { %v4438_v31 = vrot.slane %v4371_v10, %v6627_v26  ;;  %v236_v26 = vadd.f32 %v4105_v46, %v4364_v22  ;;  %6629 = vst [vmem:[#allocation84_spill] sm:$0xff] %v4484_v38  ;;  %v238_v33 = vadd.f32 %v4111_v48, %v4364_v22  ;;  %v241_v55 = vadd.f32 %v4115_v49, %v4364_v22 }
 0x137   :  { %v240_v16 = vadd.f32 %v4117_v50, %v4364_v22  ;;  %v4508_v25 = vadd.f32 %v239_v0, %v4380_v6  ;;  %v243_v48 = vadd.f32 %v4121_v51, %v4364_v22  ;;  %v347_v49 = vadd.f32 %v4133_v56, %v4400_v1 }
 0x138   :  { %1259 = vperm.xlu1 %3550, %v4020_v28   ;;  %v4460_v44 = vpop.permute.xlu1 %817  ;;  %v4473_v46 = vpop.permute.xlu0 %979  ;;  %v4479_v28 = vadd.f32 %v232_v17, %v4344_v12  ;;  %v4498_v17 = vadd.f32 %v236_v26, %v4366_v15  ;;  %v242_v26 = vadd.f32 %v4123_v52, %v4364_v22  ;;  %v361_v50 = vand.u32 2147483647, %v344_v37 }
 0x139   :  { %v349_v43 = vadd.f32 %v4139_v58, %v4400_v1  ;;  %v348_v0 = vadd.f32 %v4141_v59, %v4400_v1  ;;  %v4525_v51 = vadd.f32 %v238_v33, %v4382_v4  ;;  %v351_v52 = vadd.f32 %v4145_v60, %v4400_v1 }
 0x13a   :  { %v350_v56 = vadd.f32 %v4147_v61, %v4400_v1  ;;  %v4533_v37 = vadd.f32 %v241_v55, %v4384_v20  ;;  %v379_v58 = vmul.f32 %v4396_v24, %v362_v39  ;;  %v353_v59 = vadd.f32 %v4151_v62, %v4400_v1 }
 0x13b   :  { %v4547_v61 = vadd.f32 %v243_v48, %v4391_v14  ;;  %v4550_v33 = vadd.f32 %v242_v26, %v4393_v8  ;;  %v364_v55 = vand.u32 2147483647, %v347_v49  ;;  %v378_v62 = vmul.f32 %v4396_v24, %v361_v50  ;;  %v6633_v8 = vld [vmem:[#allocation9_spill] sm:$0xff]  ;;  %v6634_v50 = vld [vmem:[#allocation10_spill] sm:$0xff] }
 0x13c   :  { %1267 = vperm.xlu1 %3550, %v4032_v30   ;;  %v4505_v40 = vpop.permute.xlu1 %825  ;;  %v4516_v53 = vpop.permute.xlu0 %987  ;;  %v346_v30 = vadd.f32 %v4136_v57, %v4400_v1  ;;  %v4536_v57 = vadd.f32 %v240_v16, %v4386_v27  ;;  %v352_v16 = vadd.f32 %v4153_v63, %v4400_v1  ;;  %v366_v20 = vand.u32 2147483647, %v349_v43 }
 0x13d   :  { %v365_v6 = vand.u32 2147483647, %v348_v0  ;;  %v367_v2 = vand.u32 2147483647, %v350_v56  ;;  %v355_v48 = vadd.f32 %v6630_v34, %v4400_v1  ;;  %v6631_v14 = vsub.s32 5, %v4309_v23 }
 0x13e   :  { %v363_v22 = vand.u32 2147483647, %v346_v30  ;;  %v4564_v49 = vadd.f32 %v379_v58, %v245_v3  ;;  %v370_v63 = vand.u32 2147483647, %v353_v59  ;;  %v354_v27 = vadd.f32 %v6633_v8, %v4400_v1  ;;  %v6637_v3 = vld [vmem:[#allocation12_spill] sm:$0xff] }
 0x13f   :  { %v4562_v26 = vrot.slane %v4371_v10, %v6631_v14  ;;  %v357_v30 = vadd.f32 %v6634_v50, %v4400_v1  ;;  %v6635_v0 = vmov 1   ;;  %v381_v34 = vmul.f32 %v4396_v24, %v364_v55  ;;  %v6636_v14 = vld [vmem:[#allocation11_spill] sm:$0xff] }
 0x140   :  { %1275 = vperm.xlu1 %3550, %v4044_v32   ;;  %v4544_v60 = vpop.permute.xlu1 %829  ;;  %v4554_v39 = vpop.permute.xlu0 %995  ;;  %v368_v32 = vand.u32 2147483647, %v351_v52  ;;  %v369_v52 = vand.u32 2147483647, %v352_v16  ;;  %v356_v56 = vadd.f32 %v6636_v14, %v4400_v1  ;;  %v359_v58 = vadd.f32 %v6637_v3, %v4400_v1  ;;  %v6639_v14 = vld [vmem:[#allocation13_spill] sm:$0xff] }
 0x141   :  { %6632 = vst [vmem:[#allocation8_spill] sm:$0xff] %v4562_v26  ;;  %v4581_v8 = vadd.f32 %v378_v62, %v4453_v9  ;;  %v380_v50 = vmul.f32 %v4396_v24, %v363_v22  ;;  %v383_v29 = vmul.f32 %v4396_v24, %v366_v20  ;;  %v384_v16 = vmul.f32 %v4396_v24, %v367_v2 }
 0x142   :  { %v385_v55 = vmul.f32 %v4396_v24, %v368_v32  ;;  %v372_v4 = vand.u32 2147483647, %v355_v48  ;;  %v358_v15 = vadd.f32 %v6639_v14, %v4400_v1  ;;  %v387_v3 = vmul.f32 %v4396_v24, %v370_v63  ;;  %v6642_v63 = vld [vmem:[#allocation14_spill] sm:$0xff] }
 0x143   :  { %6638 = vst [vmem:[#allocation9_spill] sm:$0xff] %v4581_v8  ;;  %v371_v5 = vand.u32 2147483647, %v354_v27  ;;  %v374_v12 = vand.u32 2147483647, %v357_v30  ;;  %v4592_v9 = vstv %s4541_s13  ;;  %v4597_v20 = vadd.f32 %v381_v34, %v4463_v45  ;;  %v6649_v14 = vld [vmem:[#allocation22_spill] sm:$0xff] }
 0x144   :  { %v4570_v43 = vpop.permute.xlu1 %837  ;;  %3552 = vset.pattern.permute.xlu1 %v6635_v0  ;;  %v4578_v59 = vpop.permute.xlu0 %1003  ;;  %v382_v0 = vmul.f32 %v4396_v24, %v365_v6  ;;  %v386_v6 = vmul.f32 %v4396_v24, %v369_v52  ;;  %v373_v22 = vand.u32 2147483647, %v356_v56  ;;  %v376_v32 = vand.u32 2147483647, %v359_v58  ;;  %s3361_s13 = sld [smem:[#allocation2 + $0x84]] }
 0x145   :  { %6640 = vst [vmem:[#allocation10_spill] sm:$0xff] %v4597_v20  ;;  %v4603_v48 = vadd.f32 %v380_v50, %v4450_v42  ;;  %v4606_v1 = vadd.f32 %v383_v29, %v4476_v54  ;;  %v479_v30 = vadd.f32 %v6642_v63, %v4410_v11  ;;  %v4612_v45 = vadd.f32 %v385_v55, %v4487_v47  ;;  %v6647_v55 = vld [vmem:[#allocation15_spill] sm:$0xff] }
 0x146   :  { %v398_v27 = vadd.f32 %v382_v0, %v4479_v28  ;;  %v4615_v34 = vadd.f32 %v384_v16, %v4490_v13  ;;  %v389_v52 = vmul.f32 %v4396_v24, %v372_v4  ;;  %v375_v56 = vand.u32 2147483647, %v358_v15  ;;  %v6645_v28 = vld [vmem:[#allocation18_spill] sm:$0xff]  ;;  %v6646_v15 = vld [vmem:[#allocation20_spill] sm:$0xff] }
 0x147   :  { %6641 = vst [vmem:[#allocation11_spill] sm:$0xff] %v4606_v1  ;;  %6643 = vst [vmem:[#allocation12_spill] sm:$0xff] %v4612_v45  ;;  %v4619_v42 = vadd.f32 %v387_v3, %v4493_v36  ;;  %v388_v29 = vmul.f32 %v4396_v24, %v371_v5  ;;  %v391_v54 = vmul.f32 %v4396_v24, %v374_v12  ;;  %v496_v36 = vand.u32 2147483647, %v479_v30  ;;  %v6648_v12 = vld [vmem:[#allocation16_spill] sm:$0xff] }
 0x148   :  { %v4594_v62 = vpop.permute.xlu1 %845  ;;  %v4600_v2 = vpop.permute.xlu0 %1011  ;;  %v482_v58 = vadd.f32 %v6645_v28, %v4410_v11  ;;  %v402_v47 = vadd.f32 %v386_v6, %v4498_v17  ;;  %v390_v13 = vmul.f32 %v4396_v24, %v373_v22  ;;  %v393_v0 = vmul.f32 %v4396_v24, %v376_v32  ;;  %v6651_v22 = vld [vmem:[#allocation17_spill] sm:$0xff]  ;;  %v6652_v30 = vld [vmem:[#allocation24_spill] sm:$0xff] }
 0x149   :  { %6644 = vst [vmem:[#allocation13_spill] sm:$0xff] %v4619_v42  ;;  %v484_v4 = vadd.f32 %v6646_v15, %v4410_v11  ;;  %v613_v5 = vadd.f32 %v6647_v55, %v4415_v18  ;;  %v480_v16 = vadd.f32 %v6648_v12, %v4410_v11  ;;  %v486_v3 = vadd.f32 %v6649_v14, %v4410_v11  ;;  %v6654_v14 = vld [vmem:[#allocation26_spill] sm:$0xff] }
 0x14a   :  { %v4641_v17 = vadd.f32 %v389_v52, %v4508_v25  ;;  %v392_v6 = vmul.f32 %v4396_v24, %v375_v56  ;;  %v616_v32 = vadd.f32 %v6651_v22, %v4415_v18  ;;  %v488_v28 = vadd.f32 %v6652_v30, %v4410_v11 }
 0x14b   :  { %v404_v15 = vadd.f32 %v388_v29, %v4525_v51  ;;  %v4650_v55 = vadd.f32 %v391_v54, %v4533_v37  ;;  %v499_v12 = vand.u32 2147483647, %v482_v58  ;;  %v490_v42 = vadd.f32 %v6654_v14, %v4410_v11 }
 0x14c   :  { %v4625_v50 = vpop.permute.xlu1 %853  ;;  %6650 = vst [vmem:[#allocation14_spill] sm:$0xff] %v4641_v17  ;;  %v406_v25 = vadd.f32 %v390_v13, %v4536_v57  ;;  %v4658_v24 = vadd.f32 %v393_v0, %v4547_v61  ;;  %v501_v52 = vand.u32 2147483647, %v484_v4  ;;  %v513_v51 = vmul.f32 %v4425_v7, %v496_v36  ;;  %v6656_v57 = vld [vmem:[#allocation19_spill] sm:$0xff]  ;;  %v6657_v4 = vld [vmem:[#allocation21_spill] sm:$0xff]  ;;  %v6658_v36 = vld [vmem:[#allocation28_spill] sm:$0xff] }
 0x14d   :  { %v4638_v63 = vpop.permute.xlu0 %1089  ;;  %6653 = vst [vmem:[#allocation18_spill] sm:$0xff] %v4650_v55  ;;  %v630_v37 = vand.u32 2147483647, %v613_v5  ;;  %v497_v29 = vand.u32 2147483647, %v480_v16  ;;  %v408_v22 = vadd.f32 %v392_v6, %v4550_v33  ;;  %v618_v13 = vadd.f32 %v6656_v57, %v4415_v18  ;;  %v6659_v33 = vld [vmem:[#allocation23_spill] sm:$0xff] }
 0x14e   :  { %6655 = vst [vmem:[#allocation20_spill] sm:$0xff] %v4658_v24  ;;  %v503_v54 = vand.u32 2147483647, %v486_v3  ;;  %v633_v30 = vand.u32 2147483647, %v616_v32  ;;  %v516_v0 = vmul.f32 %v4425_v7, %v499_v12  ;;  %v620_v14 = vadd.f32 %v6657_v4, %v4415_v18  ;;  %v6660_v32 = vld [vmem:[#allocation25_spill] sm:$0xff] }
 0x14f   :  { %v505_v61 = vand.u32 2147483647, %v488_v28  ;;  %v507_v56 = vand.u32 2147483647, %v490_v42  ;;  %v492_v5 = vadd.f32 %v6658_v36, %v4410_v11  ;;  %v518_v3 = vmul.f32 %v4425_v7, %v501_v52  ;;  %v6662_v17 = vld [vmem:[#allocation27_spill] sm:$0xff] }
 0x150   :  { %v4654_v45 = vpop.permute.xlu1 %861  ;;  %v622_v6 = vadd.f32 %v6659_v33, %v4415_v18  ;;  %v624_v57 = vadd.f32 %v6660_v32, %v4415_v18  ;;  %v6661_v28 = vsub.s32 6, %v4309_v23  ;;  %v529_v42 = vadd.f32 %v513_v51, %v4564_v49 }
 0x151   :  { %v4664_v58 = vpop.permute.xlu0 %1101  ;;  %v647_v4 = vmul.f32 %v4433_v21, %v630_v37  ;;  %v514_v36 = vmul.f32 %v4425_v7, %v497_v29  ;;  %v520_v52 = vmul.f32 %v4425_v7, %v503_v54  ;;  %v650_v33 = vmul.f32 %v4433_v21, %v633_v30 }
 0x152   :  { %v4684_v12 = vrot.slane %v4371_v10, %v6661_v28  ;;  %v635_v55 = vand.u32 2147483647, %v618_v13  ;;  %v522_v32 = vmul.f32 %v4425_v7, %v505_v61  ;;  %v626_v28 = vadd.f32 %v6662_v17, %v4415_v18  ;;  %v6664_v17 = vld [vmem:[#allocation29_spill] sm:$0xff] }
 0x153   :  { %v532_v1 = vadd.f32 %v516_v0, %v398_v27  ;;  %v637_v20 = vand.u32 2147483647, %v620_v14  ;;  %v524_v49 = vmul.f32 %v4425_v7, %v507_v56  ;;  %v509_v51 = vand.u32 2147483647, %v492_v5 }
 0x154   :  { %v4674_v16 = vpop.permute.xlu1 %869  ;;  %v534_v29 = vadd.f32 %v518_v3, %v4615_v34  ;;  %v639_v54 = vand.u32 2147483647, %v622_v6  ;;  %v641_v8 = vand.u32 2147483647, %v624_v57  ;;  %v4701_v11 = vstv %s4661_s14  ;;  %v6665_v34 = vld [vmem:[#allocation32_spill] sm:$0xff] }
 0x155   :  { %v4690_v24 = vpop.permute.xlu0 %1109  ;;  %6663 = vst [vmem:[#allocation15_spill] sm:$0xff] %v4701_v11  ;;  %v4703_v30 = vadd.f32 %v647_v4, %v529_v42  ;;  %v530_v13 = vadd.f32 %v514_v36, %v4603_v48  ;;  %v536_v61 = vadd.f32 %v520_v52, %v402_v47  ;;  %v746_v27 = vadd.f32 %v6664_v17, %v4438_v31 }
 0x156   :  { %v652_v56 = vmul.f32 %v4433_v21, %v635_v55  ;;  %v538_v14 = vadd.f32 %v522_v32, %v404_v15  ;;  %v643_v5 = vand.u32 2147483647, %v626_v28  ;;  %v614_v3 = vadd.f32 %v6665_v34, %v4415_v18  ;;  %v6667_v32 = vld [vmem:[#allocation31_spill] sm:$0xff]  ;;  %v6674_v55 = vld [vmem:[#allocation38_spill] sm:$0xff] }
 0x157   :  { %v654_v6 = vmul.f32 %v4433_v21, %v637_v20  ;;  %v540_v57 = vadd.f32 %v524_v49, %v406_v25  ;;  %v526_v42 = vmul.f32 %v4425_v7, %v509_v51  ;;  %v4715_v4 = vadd.f32 %v650_v33, %v532_v1  ;;  %v6666_v20 = vld [vmem:[#allocation30_spill] sm:$0xff]  ;;  %v6669_v51 = vld [vmem:[#allocation33_spill] sm:$0xff]  ;;  %v6671_v34 = vld [vmem:[#allocation35_spill] sm:$0xff] }
 0x158   :  { %v4697_v37 = vpop.permute.xlu1 %877  ;;  %v656_v48 = vmul.f32 %v4433_v21, %v639_v54  ;;  %v658_v47 = vmul.f32 %v4433_v21, %v641_v8  ;;  %v4721_v36 = vadd.f32 %v652_v56, %v534_v29  ;;  %v763_v52 = vand.u32 2147483647, %v746_v27  ;;  %v6670_v27 = vld [vmem:[#allocation34_spill] sm:$0xff]  ;;  %v6681_v7 = vld [vmem:[#allocation40_spill] sm:$0xff] }
 0x159   :  { %v4708_v0 = vpop.permute.xlu0 %1117  ;;  %v612_v25 = vadd.f32 %v6666_v20, %v4415_v18  ;;  %v749_v1 = vadd.f32 %v6667_v32, %v4438_v31  ;;  %v4730_v33 = vadd.f32 %v654_v6, %v536_v61  ;;  %v660_v49 = vmul.f32 %v4433_v21, %v643_v5  ;;  %v6672_v61 = vld [vmem:[#allocation36_spill] sm:$0xff]  ;;  %v6673_v5 = vld [vmem:[#allocation37_spill] sm:$0xff] }
 0x15a   :  { %v631_v8 = vand.u32 2147483647, %v614_v3  ;;  %v751_v29 = vadd.f32 %v6669_v51, %v4438_v31  ;;  %v4737_v54 = vadd.f32 %v656_v48, %v538_v14  ;;  %v542_v17 = vadd.f32 %v526_v42, %v408_v22 }
 0x15b   :  { %v615_v56 = vadd.f32 %v6670_v27, %v4415_v18  ;;  %v753_v20 = vadd.f32 %v6671_v34, %v4438_v31  ;;  %v4743_v32 = vadd.f32 %v658_v47, %v540_v57  ;;  %v617_v6 = vadd.f32 %v6672_v61, %v4415_v18  ;;  %v6679_v27 = vld [vmem:[#allocation39_spill] sm:$0xff] }
 0x15c   :  { %v755_v3 = vadd.f32 %v6673_v5, %v4438_v31  ;;  %v619_v14 = vadd.f32 %v6674_v55, %v4415_v18  ;;  %v6676_v22 = vsub.s32 7, %v4309_v23  ;;  %v4759_v57 = vmul.f32 %v4447_v41, %v763_v52  ;;  %v6682_v23 = vld [vmem:[#allocation41_spill] sm:$0xff] }
 0x15d   :  { %v4723_v15 = vpop.permute.xlu1 %955  ;;  %v4732_v28 = vpop.permute.xlu0 %1125  ;;  %v629_v47 = vand.u32 2147483647, %v612_v25  ;;  %v766_v51 = vand.u32 2147483647, %v749_v1  ;;  %v757_v34 = vadd.f32 %v6679_v27, %v4438_v31  ;;  %v648_v5 = vmul.f32 %v4433_v21, %v631_v8 }
 0x15e   :  { %6668 = vst [vmem:[#allocation16_spill] sm:$0xff] %v4732_v28  ;;  %v4756_v42 = vrot.slane %v4371_v10, %v6676_v22  ;;  %6678 = vst [vmem:[#allocation24_spill] sm:$0xff] %v4759_v57  ;;  %v768_v55 = vand.u32 2147483647, %v751_v29  ;;  %v621_v28 = vadd.f32 %v6681_v7, %v4415_v18  ;;  %v759_v10 = vadd.f32 %v6682_v23, %v4438_v31 }
 0x15f   :  { %v632_v22 = vand.u32 2147483647, %v615_v56  ;;  %v4770_v52 = vadd.f32 %v660_v49, %v542_v17  ;;  %v4773_v25 = vstv %s4717_s15  ;;  %v634_v1 = vand.u32 2147483647, %v617_v6  ;;  %v6688_v49 = vld [vmem:[#allocation48_spill] sm:$0xff] }
 0x160   :  { %6677 = vst [vmem:[#allocation17_spill] sm:$0xff] %v4756_v42  ;;  %v770_v42 = vand.u32 2147483647, %v753_v20  ;;  %6684 = vst [vmem:[#allocation21_spill] sm:$0xff] %v4773_v25  ;;  %v772_v57 = vand.u32 2147483647, %v755_v3  ;;  %v4780_v29 = vmul.f32 %v4433_v21, %v629_v47  ;;  %v4783_v7 = vmul.f32 %v4447_v41, %v766_v51 }
 0x161   :  { %v4751_v48 = vpop.permute.xlu1 %959  ;;  %v4763_v61 = vpop.permute.xlu0 %1133  ;;  %6683 = vst [vmem:[#allocation19_spill] sm:$0xff] %v4770_v52  ;;  %v636_v27 = vand.u32 2147483647, %v619_v14  ;;  %v774_v23 = vand.u32 2147483647, %v757_v34  ;;  %v747_v17 = vadd.f32 %v6688_v49, %v4438_v31  ;;  %v4789_v20 = vadd.f32 %v648_v5, %v530_v13  ;;  %v6693_v51 = vld [vmem:[#allocation43_spill] sm:$0xff] }
 0x162   :  { %6675 = vst [vmem:[#allocation22_spill] sm:$0xff] %v4751_v48  ;;  %6680 = vst [vmem:[#allocation26_spill] sm:$0xff] %v4763_v61  ;;  %v6685_v61 = vld [vmem:[#allocation42_spill] sm:$0xff]  ;;  %v4792_v6 = vmul.f32 %v4447_v41, %v768_v55  ;;  %v638_v3 = vand.u32 2147483647, %v621_v28  ;;  %v4798_v47 = vmul.f32 %v4447_v41, %v770_v42  ;;  %v761_v34 = vadd.f32 %v6693_v51, %v4438_v31  ;;  %v6694_v49 = vld [vmem:[#allocation52_spill] sm:$0xff] }
 0x163   :  { %v623_v11 = vadd.f32 %v6685_v61, %v4415_v18  ;;  %6686 = vst [vmem:[#allocation28_spill] sm:$0xff] %v4780_v29  ;;  %6687 = vst [vmem:[#allocation23_spill] sm:$0xff] %v4783_v7  ;;  %v776_v14 = vand.u32 2147483647, %v759_v10  ;;  %v4795_v61 = vmul.f32 %v4433_v21, %v632_v22  ;;  %v750_v52 = vadd.f32 %v6694_v49, %v4438_v31  ;;  %v6699_v22 = vld [vmem:[#allocation45_spill] sm:$0xff]  ;;  %v6700_v49 = vld [vmem:[#allocation50_spill] sm:$0xff] }
 0x164   :  { %6690 = vst [vmem:[#allocation27_spill] sm:$0xff] %v4792_v6  ;;  %6692 = vst [vmem:[#allocation32_spill] sm:$0xff] %v4798_v47  ;;  %v4805_v13 = vmul.f32 %v4433_v21, %v634_v1  ;;  %v4808_v5 = vmul.f32 %v4447_v41, %v772_v57  ;;  %v4811_v28 = vmul.f32 %v4433_v21, %v636_v27  ;;  %v6714_v29 = vld [vmem:[#allocation56_spill] sm:$0xff] }
 0x165   :  { %v4777_v8 = vpop.permute.xlu1 %967  ;;  %v4787_v56 = vpop.permute.xlu0 %1141  ;;  %6691 = vst [vmem:[#allocation29_spill] sm:$0xff] %v4795_v61  ;;  %v640_v55 = vand.u32 2147483647, %v623_v11  ;;  %v4816_v42 = vmul.f32 %v4447_v41, %v774_v23  ;;  %v881_v51 = vadd.f32 %v6699_v22, %v4471_v35  ;;  %v748_v1 = vadd.f32 %v6700_v49, %v4438_v31  ;;  %v6703_v11 = vld [vmem:[#allocation44_spill] sm:$0xff]  ;;  %v6707_v49 = vld [vmem:[#allocation55_spill] sm:$0xff]  ;;  %v6713_v61 = vld [vmem:[#allocation53_spill] sm:$0xff] }
 0x166   :  { %6689 = vst [vmem:[#allocation25_spill] sm:$0xff] %v4787_v56  ;;  %6695 = vst [vmem:[#allocation30_spill] sm:$0xff] %v4805_v13  ;;  %v764_v56 = vand.u32 2147483647, %v747_v17  ;;  %v4823_v47 = vmul.f32 %v4433_v21, %v638_v3  ;;  %v4826_v57 = vmul.f32 %v4447_v41, %v776_v14  ;;  %v625_v27 = vadd.f32 %v6703_v11, %v4415_v18  ;;  %v6706_v17 = vld [vmem:[#allocation47_spill] sm:$0xff]  ;;  %v6709_v14 = vld [vmem:[#allocation49_spill] sm:$0xff] }
 0x167   :  { %6696 = vst [vmem:[#allocation31_spill] sm:$0xff] %v4808_v5  ;;  %6697 = vst [vmem:[#allocation33_spill] sm:$0xff] %v4811_v28  ;;  %v6704_v5 = vld [vmem:[#allocation46_spill] sm:$0xff]  ;;  %v778_v28 = vand.u32 2147483647, %v761_v34  ;;  %v884_v22 = vadd.f32 %v6706_v17, %v4471_v35  ;;  %v752_v3 = vadd.f32 %v6707_v49, %v4438_v31  ;;  %v6710_v11 = vld [vmem:[#allocation51_spill] sm:$0xff] }
 0x168   :  { %6698 = vst [vmem:[#allocation34_spill] sm:$0xff] %v4816_v42  ;;  %6701 = vst [vmem:[#allocation35_spill] sm:$0xff] %v4823_v47  ;;  %v627_v23 = vadd.f32 %v6704_v5, %v4415_v18  ;;  %v767_v6 = vand.u32 2147483647, %v750_v52  ;;  %v4839_v47 = vmul.f32 %v4433_v21, %v640_v55  ;;  %v888_v13 = vadd.f32 %v6710_v11, %v4471_v35  ;;  %v6712_v49 = vld [vmem:[#allocation63_spill] sm:$0xff] }
 0x169   :  { %v4813_v10 = vpop.permute.xlu1 %975  ;;  %6702 = vst [vmem:[#allocation36_spill] sm:$0xff] %v4826_v57  ;;  %v886_v57 = vadd.f32 %v6709_v14, %v4471_v35  ;;  %v754_v18 = vadd.f32 %v4318_v19, %v4438_v31  ;;  %v898_v5 = vand.u32 2147483647, %v881_v51  ;;  %v781_v52 = vmul.f32 %v4447_v41, %v764_v56  ;;  %v6716_v56 = vld [vmem:[#allocation70_spill] sm:$0xff] }
 0x16a   :  { %v4832_v42 = vpop.permute.xlu0 %1219  ;;  %6708 = vst [vmem:[#allocation38_spill] sm:$0xff] %v4839_v47  ;;  %v765_v17 = vand.u32 2147483647, %v748_v1  ;;  %v756_v7 = vadd.f32 %v6712_v49, %v4438_v31  ;;  %v642_v55 = vand.u32 2147483647, %v625_v27  ;;  %v890_v14 = vadd.f32 %v6713_v61, %v4471_v35 }
 0x16b   :  { %6705 = vst [vmem:[#allocation37_spill] sm:$0xff] %v4832_v42  ;;  %v644_v47 = vand.u32 2147483647, %v627_v23  ;;  %v892_v11 = vadd.f32 %v6714_v29, %v4471_v35  ;;  %v901_v19 = vand.u32 2147483647, %v884_v22  ;;  %v784_v42 = vmul.f32 %v4447_v41, %v767_v6 }
 0x16c   :  { %v769_v51 = vand.u32 2147483647, %v752_v3  ;;  %v758_v1 = vadd.f32 %v6716_v56, %v4438_v31  ;;  %v903_v27 = vand.u32 2147483647, %v886_v57  ;;  %v905_v23 = vand.u32 2147483647, %v888_v13 }
 0x16d   :  { %v4847_v34 = vpop.permute.xlu1 %983  ;;  %v771_v49 = vand.u32 2147483647, %v754_v18  ;;  %v915_v61 = vmul.f32 %v4484_v38, %v898_v5  ;;  %v797_v29 = vadd.f32 %v781_v52, %v4703_v30  ;;  %v782_v22 = vmul.f32 %v4447_v41, %v765_v17 }
 0x16e   :  { %6711 = vst [vmem:[#allocation39_spill] sm:$0xff] %v4847_v34  ;;  %v4856_v25 = vpop.permute.xlu0 %1231  ;;  %v4862_v34 = vmul.f32 %v4447_v41, %v778_v28  ;;  %v4870_v6 = vmul.f32 %v4433_v21, %v642_v55  ;;  %v4873_v3 = vmul.f32 %v4433_v21, %v644_v47  ;;  %v907_v28 = vand.u32 2147483647, %v890_v14  ;;  %v6717_v21 = vld [vmem:[#allocation67_spill] sm:$0xff] }
 0x16f   :  { %6715 = vst [vmem:[#allocation40_spill] sm:$0xff] %v4856_v25  ;;  %v773_v25 = vand.u32 2147483647, %v756_v7  ;;  %v909_v56 = vand.u32 2147483647, %v892_v11  ;;  %v918_v13 = vmul.f32 %v4484_v38, %v901_v19  ;;  %v800_v18 = vadd.f32 %v784_v42, %v4715_v4 }
 0x170   :  { %v786_v5 = vmul.f32 %v4447_v41, %v769_v51  ;;  %v775_v30 = vand.u32 2147483647, %v758_v1  ;;  %v920_v52 = vmul.f32 %v4484_v38, %v903_v27  ;;  %v922_v7 = vmul.f32 %v4484_v38, %v905_v23  ;;  %v6718_v1 = vld [vmem:[#allocation73_spill] sm:$0xff]  ;;  %v6719_v23 = vld [vmem:[#allocation80_spill] sm:$0xff] }
 0x171   :  { %v4864_v48 = vpop.permute.xlu1 %991  ;;  %v788_v17 = vmul.f32 %v4447_v41, %v771_v49  ;;  %v1014_v47 = vadd.f32 %v6717_v21, %v4562_v26  ;;  %v798_v14 = vadd.f32 %v782_v22, %v4789_v20  ;;  %v790_v11 = vmul.f32 %v4447_v41, %v773_v25  ;;  %v6720_v25 = vld [vmem:[#allocation57_spill] sm:$0xff] }
 0x172   :  { %v4875_v57 = vpop.permute.xlu0 %1239  ;;  %v882_v4 = vadd.f32 %v4505_v40, %v4471_v35  ;;  %v4891_v42 = vadd.f32 %v915_v61, %v797_v29  ;;  %v924_v19 = vmul.f32 %v4484_v38, %v907_v28  ;;  %v926_v51 = vmul.f32 %v4484_v38, %v909_v56  ;;  %v6722_v56 = vld [vmem:[#allocation82_spill] sm:$0xff] }
 0x173   :  { %v1017_v27 = vadd.f32 %v6718_v1, %v4562_v26  ;;  %v760_v49 = vadd.f32 %v6719_v23, %v4438_v31  ;;  %v802_v20 = vadd.f32 %v786_v5, %v4721_v36  ;;  %v4904_v22 = vadd.f32 %v6720_v25, %v4471_v35 }
 0x174   :  { %v792_v40 = vmul.f32 %v4447_v41, %v775_v30  ;;  %v4907_v61 = vadd.f32 %v918_v13, %v800_v18  ;;  %v804_v29 = vadd.f32 %v788_v17, %v4730_v33  ;;  %v1031_v28 = vand.u32 2147483647, %v1014_v47 }
 0x175   :  { %v4885_v55 = vpop.permute.xlu1 %999  ;;  %6721 = vst [vmem:[#allocation41_spill] sm:$0xff] %v4904_v22  ;;  %v1019_v1 = vadd.f32 %v6722_v56, %v4562_v26  ;;  %v880_v31 = vadd.f32 %v4460_v44, %v4471_v35  ;;  %v806_v36 = vadd.f32 %v790_v11, %v4737_v54  ;;  %v1021_v5 = vadd.f32 %v4473_v46, %v4562_v26 }
 0x176   :  { %v4899_v21 = vpop.permute.xlu0 %1247  ;;  %v899_v25 = vand.u32 2147483647, %v882_v4  ;;  %v1023_v13 = vadd.f32 %v4516_v53, %v4562_v26  ;;  %v1034_v18 = vand.u32 2147483647, %v1017_v27  ;;  %v777_v33 = vand.u32 2147483647, %v760_v49 }
 0x177   :  { %v883_v30 = vadd.f32 %v4544_v60, %v4471_v35  ;;  %v1025_v17 = vadd.f32 %v4554_v39, %v4562_v26  ;;  %v808_v54 = vadd.f32 %v792_v40, %v4743_v32  ;;  %v885_v46 = vadd.f32 %v4570_v43, %v4471_v35 }
 0x178   :  { %v4931_v11 = vadd.f32 %v920_v52, %v802_v20  ;;  %v4934_v53 = vmul.f32 %v4592_v9, %v1031_v28  ;;  %v1036_v4 = vand.u32 2147483647, %v1019_v1  ;;  %v897_v27 = vand.u32 2147483647, %v880_v31 }
 0x179   :  { %v4914_v23 = vpop.permute.xlu1 %1007  ;;  %v4936_v60 = vadd.f32 %v922_v7, %v804_v29  ;;  %v1038_v49 = vand.u32 2147483647, %v1021_v5  ;;  %v916_v39 = vmul.f32 %v4484_v38, %v899_v25  ;;  %v1040_v56 = vand.u32 2147483647, %v1023_v13 }
 0x17a   :  { %6723 = vst [vmem:[#allocation42_spill] sm:$0xff] %v4914_v23  ;;  %v4925_v44 = vpop.permute.xlu0 %1255  ;;  %v4939_v23 = vadd.f32 %v924_v19, %v806_v36  ;;  %v4944_v32 = vmul.f32 %v4592_v9, %v1034_v18  ;;  %v4947_v43 = vmul.f32 %v4447_v41, %v777_v33  ;;  %v900_v52 = vand.u32 2147483647, %v883_v30 }
 0x17b   :  { %v1042_v20 = vand.u32 2147483647, %v1025_v17  ;;  %v902_v7 = vand.u32 2147483647, %v885_v46  ;;  %v1027_v29 = vadd.f32 %v4578_v59, %v4562_v26  ;;  %v887_v19 = vadd.f32 %v4594_v62, %v4471_v35 }
 0x17c   :  { %6724 = vst [vmem:[#allocation48_spill] sm:$0xff] %v4939_v23  ;;  %6725 = vst [vmem:[#allocation43_spill] sm:$0xff] %v4947_v43  ;;  %v4955_v28 = vadd.f32 %v926_v51, %v808_v54  ;;  %v4958_v1 = vmul.f32 %v4592_v9, %v1036_v4  ;;  %v4961_v31 = vmul.f32 %v4484_v38, %v897_v27 }
 0x17d   :  { %v1029_v41 = vadd.f32 %v4600_v2, %v4562_v26  ;;  %v1015_v36 = vadd.f32 %v4723_v15, %v4562_v26  ;;  %v4968_v5 = vmul.f32 %v4592_v9, %v1038_v49  ;;  %v4970_v59 = vadd.f32 %v916_v39, %v798_v14 }
 0x17e   :  { %v4941_v47 = vpop.permute.xlu1 %1085  ;;  %v4949_v40 = vpop.permute.xlu0 %1263  ;;  %6726 = vst [vmem:[#allocation52_spill] sm:$0xff] %v4955_v28  ;;  %v4973_v62 = vmul.f32 %v4592_v9, %v1040_v56  ;;  %v889_v51 = vadd.f32 %v4625_v50, %v4471_v35  ;;  %v4980_v13 = vmul.f32 %v4484_v38, %v900_v52  ;;  %v4983_v2 = vmul.f32 %v4592_v9, %v1042_v20  ;;  %v6727_v52 = vld [vmem:[#allocation22_spill] sm:$0xff] }
 0x17f   :  { %v1149_v15 = vadd.f32 %v4638_v63, %v4684_v12  ;;  %v1018_v14 = vadd.f32 %v4777_v8, %v4562_v26  ;;  %v4992_v33 = vmul.f32 %v4484_v38, %v902_v7  ;;  %v1044_v50 = vand.u32 2147483647, %v1027_v29 }
 0x180   :  { %v904_v30 = vand.u32 2147483647, %v887_v19  ;;  %v1020_v17 = vadd.f32 %v4813_v10, %v4562_v26  ;;  %v1046_v54 = vand.u32 2147483647, %v1029_v41  ;;  %v891_v46 = vadd.f32 %v4654_v45, %v4471_v35 }
 0x181   :  { %v1152_v63 = vadd.f32 %v4664_v58, %v4684_v12  ;;  %v1032_v4 = vand.u32 2147483647, %v1015_v36  ;;  %v906_v27 = vand.u32 2147483647, %v889_v51  ;;  %v893_v8 = vadd.f32 %v4674_v16, %v4471_v35 }
 0x182   :  { %v4977_v25 = vpop.permute.xlu1 %1093  ;;  %v4989_v18 = vpop.permute.xlu0 %1271  ;;  %v1154_v49 = vadd.f32 %v4690_v24, %v4684_v12  ;;  %v895_v39 = vadd.f32 %v4697_v37, %v4471_v35  ;;  %v1166_v10 = vand.u32 2147483647, %v1149_v15  ;;  %v1156_v45 = vadd.f32 %v4708_v0, %v4684_v12  ;;  %v6728_v35 = vld [vmem:[#allocation39_spill] sm:$0xff] }
 0x183   :  { %v1016_v58 = vadd.f32 %v6727_v52, %v4562_v26  ;;  %v1035_v20 = vand.u32 2147483647, %v1018_v14  ;;  %v5015_v16 = vmul.f32 %v4592_v9, %v1044_v50  ;;  %v5018_v24 = vmul.f32 %v4484_v38, %v904_v30  ;;  %v6730_v30 = vld [vmem:[#allocation15_spill] sm:$0xff] }
 0x184   :  { %v1037_v29 = vand.u32 2147483647, %v1020_v17  ;;  %v1022_v37 = vadd.f32 %v6728_v35, %v4562_v26  ;;  %v5023_v19 = vmul.f32 %v4592_v9, %v1046_v54  ;;  %v908_v0 = vand.u32 2147483647, %v891_v46  ;;  %v6731_v54 = vld [vmem:[#allocation16_spill] sm:$0xff] }
 0x185   :  { %v1169_v41 = vand.u32 2147483647, %v1152_v63  ;;  %v1049_v36 = vmul.f32 %v4592_v9, %v1032_v4  ;;  %v5027_v51 = vmul.f32 %v4484_v38, %v906_v27  ;;  %v910_v15 = vand.u32 2147483647, %v893_v8  ;;  %v6733_v63 = vld [vmem:[#allocation17_spill] sm:$0xff] }
 0x186   :  { %v5006_v56 = vpop.permute.xlu1 %1097  ;;  %v5012_v7 = vpop.permute.xlu0 %1279  ;;  %6729 = vst [vmem:[#allocation45_spill] sm:$0xff] %v5023_v19  ;;  %v1171_v14 = vand.u32 2147483647, %v1154_v49  ;;  %v912_v50 = vand.u32 2147483647, %v895_v39  ;;  %v1183_v28 = vmul.f32 %v6730_v30, %v1166_v10  ;;  %v1052_v35 = vmul.f32 %v4592_v9, %v1035_v20  ;;  %v6734_v4 = vld [vmem:[#allocation37_spill] sm:$0xff] }
 0x187   :  { %v1173_v17 = vand.u32 2147483647, %v1156_v45  ;;  %v1033_v22 = vand.u32 2147483647, %v1016_v58  ;;  %v5033_v43 = vadd.f32 %v6731_v54, %v4684_v12  ;;  %v1054_v46 = vmul.f32 %v4592_v9, %v1037_v29  ;;  %v6735_v45 = vld [vmem:[#allocation81_spill] sm:$0xff] }
 0x188   :  { %v1282_v27 = vadd.f32 %v6734_v4, %v6733_v63  ;;  %v1039_v19 = vand.u32 2147483647, %v1022_v37  ;;  %v5039_v49 = vmul.f32 %v4484_v38, %v908_v0  ;;  %v1186_v39 = vmul.f32 %v6730_v30, %v1169_v41  ;;  %v6737_v37 = vld [vmem:[#allocation40_spill] sm:$0xff] }
 0x189   :  { %6732 = vst [vmem:[#allocation50_spill] sm:$0xff] %v5033_v43  ;;  %v1065_v10 = vadd.f32 %v1049_v36, %v4891_v42  ;;  %v5045_v20 = vmul.f32 %v4484_v38, %v910_v15  ;;  %v1188_v54 = vmul.f32 %v6730_v30, %v1171_v14  ;;  %v5049_v29 = vmul.f32 %v4484_v38, %v912_v50 }
 0x18a   :  { %v1106_v52 = vpop.permute.xlu1 %1105  ;;  %v1285_v4 = vadd.f32 %v6737_v37, %v6733_v63  ;;  %v5056_v0 = vmul.f32 %v6730_v30, %v1173_v17  ;;  %v1050_v42 = vmul.f32 %v4592_v9, %v1033_v22  ;;  %v1068_v41 = vadd.f32 %v1052_v35, %v4907_v61 }
 0x18b   :  { %v416_v8 = vpop.permute.xlu0 %415  ;;  %6736 = vst [vmem:[#allocation44_spill] sm:$0xff] %v5049_v29  ;;  %v1070_v14 = vadd.f32 %v1054_v46, %v4931_v11  ;;  %v1056_v50 = vmul.f32 %v4592_v9, %v1039_v19  ;;  %v5065_v37 = vadd.f32 %v4864_v48, %v4562_v26  ;;  %v6739_v29 = vld [vmem:[#allocation83_spill] sm:$0xff]  ;;  %v5069_v22 = vadd.f32 %v1183_v28, %v1065_v10  ;;  %v6741_v28 = vld [vmem:[#allocation21_spill] sm:$0xff] }
 0x18c   :  { %v478_v58 = vadd.f32 %v416_v8, %v6735_v45  ;;  %6738 = vst [vmem:[#allocation46_spill] sm:$0xff] %v5056_v0  ;;  %v1299_v8 = vand.u32 2147483647, %v1282_v27  ;;  %v1302_v61 = vand.u32 2147483647, %v1285_v4  ;;  %v1287_v35 = vadd.f32 %v4875_v57, %v6733_v63  ;;  %v6740_v27 = vld [vmem:[#allocation9_spill] sm:$0xff] }
 0x18d   :  { %v1289_v11 = vadd.f32 %v4899_v21, %v6733_v63  ;;  %v1291_v19 = vadd.f32 %v4925_v44, %v6733_v63  ;;  %v5078_v48 = vadd.f32 %v1050_v42, %v4970_v59  ;;  %v5085_v4 = vadd.f32 %v1056_v50, %v4936_v60  ;;  %v6744_v59 = vld [vmem:[#allocation28_spill] sm:$0xff] }
 0x18e   :  { %v5053_v23 = vpop.permute.xlu1 %1113  ;;  %v495_v36 = vand.u32 2147483647, %v478_v58  ;;  %v1316_v10 = vmul.f32 %v6741_v28, %v1299_v8  ;;  %v1148_v57 = vadd.f32 %v4941_v47, %v4684_v12  ;;  %v5089_v15 = vadd.f32 %v1188_v54, %v1070_v14  ;;  %v6745_v54 = vld [vmem:[#allocation24_spill] sm:$0xff] }
 0x18f   :  { %v428_v38 = vpop.permute.xlu0 %427  ;;  %6742 = vst [vmem:[#allocation47_spill] sm:$0xff] %v5085_v4  ;;  %v1306_v60 = vand.u32 2147483647, %v1289_v11  ;;  %v1308_v8 = vand.u32 2147483647, %v1291_v19  ;;  %v5100_v47 = vadd.f32 %v4949_v40, %v6733_v63  ;;  %v6747_v19 = vld [vmem:[#allocation29_spill] sm:$0xff] }
 0x190   :  { %v512_v17 = vmul.f32 %v6739_v29, %v495_v36  ;;  %v481_v0 = vadd.f32 %v428_v38, %v6735_v45  ;;  %v5081_v38 = vadd.f32 %v1186_v39, %v1068_v41  ;;  %6743 = vst [vmem:[#allocation55_spill] sm:$0xff] %v5089_v15  ;;  %v1304_v41 = vand.u32 2147483647, %v1287_v35  ;;  %v6750_v4 = vld [vmem:[#allocation30_spill] sm:$0xff] }
 0x191   :  { %v1153_v35 = vadd.f32 %v1106_v52, %v4684_v12  ;;  %v5124_v52 = vmul.f32 %v6741_v28, %v1308_v8 }
 0x192   :  { %v1122_v46 = vpop.permute.xlu1 %1121  ;;  %v528_v58 = vadd.f32 %v512_v17, %v6740_v27  ;;  %v498_v36 = vand.u32 2147483647, %v481_v0  ;;  %v5096_v0 = vmul.f32 %v6741_v28, %v1302_v61  ;;  %v6746_v27 = vld [vmem:[#allocation10_spill] sm:$0xff]  ;;  %v1151_v61 = vadd.f32 %v5006_v56, %v4684_v12 }
 0x193   :  { %v436_v21 = vpop.permute.xlu0 %435  ;;  %v5121_v56 = vmul.f32 %v6741_v28, %v1306_v60 }
 0x194   :  { %v662_v42 = vadd.f32 %v6744_v59, %v528_v58  ;;  %v515_v17 = vmul.f32 %v6739_v29, %v498_v36  ;;  %v483_v39 = vadd.f32 %v436_v21, %v6735_v45  ;;  %v1165_v59 = vand.u32 2147483647, %v1148_v57 }
 0x195   :  { %v1150_v36 = vadd.f32 %v4977_v25, %v4684_v12  ;;  %v5118_v25 = vadd.f32 %v4885_v55, %v4562_v26  ;;  %v1168_v55 = vand.u32 2147483647, %v1151_v61  ;;  %v6751_v61 = vld [vmem:[#allocation27_spill] sm:$0xff] }
 0x196   :  { %v1130_v50 = vpop.permute.xlu1 %1129  ;;  %v796_v14 = vadd.f32 %v6745_v54, %v662_v42  ;;  %v531_v44 = vadd.f32 %v515_v17, %v6746_v27  ;;  %v500_v58 = vand.u32 2147483647, %v483_v39  ;;  %v5114_v17 = vmul.f32 %v6741_v28, %v1304_v41  ;;  %v6748_v39 = vld [vmem:[#allocation23_spill] sm:$0xff] }
 0x197   :  { %v444_v11 = vpop.permute.xlu0 %443  ;;  %v1182_v27 = vmul.f32 %v6730_v30, %v1165_v59 }
 0x198   :  { %v665_v21 = vadd.f32 %v6747_v19, %v531_v44  ;;  %v517_v40 = vmul.f32 %v6739_v29, %v500_v58  ;;  %v485_v43 = vadd.f32 %v444_v11, %v6735_v45  ;;  %v930_v42 = vadd.f32 %v4961_v31, %v796_v14  ;;  %v6749_v31 = vld [vmem:[#allocation11_spill] sm:$0xff] }
 0x199   :  { %v1310_v44 = vand.u32 2147483647, %v5100_v47  ;;  %v1167_v58 = vand.u32 2147483647, %v1150_v36  ;;  %v1170_v19 = vand.u32 2147483647, %v1153_v35 }
 0x19a   :  { %v5126_v57 = vpop.permute.xlu1 %1137  ;;  %v799_v54 = vadd.f32 %v6748_v39, %v665_v21  ;;  %v533_v14 = vadd.f32 %v517_v40, %v6749_v31  ;;  %v502_v41 = vand.u32 2147483647, %v485_v43  ;;  %v1064_v60 = vadd.f32 %v4934_v53, %v930_v42  ;;  %v6752_v35 = vld [vmem:[#allocation12_spill] sm:$0xff] }
 0x19b   :  { %v452_v11 = vpop.permute.xlu0 %451  ;;  %v1155_v21 = vadd.f32 %v5053_v23, %v4684_v12  ;;  %v1157_v40 = vadd.f32 %v1122_v46, %v4684_v12  ;;  %v5144_v53 = vadd.f32 %v4989_v18, %v6733_v63  ;;  %v1184_v31 = vmul.f32 %v6730_v30, %v1167_v58 }
 0x19c   :  { %v667_v8 = vadd.f32 %v6750_v4, %v533_v14  ;;  %v519_v15 = vmul.f32 %v6739_v29, %v502_v41  ;;  %v487_v26 = vadd.f32 %v452_v11, %v6735_v45  ;;  %v1198_v59 = vadd.f32 %v1182_v27, %v1064_v60  ;;  %v6753_v27 = vld [vmem:[#allocation33_spill] sm:$0xff] }
 0x19d   :  { %v933_v36 = vadd.f32 %v4980_v13, %v799_v54  ;;  %v1185_v23 = vmul.f32 %v6730_v30, %v1168_v55  ;;  %v1174_v60 = vand.u32 2147483647, %v1157_v40  ;;  %v6754_v55 = vld [vmem:[#allocation32_spill] sm:$0xff]  ;;  %v6756_v40 = vld [vmem:[#allocation35_spill] sm:$0xff]  ;;  %v6764_v47 = vand.u32 2147483647, %v5065_v37 }
 0x19e   :  { %v5139_v43 = vpop.permute.xlu1 %1145  ;;  %v801_v4 = vadd.f32 %v6751_v61, %v667_v8  ;;  %v535_v42 = vadd.f32 %v519_v15, %v6752_v35  ;;  %v504_v39 = vand.u32 2147483647, %v487_v26  ;;  %v5150_v46 = vadd.f32 %v1316_v10, %v1198_v59  ;;  %v6755_v8 = vld [vmem:[#allocation13_spill] sm:$0xff] }
 0x19f   :  { %v460_v14 = vpop.permute.xlu0 %459  ;;  %v1067_v41 = vadd.f32 %v4944_v32, %v933_v36  ;;  %v1187_v15 = vmul.f32 %v6730_v30, %v1170_v19  ;;  %v1172_v26 = vand.u32 2147483647, %v1155_v21  ;;  %v1159_v35 = vadd.f32 %v1130_v50, %v4684_v12 }
 0x1a0   :  { %v669_v13 = vadd.f32 %v6753_v27, %v535_v42  ;;  %v521_v54 = vmul.f32 %v6739_v29, %v504_v39  ;;  %v489_v18 = vadd.f32 %v460_v14, %v6735_v45  ;;  %v935_v11 = vadd.f32 %v4992_v33, %v801_v4  ;;  %1348 = vmax.xlane.f32.xlu1 %v5150_v46 }
 0x1a1   :  { %v1201_v58 = vadd.f32 %v1185_v23, %v1067_v41  ;;  %v1200_v21 = vadd.f32 %v1184_v31, %v5078_v48  ;;  %v1189_v41 = vmul.f32 %v6730_v30, %v1172_v26  ;;  %v1043_v37 = vand.u32 2147483647, %v5118_v25  ;;  %v6769_v25 = vld [vmem:[#allocation55_spill] sm:$0xff] }
 0x1a2   :  { %v803_v10 = vadd.f32 %v6754_v55, %v669_v13  ;;  %v537_v59 = vadd.f32 %v521_v54, %v6755_v8  ;;  %v506_v32 = vand.u32 2147483647, %v489_v18  ;;  %v1069_v61 = vadd.f32 %v4958_v1, %v935_v11  ;;  %v6758_v54 = vld [vmem:[#allocation14_spill] sm:$0xff] }
 0x1a3   :  { %v1224_v36 = vpop.permute.xlu1 %1223  ;;  %v468_v33 = vpop.permute.xlu0 %467  ;;  %v5165_v19 = vadd.f32 %v5096_v0, %v1201_v58  ;;  %v1191_v1 = vmul.f32 %v6730_v30, %v1174_v60  ;;  %v6757_v0 = vld [vmem:[#allocation31_spill] sm:$0xff]  ;;  %v1176_v58 = vand.u32 2147483647, %v1159_v35  ;;  %v6759_v8 = vld [vmem:[#allocation38_spill] sm:$0xff] }
 0x1a4   :  { %v1283_v42 = vadd.f32 %v1224_v36, %v6733_v63  ;;  %v671_v4 = vadd.f32 %v6756_v40, %v537_v59  ;;  %v523_v39 = vmul.f32 %v6739_v29, %v506_v32  ;;  %v491_v23 = vadd.f32 %v468_v33, %v6735_v45  ;;  %v6761_v33 = vld [vmem:[#allocation18_spill] sm:$0xff] }
 0x1a5   :  { %v1203_v14 = vadd.f32 %v1187_v15, %v1069_v61  ;;  %1354 = vmax.xlane.f32.xlu1 %v5165_v19  ;;  %v937_v27 = vadd.f32 %v5018_v24, %v803_v10 }
 0x1a6   :  { %v1300_v50 = vand.u32 2147483647, %v1283_v42  ;;  %v805_v13 = vadd.f32 %v6757_v0, %v671_v4  ;;  %v539_v48 = vadd.f32 %v523_v39, %v6758_v54  ;;  %v508_v31 = vand.u32 2147483647, %v491_v23  ;;  %v6760_v42 = vld [vmem:[#allocation34_spill] sm:$0xff] }
 0x1a7   :  { %v1228_v18 = vpop.permute.xlu1 %1227  ;;  %v5178_v11 = vadd.f32 %v5114_v17, %v1203_v14  ;;  %v476_v60 = vpop.permute.xlu0 %475  ;;  %v1071_v55 = vadd.f32 %v4968_v5, %v937_v27  ;;  %v1161_v17 = vadd.f32 %v5126_v57, %v4684_v12 }
 0x1a8   :  { %v1317_v15 = vmul.f32 %v6741_v28, %v1300_v50  ;;  %v1284_v26 = vadd.f32 %v1228_v18, %v6733_v63  ;;  %v673_v59 = vadd.f32 %v6759_v8, %v539_v48  ;;  %v525_v24 = vmul.f32 %v6739_v29, %v508_v31  ;;  %v6762_v48 = vld [vmem:[#allocation36_spill] sm:$0xff] }
 0x1a9   :  { %v493_v10 = vadd.f32 %v476_v60, %v6735_v45  ;;  %v939_v32 = vadd.f32 %v5027_v51, %v805_v13  ;;  %1358 = vmax.xlane.f32.xlu1 %v5178_v11  ;;  %v1205_v35 = vadd.f32 %v1189_v41, %v1071_v55  ;;  %v1193_v51 = vmul.f32 %v6730_v30, %v1176_v58 }
 0x1aa   :  { %v1301_v36 = vand.u32 2147483647, %v1284_v26  ;;  %v5191_v61 = vadd.f32 %v1317_v15, %v5069_v22  ;;  %v807_v5 = vadd.f32 %v6760_v42, %v673_v59  ;;  %v541_v40 = vadd.f32 %v525_v24, %v6761_v33  ;;  %v6765_v24 = vld [vmem:[#allocation8_spill] sm:$0xff]  ;;  %v6768_v33 = vld [vmem:[#allocation26_spill] sm:$0xff] }
 0x1ab   :  { %v510_v4 = vand.u32 2147483647, %v493_v10  ;;  %v1236_v39 = vpop.permute.xlu1 %1235  ;;  %v1073_v45 = vadd.f32 %v4973_v62, %v939_v32  ;;  %v5201_v22 = vadd.f32 %v5121_v56, %v1205_v35  ;;  %v1178_v0 = vand.u32 2147483647, %v1161_v17  ;;  %v6763_v56 = vld [vmem:[#allocation20_spill] sm:$0xff]  ;;  %v6766_v10 = vld [vmem:[#allocation42_spill] sm:$0xff] }
 0x1ac   :  { %v1318_v23 = vmul.f32 %v6741_v28, %v1301_v36  ;;  %v1286_v57 = vadd.f32 %v1236_v39, %v6733_v63  ;;  %1350 = vmax.xlane.f32.xlu0 %v5191_v61  ;;  %v675_v14 = vadd.f32 %v4870_v6, %v541_v40  ;;  %v941_v27 = vadd.f32 %v5039_v49, %v807_v5  ;;  %v6767_v42 = vld [vmem:[#allocation44_spill] sm:$0xff]  ;;  %v6770_v39 = vld [vmem:[#allocation47_spill] sm:$0xff] }
 0x1ad   :  { %v527_v41 = vmul.f32 %v6739_v29, %v510_v4  ;;  %v1207_v50 = vadd.f32 %v1191_v1, %v1073_v45  ;;  %v1163_v62 = vadd.f32 %v5139_v43, %v4684_v12  ;;  %1362 = vmax.xlane.f32.xlu1 %v5201_v22  ;;  %v1327_v49 = vmul.f32 %v6741_v28, %v1310_v44  ;;  %v6771_v45 = vld [vmem:[#allocation46_spill] sm:$0xff] }
 0x1ae   :  { %v1303_v13 = vand.u32 2147483647, %v1286_v57  ;;  %v5209_v54 = vadd.f32 %v1318_v23, %v1200_v21  ;;  %v809_v31 = vadd.f32 %v6762_v48, %v675_v14  ;;  %v1075_v29 = vadd.f32 %v4983_v2, %v941_v27  ;;  %v6772_v23 = vld [vmem:[#allocation48_spill] sm:$0xff]  ;;  %v6773_v27 = vld [vmem:[#allocation45_spill] sm:$0xff] }
 0x1af   :  { %v543_v18 = vadd.f32 %v527_v41, %v6763_v56  ;;  %v1244_v58 = vpop.permute.xlu1 %1243  ;;  %v5214_v6 = vadd.f32 %v5124_v52, %v1207_v50  ;;  %v1312_v43 = vand.u32 2147483647, %v5144_v53  ;;  %v1297_v15 = vadd.f32 %v5012_v7, %v6733_v63  ;;  %v6774_v56 = vld [vmem:[#allocation19_spill] sm:$0xff] }
 0x1b0   :  { %v1320_v1 = vmul.f32 %v6741_v28, %v1303_v13  ;;  %v1288_v21 = vadd.f32 %v1244_v58, %v6733_v63  ;;  %1352 = vmax.xlane.f32.xlu0 %v5209_v54  ;;  %v1209_v26 = vadd.f32 %v1193_v51, %v1075_v29  ;;  %v943_v2 = vadd.f32 %v5045_v20, %v809_v31  ;;  %v6776_v29 = vld [vmem:[#allocation50_spill] sm:$0xff] }
 0x1b1   :  { %v677_v52 = vadd.f32 %v4873_v3, %v543_v18  ;;  %v1058_v44 = vmul.f32 %v4592_v9, %v6764_v47  ;;  %v1195_v53 = vmul.f32 %v6730_v30, %v1178_v0  ;;  %1366 = vmax.xlane.f32.xlu1 %v5214_v6  ;;  %v1180_v8 = vand.u32 2147483647, %v1163_v62  ;;  %v6775_v18 = vld [vmem:[#allocation43_spill] sm:$0xff] }
 0x1b2   :  { %v1305_v60 = vand.u32 2147483647, %v1288_v21  ;;  %v5234_v55 = vadd.f32 %v1320_v1, %v5081_v38  ;;  %v5237_v3 = vadd.f32 %v1327_v49, %v1209_v26  ;;  %v1077_v20 = vadd.f32 %v5015_v16, %v943_v2 }
 0x1b3   :  { %v811_v7 = vadd.f32 %v4862_v34, %v677_v52  ;;  %v1252_v59 = vpop.permute.xlu1 %1251  ;;  %v1028_v32 = vadd.f32 %v6766_v10, %v6765_v24  ;;  %v1329_v38 = vmul.f32 %v6741_v28, %v1312_v43  ;;  %v1314_v35 = vand.u32 2147483647, %v1297_v15  ;;  %v6778_v52 = vld [vmem:[#allocation25_spill] sm:$0xff] }
 0x1b4   :  { %v1322_v17 = vmul.f32 %v6741_v28, %v1305_v60  ;;  %v1290_v36 = vadd.f32 %v1252_v59, %v6733_v63  ;;  %1356 = vmax.xlane.f32.xlu0 %v5234_v55  ;;  %v1211_v34 = vadd.f32 %v1195_v53, %v1077_v20  ;;  %v1160_v16 = vadd.f32 %v6768_v33, %v4684_v12  ;;  %v6781_v60 = vld [vmem:[#allocation84_spill] sm:$0xff] }
 0x1b5   :  { %v945_v5 = vadd.f32 %v6767_v42, %v811_v7  ;;  %1370 = vmax.xlane.f32.xlu1 %v5237_v3  ;;  %v1206_v51 = vadd.f32 %v6771_v45, %v6770_v39  ;;  %v1074_v57 = vadd.f32 %v1058_v44, %v6772_v23  ;;  %v1197_v14 = vmul.f32 %v6730_v30, %v1180_v8  ;;  %v6779_v44 = vld [vmem:[#allocation41_spill] sm:$0xff] }
 0x1b6   :  { %v1307_v40 = vand.u32 2147483647, %v1290_v36  ;;  %v5252_v4 = vadd.f32 %v1322_v17, %v6769_v25  ;;  %v5258_v50 = vadd.f32 %v1329_v38, %v1211_v34  ;;  %v1060_v62 = vmul.f32 %v4592_v9, %v1043_v37  ;;  %v6782_v37 = vld [vmem:[#allocation52_spill] sm:$0xff] }
 0x1b7   :  { %v1260_v41 = vpop.permute.xlu1 %1259  ;;  %v1079_v0 = vadd.f32 %v6773_v27, %v945_v5  ;;  %v1045_v13 = vand.u32 2147483647, %v1028_v32  ;;  %v810_v58 = vadd.f32 %v6775_v18, %v6774_v56  ;;  %v6777_v49 = vand.u32 2147483647, %v6776_v29 }
 0x1b8   :  { %v1324_v48 = vmul.f32 %v6741_v28, %v1307_v40  ;;  %v1292_v31 = vadd.f32 %v1260_v41, %v6733_v63  ;;  %1360 = vmax.xlane.f32.xlu0 %v5252_v4  ;;  %v1331_v1 = vmul.f32 %v6741_v28, %v1314_v35  ;;  %v1177_v15 = vand.u32 2147483647, %v1160_v16 }
 0x1b9   :  { %v1192_v43 = vmul.f32 %v6730_v30, %v6777_v49  ;;  %v1213_v21 = vadd.f32 %v1197_v14, %v1079_v0  ;;  %v1162_v26 = vadd.f32 %v6778_v52, %v4684_v12  ;;  %1374 = vmax.xlane.f32.xlu1 %v5258_v50  ;;  %v6780_v53 = vand.u32 2147483647, %v6779_v44 }
 0x1ba   :  { %v1309_v2 = vand.u32 2147483647, %v1292_v31  ;;  %v5274_v47 = vadd.f32 %v1324_v48, %v1206_v51  ;;  %v1076_v24 = vadd.f32 %v1060_v62, %v6782_v37  ;;  %v1062_v10 = vmul.f32 %v4592_v9, %v1045_v13 }
 0x1bb   :  { %v928_v8 = vmul.f32 %v6781_v60, %v6780_v53  ;;  %v1268_v7 = vpop.permute.xlu1 %1267  ;;  %v5279_v59 = vadd.f32 %v1331_v1, %v1213_v21  ;;  %v1208_v20 = vadd.f32 %v1192_v43, %v1074_v57  ;;  %v1194_v36 = vmul.f32 %v6730_v30, %v1177_v15  ;;  %v3760_v57 = vld [vmem:[%s6493_s0] sm:$0xff] }
 0x1bc   :  { %v1326_v32 = vmul.f32 %v6741_v28, %v1309_v2  ;;  %v1294_v12 = vadd.f32 %v1268_v7, %v6733_v63  ;;  %1364 = vmax.xlane.f32.xlu0 %v5274_v47  ;;  %v1179_v38 = vand.u32 2147483647, %v1162_v26 }
 0x1bd   :  { %v944_v17 = vadd.f32 %v928_v8, %v810_v58  ;;  %1378 = vmax.xlane.f32.xlu1 %v5279_v59  ;;  %v1210_v16 = vadd.f32 %v1194_v36, %v1076_v24 }
 0x1be   :  { %v1311_v35 = vand.u32 2147483647, %v1294_v12  ;;  %v5288_v34 = vadd.f32 %v1326_v32, %v1208_v20  ;;  %v1196_v40 = vmul.f32 %v6730_v30, %v1179_v38 }
 0x1bf   :  { %v1276_v42 = vpop.permute.xlu1 %1275  ;;  %v1078_v5 = vadd.f32 %v1062_v10, %v944_v17 }
 0x1c0   :  { %v1328_v33 = vmul.f32 %v6741_v28, %v1311_v35  ;;  %v1296_v9 = vadd.f32 %v1276_v42, %v6733_v63  ;;  %1368 = vmax.xlane.f32.xlu0 %v5288_v34  ;;  %v1468_v63 = vpack.c.bf16 %v3760_v57, %v3760_v57 }
 0x1c1   :  { %v1212_v51 = vadd.f32 %v1196_v40, %v1078_v5 }
 0x1c2   :  { %v1313_v25 = vand.u32 2147483647, %v1296_v9  ;;  %v5294_v39 = vadd.f32 %v1328_v33, %v1210_v16  ;;  %3479 = vmatprep.subr.bf16.mxu0 %v1468_v63 }
 0x1c3   :  { %3480 = vmatpush3.bf16.xpose.msra.mxu0 %v1468_v63 }
 0x1c4   :  { %v1330_v45 = vmul.f32 %v6741_v28, %v1313_v25  ;;  %1372 = vmax.xlane.f32.xlu0 %v5294_v39 }
 0x1c6   :  { %v5298_v23 = vadd.f32 %v1330_v45, %v1212_v51 }
 0x1c8   :  { %1376 = vmax.xlane.f32.xlu0 %v5298_v23 }
 0x22d   :  { %v1349_v30 = vpop.xlane.xlu1 %1348 }
 0x22e   :  { %v1380_v14 = vsub.f32 %v5150_v46, %v1349_v30 }
 0x230   :  { %v1396_v41 = vmul.f32 1.442695, %v1380_v14 }
 0x232   :  { %v1355_v27 = vpop.xlane.xlu1 %1354  ;;  %3600 = vpow2.f32 %v1396_v41 }
 0x233   :  { %v1383_v0 = vsub.f32 %v5165_v19, %v1355_v27 }
 0x235   :  { %v1402_v56 = vmul.f32 1.442695, %v1383_v0 }
 0x236   :  { %v1359_v28 = vpop.xlane.xlu1 %1358 }
 0x237   :  { %v1385_v18 = vsub.f32 %v5178_v11, %v1359_v28 }
 0x239   :  { %v1351_v62 = vpop.xlane.xlu0 %1350  ;;  %v1406_v1 = vmul.f32 1.442695, %v1385_v18  ;;  %v3764_v18 = vld [vmem:[%s6496_s3 + $0x18] sm:$0xff] }
 0x23a   :  { %v1381_v13 = vsub.f32 %v5191_v61, %v1351_v62  ;;  %v1363_v48 = vpop.xlane.xlu1 %1362 }
 0x23b   :  { %v1387_v19 = vsub.f32 %v5201_v22, %v1363_v48  ;;  %v3761_v48 = vld [vmem:[%s6496_s3 + $0x8] sm:$0xff] }
 0x23c   :  { %v1398_v31 = vmul.f32 1.442695, %v1381_v13  ;;  %v3601_v29 = vpop.eup %3600 }
 0x23d   :  { %v1353_v58 = vpop.xlane.xlu0 %1352  ;;  %1428 = vadd.xlane.f32.xlu0 %v3601_v29  ;;  %v1410_v11 = vmul.f32 1.442695, %v1387_v19  ;;  %v3771_v19 = vld [vmem:[%s6496_s3 + $0x78] sm:$0xff] }
 0x23e   :  { %3602 = vpow2.f32 %v1398_v31  ;;  %v1382_v49 = vsub.f32 %v5209_v54, %v1353_v58  ;;  %v1367_v46 = vpop.xlane.xlu1 %1366  ;;  %v3762_v31 = vld [vmem:[%s6496_s3 + $0x10] sm:$0xff]  ;;  %v3765_v58 = vld [vmem:[%s6496_s3 + $0x48] sm:$0xff] }
 0x23f   :  { %3604 = vpow2.f32 %v1402_v56  ;;  %v1389_v26 = vsub.f32 %v5214_v6, %v1367_v46  ;;  %v3763_v56 = vld [vmem:[%s6496_s3] sm:$0xff]  ;;  %v3768_v46 = vld [vmem:[%s6496_s3 + $0x28] sm:$0xff] }
 0x240   :  { %v1400_v43 = vmul.f32 1.442695, %v1382_v49  ;;  %v3767_v49 = vld [vmem:[%s6496_s3 + $0x58] sm:$0xff] }
 0x241   :  { %v1357_v21 = vpop.xlane.xlu0 %1356  ;;  %v1414_v8 = vmul.f32 1.442695, %v1389_v26  ;;  %v3776_v26 = vld [vmem:[%s6496_s3 + $0x50] sm:$0xff] }
 0x242   :  { %3606 = vpow2.f32 %v1400_v43  ;;  %v1384_v61 = vsub.f32 %v5234_v55, %v1357_v21  ;;  %v1371_v15 = vpop.xlane.xlu1 %1370  ;;  %v3769_v43 = vld [vmem:[%s6496_s3 + $0x68] sm:$0xff]  ;;  %v3772_v21 = vld [vmem:[%s6496_s3 + $0x38] sm:$0xff] }
 0x243   :  { %3608 = vpow2.f32 %v1406_v1  ;;  %v1391_v22 = vsub.f32 %v5237_v3, %v1371_v15  ;;  %v3770_v1 = vld [vmem:[%s6496_s3 + $0x30] sm:$0xff]  ;;  %v5359_v15 = vld [vmem:[%s6494_s1 + $0x8] sm:$0xff] }
 0x244   :  { %v1404_v52 = vmul.f32 1.442695, %v1384_v61  ;;  %v3849_v61 = vmov 8  }
 0x245   :  { %v1361_v2 = vpop.xlane.xlu0 %1360  ;;  %v1418_v10 = vmul.f32 1.442695, %v1391_v22  ;;  %v5407_v22 = vld [vmem:[%s6494_s1 + $0x60] sm:$0xff] }
 0x246   :  { %3610 = vpow2.f32 %v1404_v52  ;;  %v1386_v54 = vsub.f32 %v5252_v4, %v1361_v2  ;;  %v1375_v60 = vpop.xlane.xlu1 %1374  ;;  %v3774_v52 = vld [vmem:[%s6496_s3 + $0x40] sm:$0xff]  ;;  %v5377_v2 = vld [vmem:[%s6494_s1 + $0x30] sm:$0xff] }
 0x247   :  { %3612 = vpow2.f32 %v1410_v11  ;;  %v1393_v4 = vsub.f32 %v5258_v50, %v1375_v60  ;;  %v5368_v11 = vld [vmem:[%s6494_s1 + $0x20] sm:$0xff]  ;;  %v5395_v60 = vld [vmem:[%s6494_s1 + $0x50] sm:$0xff] }
 0x248   :  { %v3603_v44 = vpop.eup %3602  ;;  %v1408_v53 = vmul.f32 1.442695, %v1386_v54  ;;  %v3778_v54 = vld [vmem:[%s6496_s3 + $0x60] sm:$0xff] }
 0x249   :  { %v1365_v7 = vpop.xlane.xlu0 %1364  ;;  %1430 = vadd.xlane.f32.xlu1 %v3603_v44  ;;  %v1460_v55 = vpack.c.bf16 %v3603_v44, %v3601_v29  ;;  %v3605_v37 = vpop.eup %3604  ;;  %v1422_v35 = vmul.f32 1.442695, %v1393_v4  ;;  %v3766_v29 = vld [vmem:[%s6496_s3 + $0x20] sm:$0xff]  ;;  %v5453_v4 = vld [vmem:[%s6494_s1 + $0x58] sm:$0xff] }
 0x24a   :  { %3614 = vpow2.f32 %v1408_v53  ;;  %v1388_v20 = vsub.f32 %v5274_v47, %v1365_v7  ;;  %v1379_v3 = vpop.xlane.xlu1 %1378  ;;  %v5386_v44 = vld [vmem:[%s6494_s1 + $0x40] sm:$0xff]  ;;  %v3780_v53 = vld [vmem:[%s6496_s3 + $0x70] sm:$0xff]  ;;  %s5965_s3 = sld [smem:[#allocation2 + $0x85]] }
 0x24b   :  { %3481 = vmatprep.mubr.bf16.mxu0 %v1460_v55  ;;  %3616 = vpow2.f32 %v1414_v8  ;;  %v1395_v42 = vsub.f32 %v5279_v59, %v1379_v3  ;;  %v5401_v8 = vld [vmem:[%s6494_s1] sm:$0xff]  ;;  %v5413_v7 = vld [vmem:[%s6494_s1 + $0x10] sm:$0xff]  ;;  %v6538_v3 = vmov 15  }
 0x24c   :  { %v3607_v6 = vpop.eup %3606  ;;  %v1412_v24 = vmul.f32 1.442695, %v1388_v20  ;;  %v5419_v55 = vld [vmem:[%s6494_s1 + $0x70] sm:$0xff]  ;;  %v5425_v20 = vld [vmem:[%s6494_s1 + $0x18] sm:$0xff] }
 0x24d   :  { %v1369_v32 = vpop.xlane.xlu0 %1368  ;;  %1432 = vadd.xlane.f32.xlu0 %v3607_v6  ;;  %1434 = vadd.xlane.f32.xlu1 %v3605_v37  ;;  %v1461_v12 = vpack.c.bf16 %v3605_v37, %v3607_v6  ;;  %v3609_v36 = vpop.eup %3608  ;;  %v3850_v37 = vmov 9   ;;  %v5432_v6 = vld [vmem:[%s6494_s1 + $0x28] sm:$0xff] }
 0x24e   :  { %3618 = vpow2.f32 %v1412_v24  ;;  %v1390_v17 = vsub.f32 %v5288_v34, %v1369_v32  ;;  %v1426_v34 = vmul.f32 1.442695, %v1395_v42  ;;  %v5439_v24 = vld [vmem:[%s6494_s1 + $0x38] sm:$0xff]  ;;  %v5460_v32 = vld [vmem:[%s6494_s1 + $0x68] sm:$0xff] }
 0x24f   :  { %3482 = vmatmul.mubr.bf16.vlgmr.msra.gmra.mrb[0].mxu0 %v1461_v12  ;;  %3620 = vpow2.f32 %v1418_v10  ;;  %v5446_v10 = vld [vmem:[%s6494_s1 + $0x48] sm:$0xff]  ;;  %v5467_v12 = vld [vmem:[%s6494_s1 + $0x78] sm:$0xff] }
 0x250   :  { %v3611_v38 = vpop.eup %3610  ;;  %v1416_v47 = vmul.f32 1.442695, %v1390_v17 }
 0x251   :  { %v1373_v5 = vpop.xlane.xlu0 %1372  ;;  %1436 = vadd.xlane.f32.xlu0 %v3611_v38  ;;  %1438 = vadd.xlane.f32.xlu1 %v3609_v36  ;;  %v1462_v50 = vpack.c.bf16 %v3609_v36, %v3611_v38  ;;  %v3613_v9 = vpop.eup %3612  ;;  %v6544_v36 = vmov 10  }
 0x252   :  { %3622 = vpow2.f32 %v1416_v47  ;;  %v1392_v33 = vsub.f32 %v5294_v39, %v1373_v5 }
 0x253   :  { %3485 = vmatprep.mubr.bf16.mxu0 %v1462_v50  ;;  %3624 = vpow2.f32 %v1422_v35 }
 0x254   :  { %v3615_v16 = vpop.eup %3614  ;;  %v1420_v40 = vmul.f32 1.442695, %v1392_v33 }
 0x255   :  { %v1377_v25 = vpop.xlane.xlu0 %1376  ;;  %1440 = vadd.xlane.f32.xlu0 %v3615_v16  ;;  %1442 = vadd.xlane.f32.xlu1 %v3613_v9  ;;  %v1463_v45 = vpack.c.bf16 %v3613_v9, %v3615_v16  ;;  %v3617_v51 = vpop.eup %3616 }
 0x256   :  { %3626 = vpow2.f32 %v1420_v40  ;;  %v1394_v59 = vsub.f32 %v5298_v23, %v1377_v25 }
 0x257   :  { %3486 = vmatmul.mubr.bf16.gmra.mrb[4].mxu0 %v1463_v45  ;;  %3628 = vpow2.f32 %v1426_v34 }
 0x258   :  { %v3619_v57 = vpop.eup %3618  ;;  %v1424_v63 = vmul.f32 1.442695, %v1394_v59 }
 0x259   :  { %1444 = vadd.xlane.f32.xlu0 %v3619_v57  ;;  %1446 = vadd.xlane.f32.xlu1 %v3617_v51  ;;  %v1464_v39 = vpack.c.bf16 %v3617_v51, %v3619_v57  ;;  %v3621_v30 = vpop.eup %3620  ;;  %v6540_v51 = vmov 11  }
 0x25a   :  { %3630 = vpow2.f32 %v1424_v63 }
 0x25b   :  { %3489 = vmatprep.mubr.bf16.mxu0 %v1464_v39 }
 0x25c   :  { %v3623_v14 = vpop.eup %3622 }
 0x25d   :  { %1448 = vadd.xlane.f32.xlu0 %v3623_v14  ;;  %1450 = vadd.xlane.f32.xlu1 %v3621_v30  ;;  %v1465_v41 = vpack.c.bf16 %v3621_v30, %v3623_v14  ;;  %v3625_v27 = vpop.eup %3624 }
 0x25f   :  { %3490 = vmatmul.mubr.bf16.gmra.mrb[8].mxu0 %v1465_v41  ;;  %v6536_v41 = vmov 12  }
 0x260   :  { %v3627_v28 = vpop.eup %3626 }
 0x261   :  { %1452 = vadd.xlane.f32.xlu0 %v3627_v28  ;;  %1454 = vadd.xlane.f32.xlu1 %v3625_v27  ;;  %v1466_v23 = vpack.c.bf16 %v3625_v27, %v3627_v28  ;;  %v3629_v0 = vpop.eup %3628 }
 0x263   :  { %3493 = vmatprep.mubr.bf16.mxu0 %v1466_v23 }
 0x264   :  { %v3631_v62 = vpop.eup %3630 }
 0x265   :  { %1456 = vadd.xlane.f32.xlu0 %v3631_v62  ;;  %1458 = vadd.xlane.f32.xlu1 %v3629_v0  ;;  %v1467_v13 = vpack.c.bf16 %v3629_v0, %v3631_v62 }
 0x267   :  { %3494 = vmatmul.mubr.bf16.gmra.mrb[12].mxu0 %v1467_v13 }
 0x276   :  { %1607 = vperm.xlu1 %3552, %v3761_v48  }
 0x27a   :  { %1611 = vperm.xlu1 %3552, %v3762_v31   ;;  %v6542_v31 = vmov 13  }
 0x27b   :  { %1603 = vperm.xlu0 %3551, %v3763_v56  }
 0x27e   :  { %1615 = vperm.xlu1 %3552, %v3764_v18   ;;  %v5567_v18 = vld [vmem:[%s6493_s0 + $0x8] sm:$0xff] }
 0x27f   :  { %1639 = vperm.xlu0 %3551, %v3765_v58  }
 0x282   :  { %1619 = vperm.xlu1 %3552, %v3766_v29   ;;  %v3793_v29 = vld [vmem:[%s6495_s2] sm:$0x3]  ;;  %s5638_s2 = sld [smem:[#allocation2 + $0x81]] }
 0x283   :  { %1647 = vperm.xlu0 %3551, %v3767_v49   ;;  %v6799_v49 = vld [vmem:[#allocation72_spill] sm:$0xff] }
 0x286   :  { %1623 = vperm.xlu1 %3552, %v3768_v46   ;;  %v5577_v46 = vrot.slane %v3793_v29, %v6799_v49 }
 0x287   :  { %1655 = vperm.xlu0 %3551, %v3769_v43   ;;  %v6800_v43 = vld [vmem:[#allocation64_spill] sm:$0xff] }
 0x28a   :  { %1627 = vperm.xlu1 %3552, %v3770_v1   ;;  %v5581_v1 = vrot.slane %v5567_v18, %v6800_v43 }
 0x28b   :  { %1663 = vperm.xlu0 %3551, %v3771_v19  }
 0x28e   :  { %1631 = vperm.xlu1 %3552, %v3772_v21  }
 0x28f   :  { %3554 = vset.pattern.permute.xlu0 %v3849_v61 }
 0x290   :  { %1707 = vperm.xlu0 %3554, %v5359_v15  }
 0x292   :  { %1635 = vperm.xlu1 %3552, %v3774_v52  }
 0x294   :  { %1719 = vperm.xlu0 %3554, %v5368_v11  }
 0x296   :  { %1643 = vperm.xlu1 %3552, %v3776_v26  }
 0x298   :  { %1727 = vperm.xlu0 %3554, %v5377_v2  }
 0x29a   :  { %1651 = vperm.xlu1 %3552, %v3778_v54  }
 0x29c   :  { %1735 = vperm.xlu0 %3554, %v5386_v44  }
 0x29e   :  { %1659 = vperm.xlu1 %3552, %v3780_v53   ;;  %v5589_v53 = vstv %s3357_s9 }
 0x2a0   :  { %1743 = vperm.xlu0 %3554, %v5395_v60  }
 0x2a2   :  { %3553 = vset.pattern.permute.xlu1 %v3849_v61 }
 0x2a3   :  { %1703 = vperm.xlu1 %3553, %v5401_v8  }
 0x2a4   :  { %1751 = vperm.xlu0 %3554, %v5407_v22  }
 0x2a7   :  { %1711 = vperm.xlu1 %3553, %v5413_v7  }
 0x2a8   :  { %1759 = vperm.xlu0 %3554, %v5419_v55  }
 0x2ab   :  { %1715 = vperm.xlu1 %3553, %v5425_v20  }
 0x2ac   :  { %3555 = vset.pattern.permute.xlu0 %v3850_v37 }
 0x2ad   :  { %1837 = vperm.xlu0 %3555, %v5401_v8  }
 0x2af   :  { %1723 = vperm.xlu1 %3553, %v5432_v6  }
 0x2b1   :  { %1849 = vperm.xlu0 %3555, %v5425_v20  }
 0x2b3   :  { %1731 = vperm.xlu1 %3553, %v5439_v24  }
 0x2b5   :  { %1857 = vperm.xlu0 %3555, %v5432_v6  }
 0x2b7   :  { %1739 = vperm.xlu1 %3553, %v5446_v10  }
 0x2b9   :  { %1865 = vperm.xlu0 %3555, %v5439_v24  }
 0x2bb   :  { %1747 = vperm.xlu1 %3553, %v5453_v4  }
 0x2bd   :  { %1873 = vperm.xlu0 %3555, %v5446_v10  }
 0x2bf   :  { %1755 = vperm.xlu1 %3553, %v5460_v32  }
 0x2c1   :  { %1881 = vperm.xlu0 %3555, %v5453_v4  }
 0x2c3   :  { %1763 = vperm.xlu1 %3553, %v5467_v12  }
 0x2c5   :  { %1889 = vperm.xlu0 %3555, %v5460_v32  }
 0x2c7   :  { %3556 = vset.pattern.permute.xlu1 %v3850_v37  ;;  %v6801_v37 = vld [vmem:[#allocation65_spill] sm:$0xff] }
 0x2c8   :  { %1841 = vperm.xlu1 %3556, %v5359_v15  }
 0x2c9   :  { %1897 = vperm.xlu0 %3555, %v5467_v12  }
 0x2ca   :  { %v5479_v17 = vpop.xlane.xlu0 %1428 }
 0x2cb   :  { %6783 = vst [vmem:[#allocation49_spill] sm:$0xff] %v5479_v17 }
 0x2cc   :  { %1845 = vperm.xlu1 %3556, %v5413_v7  }
 0x2cd   :  { %3568 = vset.pattern.permute.xlu0 %v6538_v3 }
 0x2ce   :  { %2649 = vperm.xlu0 %3568, %v5413_v7  }
 0x2d0   :  { %1853 = vperm.xlu1 %3556, %v5368_v11  }
 0x2d2   :  { %2665 = vperm.xlu0 %3568, %v5377_v2  }
 0x2d4   :  { %1861 = vperm.xlu1 %3556, %v5377_v2  }
 0x2d6   :  { %3579 = vset.pattern.permute.xlu0 %v6544_v36  ;;  %v5482_v38 = vpop.xlane.xlu1 %1430 }
 0x2d7   :  { %6784 = vst [vmem:[#allocation51_spill] sm:$0xff] %v5482_v38  ;;  %1975 = vperm.xlu0 %3579, %v5359_v15  }
 0x2d8   :  { %1869 = vperm.xlu1 %3556, %v5386_v44  }
 0x2da   :  { %v5486_v47 = vpop.xlane.xlu0 %1432  ;;  %v5488_v35 = vpop.xlane.xlu1 %1434 }
 0x2db   :  { %6785 = vst [vmem:[#allocation63_spill] sm:$0xff] %v5486_v47  ;;  %6786 = vst [vmem:[#allocation53_spill] sm:$0xff] %v5488_v35  ;;  %1991 = vperm.xlu0 %3579, %v5432_v6  }
 0x2dc   :  { %1877 = vperm.xlu1 %3556, %v5395_v60  }
 0x2de   :  { %v5492_v42 = vpop.xlane.xlu0 %1436  ;;  %v5494_v5 = vpop.xlane.xlu1 %1438 }
 0x2df   :  { %6787 = vst [vmem:[#allocation56_spill] sm:$0xff] %v5492_v42  ;;  %6788 = vst [vmem:[#allocation70_spill] sm:$0xff] %v5494_v5  ;;  %1995 = vperm.xlu0 %3579, %v5377_v2  }
 0x2e0   :  { %1885 = vperm.xlu1 %3556, %v5407_v22  }
 0x2e2   :  { %v5498_v50 = vpop.xlane.xlu0 %1440  ;;  %v5500_v33 = vpop.xlane.xlu1 %1442 }
 0x2e3   :  { %6789 = vst [vmem:[#allocation67_spill] sm:$0xff] %v5498_v50  ;;  %6790 = vst [vmem:[#allocation73_spill] sm:$0xff] %v5500_v33  ;;  %2007 = vperm.xlu0 %3579, %v5446_v10  }
 0x2e4   :  { %1893 = vperm.xlu1 %3556, %v5419_v55  }
 0x2e6   :  { %v5504_v9 = vpop.xlane.xlu0 %1444  ;;  %v5506_v16 = vpop.xlane.xlu1 %1446 }
 0x2e7   :  { %6791 = vst [vmem:[#allocation80_spill] sm:$0xff] %v5504_v9  ;;  %6792 = vst [vmem:[#allocation57_spill] sm:$0xff] %v5506_v16  ;;  %2011 = vperm.xlu0 %3579, %v5395_v60  }
 0x2e8   :  { %3557 = vset.pattern.permute.xlu1 %v6544_v36 }
 0x2e9   :  { %1971 = vperm.xlu1 %3557, %v5401_v8  }
 0x2ea   :  { %v5511_v40 = vpop.xlane.xlu0 %1448  ;;  %v5513_v34 = vpop.xlane.xlu1 %1450 }
 0x2eb   :  { %6793 = vst [vmem:[#allocation82_spill] sm:$0xff] %v5511_v40  ;;  %6794 = vst [vmem:[#allocation22_spill] sm:$0xff] %v5513_v34  ;;  %2023 = vperm.xlu0 %3579, %v5460_v32   ;;  %v6809_v34 = vmov 13  }
 0x2ed   :  { %1979 = vperm.xlu1 %3557, %v5413_v7  }
 0x2ee   :  { %v5517_v25 = vpop.xlane.xlu1 %1454  ;;  %v5520_v45 = vpop.xlane.xlu0 %1452 }
 0x2ef   :  { %6795 = vst [vmem:[#allocation39_spill] sm:$0xff] %v5517_v25  ;;  %2027 = vperm.xlu0 %3579, %v5419_v55   ;;  %6796 = vst [vmem:[#allocation15_spill] sm:$0xff] %v5520_v45 }
 0x2f1   :  { %1983 = vperm.xlu1 %3557, %v5425_v20  }
 0x2f2   :  { %v5523_v59 = vpop.xlane.xlu1 %1458  ;;  %v5528_v57 = vpop.xlane.xlu0 %1456 }
 0x2f3   :  { %6797 = vst [vmem:[#allocation16_spill] sm:$0xff] %v5523_v59  ;;  %3585 = vset.pattern.permute.xlu0 %v6540_v51  ;;  %6798 = vst [vmem:[#allocation17_spill] sm:$0xff] %v5528_v57 }
 0x2f4   :  { %2105 = vperm.xlu0 %3585, %v5401_v8  }
 0x2f5   :  { %3558 = vset.pattern.permute.xlu1 %v6540_v51 }
 0x2f6   :  { %2109 = vperm.xlu1 %3558, %v5359_v15   ;;  %v5531_v63 = vpop.permute.xlu1 %1607 }
 0x2f8   :  { %2117 = vperm.xlu0 %3585, %v5425_v20  }
 0x2fa   :  { %v5534_v39 = vpop.permute.xlu0 %1603  ;;  %2113 = vperm.xlu1 %3558, %v5413_v7   ;;  %v5537_v30 = vpop.permute.xlu1 %1611 }
 0x2fc   :  { %2125 = vperm.xlu0 %3585, %v5432_v6  }
 0x2fe   :  { %v5540_v14 = vpop.permute.xlu0 %1639  ;;  %3559 = vset.pattern.permute.xlu1 %v6536_v41  ;;  %v5543_v27 = vpop.permute.xlu1 %1615 }
 0x2ff   :  { %2239 = vperm.xlu1 %3559, %v5401_v8  }
 0x300   :  { %2129 = vperm.xlu0 %3585, %v5377_v2  }
 0x302   :  { %v5547_v28 = vpop.permute.xlu0 %1647  ;;  %v1620_v23 = vpop.permute.xlu1 %1619 }
 0x303   :  { %2247 = vperm.xlu1 %3559, %v5413_v7   ;;  %v1670_v61 = vadd.f32 %v1620_v23, %v5577_v46 }
 0x304   :  { %2141 = vperm.xlu0 %3585, %v5446_v10  }
 0x305   :  { %v1686_v29 = vadd.f32 %v1670_v61, %v6801_v37 }
 0x306   :  { %v5551_v0 = vpop.permute.xlu0 %1655  ;;  %v5553_v62 = vpop.permute.xlu1 %1623 }
 0x307   :  { %2251 = vperm.xlu1 %3559, %v5425_v20  }
 0x308   :  { %2145 = vperm.xlu0 %3585, %v5395_v60  }
 0x30a   :  { %v5557_v13 = vpop.permute.xlu0 %1663  ;;  %v1628_v48 = vpop.permute.xlu1 %1627 }
 0x30b   :  { %3560 = vset.pattern.permute.xlu1 %v6542_v31  ;;  %v1672_v43 = vadd.f32 %v1628_v48, %v5577_v46 }
 0x30c   :  { %2157 = vperm.xlu0 %3585, %v5460_v32   ;;  %2377 = vperm.xlu1 %3560, %v5359_v15  }
 0x30e   :  { %v5562_v56 = vpop.permute.xlu1 %1631 }
 0x30f   :  { %v5569_v58 = vpop.permute.xlu0 %1707 }
 0x310   :  { %2161 = vperm.xlu0 %3585, %v5419_v55   ;;  %2381 = vperm.xlu1 %3560, %v5413_v7  }
 0x312   :  { %v1636_v19 = vpop.permute.xlu1 %1635 }
 0x313   :  { %v1720_v21 = vpop.permute.xlu0 %1719  ;;  %v1674_v48 = vadd.f32 %v1636_v19, %v5577_v46 }
 0x314   :  { %v1770_v52 = vadd.f32 %v1720_v21, %v5581_v1  ;;  %3590 = vset.pattern.permute.xlu0 %v6536_v41  ;;  %3561 = vset.pattern.permute.xlu1 %v6544_v36  ;;  %v6546_v41 = vmov 14   ;;  %v6802_v36 = vld [vmem:[#allocation68_spill] sm:$0xff] }
 0x315   :  { %2243 = vperm.xlu0 %3590, %v5359_v15   ;;  %1987 = vperm.xlu1 %3561, %v5368_v11   ;;  %v1688_v61 = vadd.f32 %v1672_v43, %v6802_v36 }
 0x316   :  { %v1787_v26 = vand.u32 2147483647, %v1770_v52  ;;  %v1644_v54 = vpop.permute.xlu1 %1643 }
 0x317   :  { %v1728_v55 = vpop.permute.xlu0 %1727  ;;  %v1676_v57 = vadd.f32 %v1644_v54, %v5577_v46 }
 0x318   :  { %v1804_v23 = vmul.f32 %v5589_v53, %v1787_v26  ;;  %v1772_v21 = vadd.f32 %v1728_v55, %v5581_v1 }
 0x319   :  { %2259 = vperm.xlu0 %3590, %v5432_v6   ;;  %3562 = vset.pattern.permute.xlu1 %v6546_v41 }
 0x31a   :  { %v5597_v3 = vadd.f32 %v1804_v23, %v1686_v29  ;;  %v1789_v52 = vand.u32 2147483647, %v1772_v21  ;;  %2507 = vperm.xlu1 %3562, %v5401_v8   ;;  %v1652_v51 = vpop.permute.xlu1 %1651  ;;  %v6803_v21 = vld [vmem:[#allocation71_spill] sm:$0xff] }
 0x31b   :  { %v1736_v31 = vpop.permute.xlu0 %1735  ;;  %v1690_v59 = vadd.f32 %v1674_v48, %v6803_v21 }
 0x31c   :  { %v1806_v26 = vmul.f32 %v5589_v53, %v1789_v52  ;;  %v1774_v55 = vadd.f32 %v1736_v31, %v5581_v1 }
 0x31d   :  { %2275 = vperm.xlu0 %3590, %v5446_v10  }
 0x31e   :  { %v5605_v37 = vadd.f32 %v1806_v26, %v1688_v61  ;;  %v1791_v41 = vand.u32 2147483647, %v1774_v55  ;;  %2511 = vperm.xlu1 %3562, %v5359_v15   ;;  %v1660_v29 = vpop.permute.xlu1 %1659  ;;  %v6805_v61 = vmov 10   ;;  %v1666_v55 = vadd.f32 %v5534_v39, %v5577_v46 }
 0x31f   :  { %v1744_v23 = vpop.permute.xlu0 %1743 }
 0x320   :  { %v1808_v36 = vmul.f32 %v5589_v53, %v1791_v41  ;;  %v1776_v19 = vadd.f32 %v1744_v23, %v5581_v1  ;;  %v6807_v41 = vld [vmem:[#allocation75_spill] sm:$0xff] }
 0x321   :  { %2291 = vperm.xlu0 %3590, %v5460_v32   ;;  %v1692_v23 = vadd.f32 %v1676_v57, %v6807_v41  ;;  %v6812_v41 = vmov 14  }
 0x322   :  { %v5613_v31 = vadd.f32 %v1808_v36, %v1690_v59  ;;  %v1793_v43 = vand.u32 2147483647, %v1776_v19  ;;  %v5615_v52 = vpop.f32.mrb[0].mxu0  ;;  %3563 = vset.pattern.permute.xlu1 %v6805_v61  ;;  %v1704_v26 = vpop.permute.xlu1 %1703  ;;  %v1678_v59 = vadd.f32 %v1652_v51, %v5577_v46  ;;  %v6811_v51 = vld [vmem:[#allocation59_spill] sm:$0xff] }
 0x323   :  { %6804 = vst [vmem:[#allocation37_spill] sm:$0xff] %v5615_v52  ;;  %v1766_v48 = vadd.f32 %v1704_v26, %v5581_v1  ;;  %v1752_v54 = vpop.permute.xlu0 %1751  ;;  %v5621_v21 = vpop.f32.mrb[1].mxu0  ;;  %1999 = vperm.xlu1 %3563, %v5439_v24   ;;  %v1682_v57 = vadd.f32 %v1666_v55, %v6811_v51  ;;  %v1680_v52 = vadd.f32 %v1660_v29, %v5577_v46 }
 0x324   :  { %6806 = vst [vmem:[#allocation81_spill] sm:$0xff] %v5621_v21  ;;  %v1810_v36 = vmul.f32 %v5589_v53, %v1793_v43  ;;  %v1778_v19 = vadd.f32 %v1752_v54, %v5581_v1  ;;  %v5628_v25 = vpop.f32.mrb[2].mxu0 }
 0x325   :  { %6808 = vst [vmem:[#allocation40_spill] sm:$0xff] %v5628_v25  ;;  %v1783_v45 = vand.u32 2147483647, %v1766_v48  ;;  %3594 = vset.pattern.permute.xlu0 %v6809_v34  ;;  %v5631_v39 = vpop.f32.mrb[3].mxu0  ;;  %v6813_v48 = vld [vmem:[#allocation77_spill] sm:$0xff]  ;;  %v5650_v25 = vrot.slane %v5567_v18, %v6799_v49 }
 0x326   :  { %6810 = vst [vmem:[#allocation83_spill] sm:$0xff] %v5631_v39  ;;  %v5633_v26 = vadd.f32 %v1810_v36, %v1692_v23  ;;  %v1795_v40 = vand.u32 2147483647, %v1778_v19  ;;  %2373 = vperm.xlu0 %3594, %v5401_v8   ;;  %v5636_v16 = vpop.permute.xlu1 %1711  ;;  %v1694_v9 = vadd.f32 %v1678_v59, %v6813_v48 }
 0x327   :  { %v1800_v43 = vmul.f32 %v5589_v53, %v1783_v45  ;;  %v1760_v54 = vpop.permute.xlu0 %1759  ;;  %3564 = vset.pattern.permute.xlu1 %v6812_v41  ;;  %v1669_v45 = vadd.f32 %v5543_v27, %v5577_v46 }
 0x328   :  { %v1812_v23 = vmul.f32 %v5589_v53, %v1795_v40  ;;  %v1780_v36 = vadd.f32 %v1760_v54, %v5581_v1  ;;  %2519 = vperm.xlu1 %3564, %v5425_v20  }
 0x329   :  { %v1816_v19 = vadd.f32 %v1800_v43, %v1682_v57  ;;  %v6816_v57 = vld [vmem:[#allocation79_spill] sm:$0xff] }
 0x32a   :  { %v5654_v55 = vadd.f32 %v1812_v23, %v1694_v9  ;;  %v1797_v51 = vand.u32 2147483647, %v1780_v36  ;;  %2385 = vperm.xlu0 %3594, %v5425_v20   ;;  %v5657_v29 = vpop.f32.mrb[4].mxu0  ;;  %v1716_v40 = vpop.permute.xlu1 %1715  ;;  %v1696_v43 = vadd.f32 %v1680_v52, %v6816_v57  ;;  %v6818_v9 = vmov 11  }
 0x32b   :  { %6814 = vst [vmem:[#allocation9_spill] sm:$0xff] %v5657_v29  ;;  %v1769_v59 = vadd.f32 %v1716_v40, %v5581_v1  ;;  %v5660_v54 = vpop.f32.mrb[5].mxu0  ;;  %v6820_v29 = vld [vmem:[#allocation60_spill] sm:$0xff] }
 0x32c   :  { %6815 = vst [vmem:[#allocation21_spill] sm:$0xff] %v5660_v54  ;;  %v1814_v49 = vmul.f32 %v5589_v53, %v1797_v51  ;;  %v1838_v48 = vpop.permute.xlu0 %1837  ;;  %v5664_v33 = vpop.f32.mrb[6].mxu0  ;;  %3565 = vset.pattern.permute.xlu1 %v6818_v9  ;;  %v1685_v40 = vadd.f32 %v1669_v45, %v6820_v29  ;;  %v5675_v54 = vstv %s5638_s2  ;;  %v1671_v51 = vadd.f32 %v5553_v62, %v5577_v46 }
 0x32d   :  { %6817 = vst [vmem:[#allocation28_spill] sm:$0xff] %v5664_v33  ;;  %v1786_v27 = vand.u32 2147483647, %v1769_v59  ;;  %v1900_v23 = vadd.f32 %v1838_v48, %v5650_v25  ;;  %v5668_v36 = vpop.f32.mrb[7].mxu0  ;;  %2121 = vperm.xlu1 %3565, %v5368_v11  }
 0x32e   :  { %6819 = vst [vmem:[#allocation24_spill] sm:$0xff] %v5668_v36  ;;  %v5672_v39 = vadd.f32 %v1814_v49, %v1696_v43  ;;  %2389 = vperm.xlu0 %3594, %v5368_v11   ;;  %v1724_v52 = vpop.permute.xlu1 %1723  ;;  %v6821_v43 = vmov 15  }
 0x32f   :  { %v1803_v59 = vmul.f32 %v5589_v53, %v1786_v27  ;;  %v1917_v57 = vand.u32 2147483647, %v1900_v23  ;;  %v1771_v48 = vadd.f32 %v1724_v52, %v5581_v1  ;;  %v6823_v27 = vld [vmem:[#allocation62_spill] sm:$0xff] }
 0x330   :  { %v1850_v33 = vpop.permute.xlu0 %1849  ;;  %v1687_v23 = vadd.f32 %v1671_v51, %v6823_v27 }
 0x331   :  { %v1819_v36 = vadd.f32 %v1803_v59, %v1685_v40  ;;  %v1934_v50 = vmul.f32 %v5675_v54, %v1917_v57  ;;  %v1788_v45 = vand.u32 2147483647, %v1771_v48  ;;  %v1903_v29 = vadd.f32 %v1850_v33, %v5650_v25  ;;  %3566 = vset.pattern.permute.xlu1 %v6821_v43 }
 0x332   :  { %2401 = vperm.xlu0 %3594, %v5439_v24   ;;  %v5686_v49 = vpop.f32.mrb[8].mxu0  ;;  %2641 = vperm.xlu1 %3566, %v5401_v8   ;;  %v1732_v62 = vpop.permute.xlu1 %1731  ;;  %v1673_v33 = vadd.f32 %v5562_v56, %v5577_v46  ;;  %v1675_v56 = vadd.f32 %v5540_v14, %v5577_v46 }
 0x333   :  { %6822 = vst [vmem:[#allocation10_spill] sm:$0xff] %v5686_v49  ;;  %v5690_v21 = vadd.f32 %v1934_v50, %v1816_v19  ;;  %v1805_v40 = vmul.f32 %v5589_v53, %v1788_v45  ;;  %v1920_v52 = vand.u32 2147483647, %v1903_v29  ;;  %v5693_v59 = vpop.f32.mrb[9].mxu0  ;;  %v1773_v57 = vadd.f32 %v1732_v62, %v5581_v1 }
 0x334   :  { %6824 = vst [vmem:[#allocation29_spill] sm:$0xff] %v5693_v59  ;;  %v1858_v48 = vpop.permute.xlu0 %1857  ;;  %v5698_v5 = vpop.f32.mrb[10].mxu0 }
 0x335   :  { %6825 = vst [vmem:[#allocation23_spill] sm:$0xff] %v5698_v5  ;;  %v1821_v49 = vadd.f32 %v1805_v40, %v1687_v23  ;;  %v1937_v8 = vmul.f32 %v5675_v54, %v1920_v52  ;;  %v1905_v51 = vadd.f32 %v1858_v48, %v5650_v25  ;;  %v5702_v50 = vpop.f32.mrb[11].mxu0  ;;  %v1790_v19 = vand.u32 2147483647, %v1773_v57  ;;  %v6827_v23 = vld [vmem:[#allocation66_spill] sm:$0xff] }
 0x336   :  { %6826 = vst [vmem:[#allocation11_spill] sm:$0xff] %v5702_v50  ;;  %2405 = vperm.xlu0 %3594, %v5386_v44   ;;  %2645 = vperm.xlu1 %3566, %v5359_v15   ;;  %v1740_v45 = vpop.permute.xlu1 %1739  ;;  %v1689_v40 = vadd.f32 %v1673_v33, %v6827_v23 }
 0x337   :  { %v5708_v29 = vadd.f32 %v1937_v8, %v1819_v36  ;;  %v1922_v62 = vand.u32 2147483647, %v1905_v51  ;;  %v1775_v27 = vadd.f32 %v1740_v45, %v5581_v1  ;;  %v1807_v52 = vmul.f32 %v5589_v53, %v1790_v19  ;;  %v6829_v36 = vld [vmem:[#allocation69_spill] sm:$0xff] }
 0x338   :  { %v1866_v48 = vpop.permute.xlu0 %1865  ;;  %v1691_v8 = vadd.f32 %v1675_v56, %v6829_v36 }
 0x339   :  { %v1939_v57 = vmul.f32 %v5675_v54, %v1922_v62  ;;  %v1792_v5 = vand.u32 2147483647, %v1775_v27  ;;  %v1907_v50 = vadd.f32 %v1866_v48, %v5650_v25  ;;  %v1823_v15 = vadd.f32 %v1807_v52, %v1689_v40 }
 0x33a   :  { %2417 = vperm.xlu0 %3594, %v5453_v4   ;;  %v5716_v59 = vpop.f32.mrb[12].mxu0  ;;  %3567 = vset.pattern.permute.xlu1 %v6818_v9  ;;  %v1748_v14 = vpop.permute.xlu1 %1747  ;;  %v1677_v62 = vadd.f32 %v5547_v28, %v5577_v46 }
 0x33b   :  { %6828 = vst [vmem:[#allocation30_spill] sm:$0xff] %v5716_v59  ;;  %v5720_v51 = vadd.f32 %v1939_v57, %v1821_v49  ;;  %v1809_v33 = vmul.f32 %v5589_v53, %v1792_v5  ;;  %v1924_v19 = vand.u32 2147483647, %v1907_v50  ;;  %v5723_v45 = vpop.f32.mrb[13].mxu0  ;;  %2133 = vperm.xlu1 %3567, %v5439_v24   ;;  %v1777_v27 = vadd.f32 %v1748_v14, %v5581_v1  ;;  %v6835_v59 = vld [vmem:[#allocation76_spill] sm:$0xff] }
 0x33c   :  { %6830 = vst [vmem:[#allocation27_spill] sm:$0xff] %v5723_v45  ;;  %v1874_v23 = vpop.permute.xlu0 %1873  ;;  %v5729_v40 = vpop.f32.mrb[14].mxu0  ;;  %v1679_v5 = vadd.f32 %v5551_v0, %v5577_v46 }
 0x33d   :  { %6831 = vst [vmem:[#allocation12_spill] sm:$0xff] %v5729_v40  ;;  %v1825_v52 = vadd.f32 %v1809_v33, %v1691_v8  ;;  %v1941_v56 = vmul.f32 %v5675_v54, %v1924_v19  ;;  %v1909_v49 = vadd.f32 %v1874_v23, %v5650_v25  ;;  %v5733_v48 = vpop.f32.mrb[15].mxu0  ;;  %v1794_v50 = vand.u32 2147483647, %v1777_v27  ;;  %v6834_v8 = vld [vmem:[#allocation74_spill] sm:$0xff] }
 0x33e   :  { %6832 = vst [vmem:[#allocation33_spill] sm:$0xff] %v5733_v48  ;;  %2421 = vperm.xlu0 %3594, %v5407_v22   ;;  %v1756_v57 = vpop.permute.xlu1 %1755  ;;  %v1693_v33 = vadd.f32 %v1677_v62, %v6834_v8 }
 0x33f   :  { %v5738_v28 = vadd.f32 %v1941_v56, %v1823_v15  ;;  %v1926_v14 = vand.u32 2147483647, %v1909_v49  ;;  %v1779_v36 = vadd.f32 %v1756_v57, %v5581_v1  ;;  %3569 = vset.pattern.permute.xlu1 %v6821_v43  ;;  %v1811_v19 = vmul.f32 %v5589_v53, %v1794_v50 }
 0x340   :  { %v1882_v23 = vpop.permute.xlu0 %1881  ;;  %2653 = vperm.xlu1 %3569, %v5425_v20   ;;  %v1695_v15 = vadd.f32 %v1679_v5, %v6835_v59  ;;  %v1681_v56 = vadd.f32 %v5557_v13, %v5577_v46 }
 0x341   :  { %6833 = vst [vmem:[#allocation32_spill] sm:$0xff] %v5738_v28  ;;  %v1943_v0 = vmul.f32 %v5675_v54, %v1926_v14  ;;  %v1796_v27 = vand.u32 2147483647, %v1779_v36  ;;  %v1911_v40 = vadd.f32 %v1882_v23, %v5650_v25  ;;  %v1827_v49 = vadd.f32 %v1811_v19, %v1693_v33 }
 0x342   :  { %2433 = vperm.xlu0 %3594, %v5467_v12   ;;  %v1764_v57 = vpop.permute.xlu1 %1763  ;;  %v6836_v36 = vmov 12  }
 0x343   :  { %v5751_v62 = vadd.f32 %v1943_v0, %v1825_v52  ;;  %v1813_v50 = vmul.f32 %v5589_v53, %v1796_v27  ;;  %v1928_v8 = vand.u32 2147483647, %v1911_v40  ;;  %v1781_v20 = vadd.f32 %v1764_v57, %v5581_v1  ;;  %v6837_v52 = vld [vmem:[#allocation78_spill] sm:$0xff] }
 0x344   :  { %v1890_v14 = vpop.permute.xlu0 %1889  ;;  %3570 = vset.pattern.permute.xlu1 %v6836_v36  ;;  %v1697_v33 = vadd.f32 %v1681_v56, %v6837_v52 }
 0x345   :  { %v1829_v23 = vadd.f32 %v1813_v50, %v1695_v15  ;;  %v1945_v59 = vmul.f32 %v5675_v54, %v1928_v8  ;;  %v1798_v5 = vand.u32 2147483647, %v1781_v20  ;;  %v1913_v13 = vadd.f32 %v1890_v14, %v5650_v25  ;;  %2255 = vperm.xlu1 %3570, %v5368_v11  }
 0x346   :  { %3596 = vset.pattern.permute.xlu0 %v6812_v41 }
 0x347   :  { %v5761_v19 = vadd.f32 %v1945_v59, %v1827_v49  ;;  %v1815_v40 = vmul.f32 %v5589_v53, %v1798_v5  ;;  %v1930_v0 = vand.u32 2147483647, %v1913_v13  ;;  %2515 = vperm.xlu0 %3596, %v5413_v7   ;;  %v5765_v27 = vpop.permute.xlu1 %1841 }
 0x348   :  { %v1898_v15 = vpop.permute.xlu0 %1897 }
 0x349   :  { %6838 = vst [vmem:[#allocation13_spill] sm:$0xff] %v5761_v19  ;;  %v1831_v57 = vadd.f32 %v1815_v40, %v1697_v33  ;;  %v1947_v50 = vmul.f32 %v5675_v54, %v1930_v0  ;;  %v1915_v8 = vadd.f32 %v1898_v15, %v5650_v25  ;;  %2263 = vperm.xlu1 %3570, %v5377_v2  }
 0x34b   :  { %v5770_v20 = vadd.f32 %v1947_v50, %v1829_v23  ;;  %v1932_v56 = vand.u32 2147483647, %v1915_v8  ;;  %v5772_v49 = vpop.permute.xlu1 %1845  ;;  %2531 = vperm.xlu0 %3596, %v5377_v2  }
 0x34d   :  { %v1949_v14 = vmul.f32 %v5675_v54, %v1932_v56  ;;  %2267 = vperm.xlu1 %3570, %v5439_v24   ;;  %v5777_v7 = vpop.permute.xlu0 %2649 }
 0x34e   :  { %6839 = vst [vmem:[#allocation35_spill] sm:$0xff] %v5777_v7 }
 0x34f   :  { %v5779_v59 = vadd.f32 %v1949_v14, %v1831_v57  ;;  %v1854_v5 = vpop.permute.xlu1 %1853  ;;  %2547 = vperm.xlu0 %3596, %v5395_v60  }
 0x350   :  { %v1904_v13 = vadd.f32 %v1854_v5, %v5650_v25 }
 0x351   :  { %6840 = vst [vmem:[#allocation31_spill] sm:$0xff] %v5779_v59  ;;  %3571 = vset.pattern.permute.xlu1 %v6809_v34  ;;  %v5784_v23 = vpop.permute.xlu0 %2665 }
 0x352   :  { %6841 = vst [vmem:[#allocation14_spill] sm:$0xff] %v5784_v23  ;;  %v1921_v52 = vand.u32 2147483647, %v1904_v13  ;;  %2393 = vperm.xlu1 %3571, %v5432_v6  }
 0x353   :  { %v1862_v33 = vpop.permute.xlu1 %1861  ;;  %2559 = vperm.xlu0 %3596, %v5460_v32  }
 0x354   :  { %v1938_v40 = vmul.f32 %v5675_v54, %v1921_v52  ;;  %v1906_v0 = vadd.f32 %v1862_v33, %v5650_v25 }
 0x356   :  { %v5791_v15 = vadd.f32 %v1938_v40, %v5597_v3  ;;  %v1923_v57 = vand.u32 2147483647, %v1906_v0  ;;  %v5793_v50 = vpop.permute.xlu0 %1975  ;;  %2397 = vperm.xlu1 %3571, %v5377_v2  }
 0x357   :  { %v1870_v8 = vpop.permute.xlu1 %1869  ;;  %3598 = vset.pattern.permute.xlu0 %v6821_v43 }
 0x358   :  { %6842 = vst [vmem:[#allocation38_spill] sm:$0xff] %v5791_v15  ;;  %v1940_v56 = vmul.f32 %v5675_v54, %v1923_v57  ;;  %v1908_v14 = vadd.f32 %v1870_v8, %v5650_v25  ;;  %2681 = vperm.xlu0 %3598, %v5395_v60  }
 0x35a   :  { %v5801_v32 = vadd.f32 %v1940_v56, %v5605_v37  ;;  %v1925_v5 = vand.u32 2147483647, %v1908_v14  ;;  %v1992_v3 = vpop.permute.xlu0 %1991  ;;  %3572 = vset.pattern.permute.xlu1 %v6805_v61 }
 0x35b   :  { %2003 = vperm.xlu1 %3572, %v5386_v44   ;;  %v1878_v13 = vpop.permute.xlu1 %1877 }
 0x35c   :  { %v1942_v2 = vmul.f32 %v5675_v54, %v1925_v5  ;;  %v1910_v52 = vadd.f32 %v1878_v13, %v5650_v25  ;;  %2689 = vperm.xlu0 %3598, %v5407_v22  }
 0x35e   :  { %v5809_v33 = vadd.f32 %v1942_v2, %v5613_v31  ;;  %v1927_v40 = vand.u32 2147483647, %v1910_v52  ;;  %v1996_v0 = vpop.permute.xlu0 %1995 }
 0x35f   :  { %3573 = vset.pattern.permute.xlu1 %v6812_v41  ;;  %v1886_v37 = vpop.permute.xlu1 %1885 }
 0x360   :  { %6843 = vst [vmem:[#allocation34_spill] sm:$0xff] %v5809_v33  ;;  %v1944_v57 = vmul.f32 %v5675_v54, %v1927_v40  ;;  %v1912_v8 = vadd.f32 %v1886_v37, %v5650_v25  ;;  %2523 = vperm.xlu1 %3573, %v5368_v11   ;;  %2701 = vperm.xlu0 %3598, %v5467_v12  }
 0x362   :  { %v5817_v56 = vadd.f32 %v1944_v57, %v5633_v26  ;;  %v1929_v14 = vand.u32 2147483647, %v1912_v8  ;;  %v2008_v5 = vpop.permute.xlu0 %2007 }
 0x363   :  { %v1894_v31 = vpop.permute.xlu1 %1893 }
 0x364   :  { %v1946_v13 = vmul.f32 %v5675_v54, %v1929_v14  ;;  %v1914_v2 = vadd.f32 %v1894_v31, %v5650_v25  ;;  %2527 = vperm.xlu1 %3573, %v5432_v6   ;;  %v6845_v31 = vld [vmem:[#allocation54_spill] sm:$0xff] }
 0x365   :  { %v6847_v35 = vsub.s32 3, %v6845_v31 }
 0x366   :  { %v5823_v52 = vadd.f32 %v1946_v13, %v5654_v55  ;;  %v1931_v40 = vand.u32 2147483647, %v1914_v2  ;;  %v2012_v37 = vpop.permute.xlu0 %2011  ;;  %v6846_v13 = vsub.s32 2, %v6845_v31 }
 0x367   :  { %v5861_v38 = vrot.slane %v5567_v18, %v6847_v35  ;;  %v5872_v35 = vstv %s3360_s12 }
 0x368   :  { %6844 = vst [vmem:[#allocation18_spill] sm:$0xff] %v5823_v52  ;;  %v1948_v48 = vmul.f32 %v5675_v54, %v1931_v40  ;;  %3574 = vset.pattern.permute.xlu1 %v6805_v61  ;;  %v5827_v12 = vpop.permute.xlu1 %1971  ;;  %v5842_v2 = vrot.slane %v5567_v18, %v6846_v13 }
 0x369   :  { %2015 = vperm.xlu1 %3574, %v5453_v4  }
 0x36a   :  { %v5831_v26 = vadd.f32 %v1948_v48, %v5672_v39  ;;  %v2024_v57 = vpop.permute.xlu0 %2023  ;;  %v2039_v48 = vadd.f32 %v1992_v3, %v5842_v2  ;;  %v2040_v13 = vadd.f32 %v1996_v0, %v5842_v2  ;;  %v5863_v3 = vstv %s3359_s11 }
 0x36b   :  { %v2043_v17 = vadd.f32 %v2008_v5, %v5842_v2  ;;  %v2044_v23 = vadd.f32 %v2012_v37, %v5842_v2 }
 0x36c   :  { %v5833_v8 = vpop.permute.xlu1 %1979  ;;  %v2056_v42 = vand.u32 2147483647, %v2039_v48  ;;  %v2057_v19 = vand.u32 2147483647, %v2040_v13 }
 0x36d   :  { %3575 = vset.pattern.permute.xlu1 %v6812_v41  ;;  %v2060_v33 = vand.u32 2147483647, %v2043_v17 }
 0x36e   :  { %v2028_v55 = vpop.permute.xlu0 %2027  ;;  %2535 = vperm.xlu1 %3575, %v5439_v24   ;;  %v2073_v52 = vmul.f32 %v5863_v3, %v2056_v42  ;;  %v2074_v5 = vmul.f32 %v5863_v3, %v2057_v19  ;;  %v2047_v19 = vadd.f32 %v2024_v57, %v5842_v2 }
 0x36f   :  { %v2077_v37 = vmul.f32 %v5863_v3, %v2060_v33  ;;  %v2048_v57 = vadd.f32 %v2028_v55, %v5842_v2 }
 0x370   :  { %v5837_v14 = vpop.permute.xlu1 %1983  ;;  %v2089_v15 = vadd.f32 %v2073_v52, %v5720_v51  ;;  %v2090_v51 = vadd.f32 %v2074_v5, %v5801_v32  ;;  %v2064_v5 = vand.u32 2147483647, %v2047_v19 }
 0x372   :  { %3576 = vset.pattern.permute.xlu1 %v6818_v9 }
 0x373   :  { %v5845_v39 = vpop.permute.xlu0 %2105  ;;  %2137 = vperm.xlu1 %3576, %v5386_v44  }
 0x375   :  { %v5849_v40 = vpop.permute.xlu1 %2109 }
 0x377   :  { %v5851_v45 = vpop.permute.xlu0 %2117  ;;  %3577 = vset.pattern.permute.xlu1 %v6821_v43 }
 0x378   :  { %2657 = vperm.xlu1 %3577, %v5368_v11  }
 0x379   :  { %v5856_v47 = vpop.permute.xlu1 %2113 }
 0x37b   :  { %v2126_v59 = vpop.permute.xlu0 %2125 }
 0x37c   :  { %v2173_v48 = vadd.f32 %v2126_v59, %v5861_v38  ;;  %2661 = vperm.xlu1 %3577, %v5432_v6  }
 0x37e   :  { %v2190_v11 = vand.u32 2147483647, %v2173_v48  ;;  %v5869_v0 = vpop.permute.xlu1 %2239  ;;  %v2061_v48 = vand.u32 2147483647, %v2044_v23  ;;  %v2093_v23 = vadd.f32 %v2077_v37, %v5751_v62  ;;  %v2081_v37 = vmul.f32 %v5863_v3, %v2064_v5 }
 0x37f   :  { %v2130_v28 = vpop.permute.xlu0 %2129 }
 0x380   :  { %v2207_v42 = vmul.f32 %v5872_v35, %v2190_v11  ;;  %v2174_v13 = vadd.f32 %v2130_v28, %v5861_v38  ;;  %3578 = vset.pattern.permute.xlu1 %v6818_v9  ;;  %v2078_v33 = vmul.f32 %v5863_v3, %v2061_v48  ;;  %v2065_v48 = vand.u32 2147483647, %v2048_v57 }
 0x381   :  { %2149 = vperm.xlu1 %3578, %v5453_v4  }
 0x382   :  { %v5880_v6 = vadd.f32 %v2207_v42, %v2089_v15  ;;  %v2191_v17 = vand.u32 2147483647, %v2174_v13  ;;  %v5882_v59 = vpop.permute.xlu1 %2247 }
 0x383   :  { %v2142_v7 = vpop.permute.xlu0 %2141 }
 0x384   :  { %v2208_v52 = vmul.f32 %v5872_v35, %v2191_v17  ;;  %v2177_v28 = vadd.f32 %v2142_v7, %v5861_v38 }
 0x385   :  { %3580 = vset.pattern.permute.xlu1 %v6821_v43 }
 0x386   :  { %v5890_v11 = vadd.f32 %v2208_v52, %v2090_v51  ;;  %v2194_v15 = vand.u32 2147483647, %v2177_v28  ;;  %2669 = vperm.xlu1 %3580, %v5439_v24   ;;  %v5893_v42 = vpop.permute.xlu1 %2251  ;;  %v2094_v24 = vadd.f32 %v2078_v33, %v5817_v56  ;;  %v2097_v56 = vadd.f32 %v2081_v37, %v5770_v20 }
 0x387   :  { %v2146_v32 = vpop.permute.xlu0 %2145  ;;  %v2082_v33 = vmul.f32 %v5863_v3, %v2065_v48  ;;  %v6849_v37 = vsub.s32 4, %v6845_v31 }
 0x388   :  { %v2211_v13 = vmul.f32 %v5872_v35, %v2194_v15  ;;  %v2178_v7 = vadd.f32 %v2146_v32, %v5861_v38 }
 0x389   :  { %v5933_v48 = vrot.slane %v5567_v18, %v6849_v37 }
 0x38a   :  { %v5900_v17 = vadd.f32 %v2211_v13, %v2093_v23  ;;  %v2195_v51 = vand.u32 2147483647, %v2178_v7  ;;  %3581 = vset.pattern.permute.xlu1 %v6836_v36 }
 0x38b   :  { %v2158_v52 = vpop.permute.xlu0 %2157  ;;  %2271 = vperm.xlu1 %3581, %v5386_v44   ;;  %v5905_v62 = vpop.permute.xlu1 %2377 }
 0x38c   :  { %v2212_v55 = vmul.f32 %v5872_v35, %v2195_v51  ;;  %v2181_v19 = vadd.f32 %v2158_v52, %v5861_v38  ;;  %v2098_v51 = vadd.f32 %v2082_v33, %v5831_v26  ;;  %v5944_v33 = vstv %s3361_s13 }
 0x38e   :  { %v5910_v28 = vadd.f32 %v2212_v55, %v2094_v24  ;;  %v2198_v15 = vand.u32 2147483647, %v2181_v19 }
 0x38f   :  { %v2162_v23 = vpop.permute.xlu0 %2161  ;;  %2279 = vperm.xlu1 %3581, %v5395_v60   ;;  %v5913_v32 = vpop.permute.xlu1 %2381 }
 0x390   :  { %v2215_v13 = vmul.f32 %v5872_v35, %v2198_v15  ;;  %v2182_v5 = vadd.f32 %v2162_v23, %v5861_v38  ;;  %v2034_v15 = vadd.f32 %v5827_v12, %v5842_v2  ;;  %v2302_v12 = vadd.f32 %v5869_v0, %v5933_v48 }
 0x392   :  { %v5919_v57 = vadd.f32 %v2215_v13, %v2097_v56  ;;  %v2199_v7 = vand.u32 2147483647, %v2182_v5  ;;  %v2168_v56 = vadd.f32 %v5845_v39, %v5861_v38  ;;  %v2037_v5 = vadd.f32 %v5837_v14, %v5842_v2 }
 0x393   :  { %2283 = vperm.xlu1 %3581, %v5453_v4   ;;  %v1767_v39 = vadd.f32 %v5569_v58, %v5581_v1  ;;  %v2171_v14 = vadd.f32 %v5851_v45, %v5861_v38 }
 0x394   :  { %v2216_v24 = vmul.f32 %v5872_v35, %v2199_v7  ;;  %v5924_v52 = vpop.permute.xlu0 %2243  ;;  %v5926_v55 = vpop.permute.xlu1 %1987 }
 0x396   :  { %v5928_v20 = vadd.f32 %v2216_v24, %v2098_v51  ;;  %v2051_v24 = vand.u32 2147483647, %v2034_v15  ;;  %v1901_v15 = vadd.f32 %v5765_v27, %v5650_v25  ;;  %v1784_v27 = vand.u32 2147483647, %v1767_v39 }
 0x397   :  { %3582 = vset.pattern.permute.xlu1 %v6809_v34  ;;  %v2169_v39 = vadd.f32 %v5849_v40, %v5861_v38 }
 0x398   :  { %6848 = vst [vmem:[#allocation36_spill] sm:$0xff] %v5928_v20  ;;  %v2260_v19 = vpop.permute.xlu0 %2259  ;;  %2409 = vperm.xlu1 %3582, %v5446_v10   ;;  %v2068_v45 = vmul.f32 %v5863_v3, %v2051_v24 }
 0x399   :  { %v2307_v4 = vadd.f32 %v2260_v19, %v5933_v48  ;;  %v5938_v26 = vpop.permute.xlu1 %2507  ;;  %v2185_v19 = vand.u32 2147483647, %v2168_v56  ;;  %v2319_v56 = vand.u32 2147483647, %v2302_v12  ;;  %v1918_v12 = vand.u32 2147483647, %v1901_v15 }
 0x39a   :  { %v6852_v15 = vld [vmem:[#allocation61_spill] sm:$0xff] }
 0x39b   :  { %v2324_v23 = vand.u32 2147483647, %v2307_v4 }
 0x39c   :  { %v2276_v13 = vpop.permute.xlu0 %2275  ;;  %2413 = vperm.xlu1 %3582, %v5395_v60  }
 0x39d   :  { %v2341_v10 = vmul.f32 %v5944_v33, %v2324_v23  ;;  %v2311_v7 = vadd.f32 %v2276_v13, %v5933_v48  ;;  %v5951_v51 = vpop.permute.xlu1 %2511  ;;  %v2054_v23 = vand.u32 2147483647, %v2037_v5  ;;  %v2305_v13 = vadd.f32 %v5893_v42, %v5933_v48 }
 0x39e   :  { %v2035_v5 = vadd.f32 %v5793_v50, %v5842_v2 }
 0x39f   :  { %v5958_v37 = vadd.f32 %v2341_v10, %v5880_v6  ;;  %v2328_v60 = vand.u32 2147483647, %v2311_v7  ;;  %v1667_v6 = vadd.f32 %v5531_v63, %v5577_v46  ;;  %v6851_v63 = vsub.s32 5, %v6845_v31 }
 0x3a0   :  { %v2292_v4 = vpop.permute.xlu0 %2291  ;;  %3583 = vset.pattern.permute.xlu1 %v6805_v61  ;;  %v2071_v42 = vmul.f32 %v5863_v3, %v2054_v23  ;;  %v2052_v40 = vand.u32 2147483647, %v2035_v5 }
 0x3a1   :  { %v2345_v0 = vmul.f32 %v5944_v33, %v2328_v60  ;;  %v2315_v58 = vadd.f32 %v2292_v4, %v5933_v48  ;;  %2019 = vperm.xlu1 %3583, %v5407_v22   ;;  %v2202_v22 = vmul.f32 %v5872_v35, %v2185_v19  ;;  %v2188_v4 = vand.u32 2147483647, %v2171_v14 }
 0x3a2   :  { %v5975_v10 = vpop.permute.xlu1 %1999  ;;  %v5986_v24 = vrot.slane %v5567_v18, %v6851_v63  ;;  %v2336_v19 = vmul.f32 %v5944_v33, %v2319_v56  ;;  %v2322_v14 = vand.u32 2147483647, %v2305_v13  ;;  %v1683_v23 = vadd.f32 %v1667_v6, %v6852_v15 }
 0x3a3   :  { %v5980_v7 = vadd.f32 %v2345_v0, %v5900_v17  ;;  %v2332_v60 = vand.u32 2147483647, %v2315_v58  ;;  %v2084_v17 = vadd.f32 %v2068_v45, %v5690_v21  ;;  %v1801_v58 = vmul.f32 %v5589_v53, %v1784_v27 }
 0x3a4   :  { %v2205_v21 = vmul.f32 %v5872_v35, %v2188_v4  ;;  %v2303_v45 = vadd.f32 %v5924_v52, %v5933_v48  ;;  %v2186_v6 = vand.u32 2147483647, %v2169_v39  ;;  %v6010_v13 = vstv %s5965_s3  ;;  %v6018_v52 = vld [vmem:[%s6494_s1 + $0x48] sm:$0xff] }
 0x3a5   :  { %6850 = vst [vmem:[#allocation20_spill] sm:$0xff] %v5980_v7  ;;  %v2349_v50 = vmul.f32 %v5944_v33, %v2332_v60  ;;  %v2374_v20 = vpop.permute.xlu0 %2373  ;;  %3584 = vset.pattern.permute.xlu1 %v6812_v41  ;;  %v2218_v7 = vadd.f32 %v2202_v22, %v2084_v17  ;;  %v1817_v4 = vadd.f32 %v1801_v58, %v1683_v23 }
 0x3a6   :  { %v2436_v0 = vadd.f32 %v2374_v20, %v5986_v24  ;;  %2539 = vperm.xlu1 %3584, %v5386_v44   ;;  %v1935_v20 = vmul.f32 %v5675_v54, %v1918_v12  ;;  %v2087_v44 = vadd.f32 %v2071_v42, %v5708_v29  ;;  %v2069_v29 = vmul.f32 %v5863_v3, %v2052_v40 }
 0x3a7   :  { %v6000_v60 = vadd.f32 %v2349_v50, %v5919_v57  ;;  %v6002_v63 = vpop.permute.xlu1 %2519  ;;  %v2352_v5 = vadd.f32 %v2336_v19, %v2218_v7  ;;  %v2339_v57 = vmul.f32 %v5944_v33, %v2322_v14  ;;  %v6853_v12 = vsub.s32 6, %v6845_v31 }
 0x3a8   :  { %v2453_v56 = vand.u32 2147483647, %v2436_v0  ;;  %v2221_v42 = vadd.f32 %v2205_v21, %v2087_v44  ;;  %v2320_v39 = vand.u32 2147483647, %v2303_v45  ;;  %v1951_v0 = vadd.f32 %v1935_v20, %v1817_v4  ;;  %v6041_v45 = vld [vmem:[%s6494_s1 + $0x78] sm:$0xff] }
 0x3a9   :  { %v2386_v27 = vpop.permute.xlu0 %2385  ;;  %v6025_v7 = vrot.slane %v5567_v18, %v6853_v12  ;;  %v2203_v15 = vmul.f32 %v5872_v35, %v2186_v6  ;;  %v2437_v58 = vadd.f32 %v5905_v62, %v5986_v24  ;;  %v6065_v12 = vstv %s3363_s16 }
 0x3aa   :  { %v2470_v50 = vmul.f32 %v6010_v13, %v2453_v56  ;;  %v2439_v22 = vadd.f32 %v2386_v27, %v5986_v24  ;;  %2543 = vperm.xlu1 %3584, %v6018_v52   ;;  %v2355_v23 = vadd.f32 %v2339_v57, %v2221_v42  ;;  %v2085_v20 = vadd.f32 %v2069_v29, %v1951_v0  ;;  %v6062_v29 = vld [vmem:[%s6494_s1 + $0x58] sm:$0xff] }
 0x3ab   :  { %v2571_v40 = vadd.f32 %v5951_v51, %v6025_v7  ;;  %v2337_v44 = vmul.f32 %v5944_v33, %v2320_v39  ;;  %v1768_v57 = vadd.f32 %v5636_v16, %v5581_v1  ;;  %v1902_v16 = vadd.f32 %v5772_v49, %v5650_v25  ;;  %v6084_v25 = vld [vmem:[%s6494_s1 + $0x60] sm:$0xff] }
 0x3ac   :  { %v6027_v17 = vadd.f32 %v2470_v50, %v2352_v5  ;;  %v2456_v19 = vand.u32 2147483647, %v2439_v22  ;;  %v2122_v14 = vpop.permute.xlu1 %2121  ;;  %v2219_v27 = vadd.f32 %v2203_v15, %v2085_v20  ;;  %v2454_v5 = vand.u32 2147483647, %v2437_v58 }
 0x3ad   :  { %v6030_v56 = vpop.permute.xlu0 %2389  ;;  %v6854_v50 = vsub.s32 7, %v6845_v31  ;;  %v2036_v0 = vadd.f32 %v5833_v8, %v5842_v2  ;;  %v1668_v58 = vadd.f32 %v5537_v30, %v5577_v46  ;;  %v2170_v8 = vadd.f32 %v5856_v47, %v5861_v38 }
 0x3ae   :  { %v2473_v21 = vmul.f32 %v6010_v13, %v2456_v19  ;;  %3586 = vset.pattern.permute.xlu1 %v6805_v61  ;;  %v2588_v61 = vand.u32 2147483647, %v2571_v40  ;;  %v2353_v4 = vadd.f32 %v2337_v44, %v2219_v27  ;;  %v2471_v1 = vmul.f32 %v6010_v13, %v2454_v5 }
 0x3af   :  { %2031 = vperm.xlu1 %3586, %v6041_v45   ;;  %v6057_v22 = vrot.slane %v5567_v18, %v6854_v50  ;;  %v1785_v19 = vand.u32 2147483647, %v1768_v57  ;;  %v6079_v40 = vstv %s3364_s19  ;;  %v2038_v30 = vadd.f32 %v5926_v55, %v5842_v2 }
 0x3b0   :  { %v6045_v6 = vadd.f32 %v2473_v21, %v2355_v23  ;;  %v2605_v18 = vmul.f32 %v6065_v12, %v2588_v61  ;;  %v2487_v15 = vadd.f32 %v2471_v1, %v2353_v4  ;;  %v1919_v21 = vand.u32 2147483647, %v1902_v16  ;;  %v6855_v4 = vld [vmem:[#allocation58_spill] sm:$0xff] }
 0x3b1   :  { %v6047_v62 = vpop.permute.xlu1 %2641  ;;  %v6049_v51 = vpop.permute.xlu0 %2401  ;;  %v1802_v46 = vmul.f32 %v5589_v53, %v1785_v19  ;;  %v2053_v5 = vand.u32 2147483647, %v2036_v0  ;;  %v2304_v61 = vadd.f32 %v5882_v59, %v5933_v48  ;;  %v2172_v50 = vadd.f32 %v2122_v14, %v5861_v38  ;;  %v3798_v59 = vld [vmem:[%s6494_s1 + $0x40] sm:$0xff] }
 0x3b2   :  { %v2621_v27 = vadd.f32 %v2605_v18, %v2487_v15  ;;  %v1936_v16 = vmul.f32 %v5675_v54, %v1919_v21  ;;  %v2187_v1 = vand.u32 2147483647, %v2170_v8  ;;  %v2438_v53 = vadd.f32 %v5913_v32, %v5986_v24  ;;  %v6856_v54 = vld [vmem:[#allocation35_spill] sm:$0xff] }
 0x3b3   :  { %3587 = vset.pattern.permute.xlu1 %v6812_v41  ;;  %v2055_v55 = vand.u32 2147483647, %v2038_v30  ;;  %v2321_v19 = vand.u32 2147483647, %v2304_v61  ;;  %v2706_v0 = vadd.f32 %v6856_v54, %v6057_v22  ;;  %v2189_v15 = vand.u32 2147483647, %v2172_v50 }
 0x3b4   :  { %2551 = vperm.xlu1 %3587, %v6062_v29   ;;  %v2455_v21 = vand.u32 2147483647, %v2438_v53  ;;  %v2440_v8 = vadd.f32 %v6030_v56, %v5986_v24  ;;  %v6857_v53 = vld [vmem:[#allocation38_spill] sm:$0xff] }
 0x3b5   :  { %v2646_v42 = vpop.permute.xlu1 %2645  ;;  %v6067_v39 = vpop.permute.xlu0 %2405  ;;  %v2206_v61 = vmul.f32 %v5872_v35, %v2189_v15 }
 0x3b6   :  { %v2705_v31 = vadd.f32 %v2646_v42, %v6057_v22  ;;  %v1684_v42 = vadd.f32 %v1668_v58, %v6855_v4  ;;  %v2204_v58 = vmul.f32 %v5872_v35, %v2187_v1  ;;  %v2472_v56 = vmul.f32 %v6010_v13, %v2455_v21 }
 0x3b8   :  { %v2722_v23 = vand.u32 2147483647, %v2705_v31  ;;  %3588 = vset.pattern.permute.xlu1 %v6818_v9  ;;  %v1818_v18 = vadd.f32 %v1802_v46, %v1684_v42  ;;  %v2070_v31 = vmul.f32 %v5863_v3, %v2053_v5  ;;  %v2338_v46 = vmul.f32 %v5944_v33, %v2321_v19 }
 0x3b9   :  { %2153 = vperm.xlu1 %3588, %v6084_v25   ;;  %v6087_v49 = vpop.permute.xlu0 %2417  ;;  %v2723_v42 = vand.u32 2147483647, %v2706_v0 }
 0x3ba   :  { %v2739_v20 = vmul.f32 %v6079_v40, %v2722_v23  ;;  %v2134_v44 = vpop.permute.xlu1 %2133  ;;  %v1952_v32 = vadd.f32 %v1936_v16, %v1818_v18 }
 0x3bb   :  { %v2175_v50 = vadd.f32 %v2134_v44, %v5861_v38  ;;  %v2443_v44 = vadd.f32 %v6049_v51, %v5986_v24 }
 0x3bc   :  { %v6097_v57 = vadd.f32 %v2739_v20, %v2621_v27  ;;  %v2072_v20 = vmul.f32 %v5863_v3, %v2055_v55  ;;  %v2041_v27 = vadd.f32 %v5975_v10, %v5842_v2  ;;  %v2086_v30 = vadd.f32 %v2070_v31, %v1952_v32 }
 0x3bd   :  { %3589 = vset.pattern.permute.xlu1 %v6821_v43  ;;  %v6101_v47 = vpop.permute.xlu0 %2421  ;;  %v2192_v0 = vand.u32 2147483647, %v2175_v50 }
 0x3be   :  { %2673 = vperm.xlu1 %3589, %v3798_v59   ;;  %2772 = vmax.xlane.f32.xlu0 %v6097_v57  ;;  %v2220_v16 = vadd.f32 %v2204_v58, %v2086_v30  ;;  %v2088_v10 = vadd.f32 %v2072_v20, %v6857_v53  ;;  %v2058_v59 = vand.u32 2147483647, %v2041_v27  ;;  %v2460_v30 = vand.u32 2147483647, %v2443_v44 }
 0x3bf   :  { %v6111_v14 = vpop.permute.xlu1 %2653 }
 0x3c0   :  { %v2354_v31 = vadd.f32 %v2338_v46, %v2220_v16  ;;  %v2222_v54 = vadd.f32 %v2206_v61, %v2088_v10  ;;  %v2209_v46 = vmul.f32 %v5872_v35, %v2192_v0 }
 0x3c1   :  { %v6116_v23 = vpop.permute.xlu0 %2433 }
 0x3c2   :  { %2677 = vperm.xlu1 %3589, %v6018_v52   ;;  %v2457_v52 = vand.u32 2147483647, %v2440_v8  ;;  %v2488_v21 = vadd.f32 %v2472_v56, %v2354_v31  ;;  %v2075_v8 = vmul.f32 %v5863_v3, %v2058_v59  ;;  %v3799_v59 = vld [vmem:[%s6494_s1 + $0x70] sm:$0xff]  ;;  %v3800_v31 = vld [vmem:[%s6494_s1 + $0x68] sm:$0xff] }
 0x3c4   :  { %v2256_v5 = vpop.permute.xlu1 %2255  ;;  %v2474_v58 = vmul.f32 %v6010_v13, %v2457_v52  ;;  %v2477_v52 = vmul.f32 %v6010_v13, %v2460_v30 }
 0x3c5   :  { %v2306_v4 = vadd.f32 %v2256_v5, %v5933_v48 }
 0x3c6   :  { %v2516_v1 = vpop.permute.xlu0 %2515  ;;  %3591 = vset.pattern.permute.xlu1 %v6818_v9  ;;  %v2740_v9 = vmul.f32 %v6079_v40, %v2723_v42 }
 0x3c7   :  { %v2323_v55 = vand.u32 2147483647, %v2306_v4  ;;  %v2572_v18 = vadd.f32 %v2516_v1, %v6025_v7  ;;  %2165 = vperm.xlu1 %3591, %v6041_v45   ;;  %v6858_v4 = vld [vmem:[#allocation32_spill] sm:$0xff] }
 0x3c8   :  { %v2264_v19 = vpop.permute.xlu1 %2263  ;;  %v2091_v42 = vadd.f32 %v2075_v8, %v6858_v4 }
 0x3c9   :  { %v2340_v15 = vmul.f32 %v5944_v33, %v2323_v55  ;;  %v2589_v32 = vand.u32 2147483647, %v2572_v18 }
 0x3ca   :  { %v2225_v1 = vadd.f32 %v2209_v46, %v2091_v42 }
 0x3cb   :  { %v2356_v20 = vadd.f32 %v2340_v15, %v2222_v54  ;;  %v2606_v27 = vmul.f32 %v6065_v12, %v2589_v32  ;;  %3592 = vset.pattern.permute.xlu1 %v6821_v43  ;;  %v2308_v15 = vadd.f32 %v2264_v19, %v5933_v48  ;;  %v6859_v19 = vld [vmem:[#allocation14_spill] sm:$0xff] }
 0x3cc   :  { %2685 = vperm.xlu1 %3592, %v6062_v29   ;;  %v2268_v51 = vpop.permute.xlu1 %2267 }
 0x3cd   :  { %v2622_v5 = vadd.f32 %v2606_v27, %v2488_v21  ;;  %v2309_v61 = vadd.f32 %v2268_v51, %v5933_v48  ;;  %v2490_v50 = vadd.f32 %v2474_v58, %v2356_v20  ;;  %v2325_v58 = vand.u32 2147483647, %v2308_v15 }
 0x3ce   :  { %v2710_v51 = vadd.f32 %v6859_v19, %v6057_v22 }
 0x3cf   :  { %v2326_v16 = vand.u32 2147483647, %v2309_v61  ;;  %v6146_v56 = vadd.f32 %v2740_v9, %v2622_v5  ;;  %v2532_v9 = vpop.permute.xlu0 %2531 }
 0x3d0   :  { %3593 = vset.pattern.permute.xlu1 %v6836_v36  ;;  %v2576_v20 = vadd.f32 %v2532_v9, %v6025_v7  ;;  %v2727_v42 = vand.u32 2147483647, %v2710_v51  ;;  %v2570_v51 = vadd.f32 %v5938_v26, %v6025_v7  ;;  %v2573_v26 = vadd.f32 %v6002_v63, %v6025_v7 }
 0x3d1   :  { %v2343_v29 = vmul.f32 %v5944_v33, %v2326_v16  ;;  %2287 = vperm.xlu1 %3593, %v6084_v25   ;;  %2774 = vmax.xlane.f32.xlu0 %v6146_v56  ;;  %v6153_v53 = vpop.permute.xlu1 %2393 }
 0x3d2   :  { %v2593_v46 = vand.u32 2147483647, %v2576_v20 }
 0x3d3   :  { %v2359_v10 = vadd.f32 %v2343_v29, %v2225_v1 }
 0x3d4   :  { %v2610_v16 = vmul.f32 %v6065_v12, %v2593_v46 }
 0x3d5   :  { %2295 = vperm.xlu1 %3593, %v3799_v59   ;;  %v2398_v55 = vpop.permute.xlu1 %2397  ;;  %v6158_v18 = vadd.f32 %v2477_v52, %v2359_v10 }
 0x3d9   :  { %2299 = vperm.xlu1 %3593, %v6041_v45  }
 0x3da   :  { %v2004_v36 = vpop.permute.xlu1 %2003 }
 0x3db   :  { %v2042_v15 = vadd.f32 %v2004_v36, %v5842_v2 }
 0x3dd   :  { %3595 = vset.pattern.permute.xlu1 %v6809_v34  ;;  %v2442_v34 = vadd.f32 %v2398_v55, %v5986_v24  ;;  %v2744_v55 = vmul.f32 %v6079_v40, %v2727_v42  ;;  %v2059_v9 = vand.u32 2147483647, %v2042_v15 }
 0x3de   :  { %2425 = vperm.xlu1 %3595, %v3800_v31  }
 0x3df   :  { %v2524_v44 = vpop.permute.xlu1 %2523  ;;  %v2459_v8 = vand.u32 2147483647, %v2442_v34 }
 0x3e0   :  { %v2574_v21 = vadd.f32 %v2524_v44, %v6025_v7 }
 0x3e1   :  { %v2476_v30 = vmul.f32 %v6010_v13, %v2459_v8  ;;  %v2076_v8 = vmul.f32 %v5863_v3, %v2059_v9 }
 0x3e2   :  { %2429 = vperm.xlu1 %3595, %v3799_v59   ;;  %v2591_v27 = vand.u32 2147483647, %v2574_v21 }
 0x3e3   :  { %v6165_v54 = vpop.permute.xlu1 %2527 }
 0x3e4   :  { %v2608_v61 = vmul.f32 %v6065_v12, %v2591_v27 }
 0x3e6   :  { %3597 = vset.pattern.permute.xlu1 %v6812_v41  ;;  %v2624_v10 = vadd.f32 %v2608_v61, %v2490_v50  ;;  %v2444_v50 = vadd.f32 %v6067_v39, %v5986_v24  ;;  %v6860_v39 = vld [vmem:[#allocation34_spill] sm:$0xff] }
 0x3e7   :  { %2555 = vperm.xlu1 %3597, %v6084_v25   ;;  %v2342_v25 = vmul.f32 %v5944_v33, %v2325_v58  ;;  %v2092_v46 = vadd.f32 %v2076_v8, %v6860_v39 }
 0x3e8   :  { %v2016_v0 = vpop.permute.xlu1 %2015 }
 0x3e9   :  { %v2358_v5 = vadd.f32 %v2342_v25, %v5890_v11  ;;  %v2045_v20 = vadd.f32 %v2016_v0, %v5842_v2  ;;  %v2461_v25 = vand.u32 2147483647, %v2444_v50  ;;  %v2575_v50 = vadd.f32 %v6165_v54, %v6025_v7 }
 0x3eb   :  { %2563 = vperm.xlu1 %3597, %v3799_v59   ;;  %v2478_v0 = vmul.f32 %v6010_v13, %v2461_v25 }
 0x3ed   :  { %v6170_v32 = vpop.permute.xlu1 %2535 }
 0x3ee   :  { %v2577_v54 = vadd.f32 %v6170_v32, %v6025_v7 }
 0x3ef   :  { %2567 = vperm.xlu1 %3597, %v6041_v45  }
 0x3f2   :  { %v2138_v41 = vpop.permute.xlu1 %2137 }
 0x3f3   :  { %3599 = vset.pattern.permute.xlu1 %v6821_v43  ;;  %v2492_v43 = vadd.f32 %v2476_v30, %v2358_v5  ;;  %v2176_v34 = vadd.f32 %v2138_v41, %v5861_v38  ;;  %v2704_v30 = vadd.f32 %v6047_v62, %v6057_v22 }
 0x3f4   :  { %2693 = vperm.xlu1 %3599, %v3800_v31  }
 0x3f5   :  { %v2626_v31 = vadd.f32 %v2610_v16, %v2492_v43  ;;  %v2193_v21 = vand.u32 2147483647, %v2176_v34  ;;  %v2721_v62 = vand.u32 2147483647, %v2704_v30 }
 0x3f7   :  { %v2658_v45 = vpop.permute.xlu1 %2657  ;;  %v2210_v36 = vmul.f32 %v5872_v35, %v2193_v21  ;;  %v2590_v21 = vand.u32 2147483647, %v2573_v26  ;;  %v2738_v8 = vmul.f32 %v6079_v40, %v2721_v62  ;;  %v2594_v26 = vand.u32 2147483647, %v2577_v54 }
 0x3f8   :  { %v2708_v4 = vadd.f32 %v2658_v45, %v6057_v22  ;;  %2697 = vperm.xlu1 %3599, %v3799_v59   ;;  %v6191_v59 = vadd.f32 %v2744_v55, %v2626_v31  ;;  %v2062_v45 = vand.u32 2147483647, %v2045_v20  ;;  %v2707_v55 = vadd.f32 %v6111_v14, %v6057_v22  ;;  %v6861_v14 = vld [vmem:[#allocation13_spill] sm:$0xff] }
 0x3f9   :  { %v2226_v42 = vadd.f32 %v2210_v36, %v2092_v46  ;;  %v2441_v31 = vadd.f32 %v6153_v53, %v5986_v24  ;;  %v2592_v46 = vand.u32 2147483647, %v2575_v50  ;;  %v2548_v50 = vpop.permute.xlu0 %2547 }
 0x3fa   :  { %v2725_v52 = vand.u32 2147483647, %v2708_v4  ;;  %v2447_v4 = vadd.f32 %v6087_v49, %v5986_v24  ;;  %v2724_v53 = vand.u32 2147483647, %v2707_v55 }
 0x3fb   :  { %v2662_v1 = vpop.permute.xlu1 %2661 }
 0x3fc   :  { %v2742_v29 = vmul.f32 %v6079_v40, %v2725_v52  ;;  %v2587_v52 = vand.u32 2147483647, %v2570_v51  ;;  %v2464_v49 = vand.u32 2147483647, %v2447_v4  ;;  %v2709_v36 = vadd.f32 %v2662_v1, %v6057_v22 }
 0x3fd   :  { %v2741_v4 = vmul.f32 %v6079_v40, %v2724_v53 }
 0x3fe   :  { %v6187_v44 = vadd.f32 %v2742_v29, %v2624_v10  ;;  %v2079_v29 = vmul.f32 %v5863_v3, %v2062_v45  ;;  %v2604_v63 = vmul.f32 %v6065_v12, %v2587_v52  ;;  %v2607_v45 = vmul.f32 %v6065_v12, %v2590_v21 }
 0x400   :  { %2778 = vmax.xlane.f32.xlu0 %v6187_v44  ;;  %v2150_v11 = vpop.permute.xlu1 %2149  ;;  %v2095_v20 = vadd.f32 %v2079_v29, %v6861_v14  ;;  %v2620_v39 = vadd.f32 %v2604_v63, %v6027_v17  ;;  %v2609_v17 = vmul.f32 %v6065_v12, %v2592_v46  ;;  %v2623_v32 = vadd.f32 %v2607_v45, %v6045_v6  ;;  %v6264_v14 = vpop.permute.xlu0 %2559 }
 0x401   :  { %v2179_v19 = vadd.f32 %v2150_v11, %v5861_v38 }
 0x402   :  { %v6248_v55 = vadd.f32 %v2741_v4, %v2623_v32 }
 0x403   :  { %v2196_v43 = vand.u32 2147483647, %v2179_v19  ;;  %v2481_v19 = vmul.f32 %v6010_v13, %v2464_v49 }
 0x404   :  { %2782 = vmax.xlane.f32.xlu0 %v6191_v59 }
 0x405   :  { %v2670_v58 = vpop.permute.xlu1 %2669  ;;  %v2213_v15 = vmul.f32 %v5872_v35, %v2196_v43 }
 0x406   :  { %v2711_v43 = vadd.f32 %v2670_v58, %v6057_v22 }
 0x40a   :  { %v2272_v27 = vpop.permute.xlu1 %2271 }
 0x40b   :  { %v2310_v41 = vadd.f32 %v2272_v27, %v5933_v48  ;;  %v2458_v27 = vand.u32 2147483647, %v2441_v31  ;;  %v2611_v31 = vmul.f32 %v6065_v12, %v2594_v26 }
 0x40d   :  { %v2327_v5 = vand.u32 2147483647, %v2310_v41  ;;  %v2229_v41 = vadd.f32 %v2213_v15, %v2095_v20  ;;  %v2475_v1 = vmul.f32 %v6010_v13, %v2458_v27  ;;  %v2627_v6 = vadd.f32 %v2611_v31, %v6158_v18 }
 0x40e   :  { %v6208_v61 = vpop.permute.xlu1 %2279 }
 0x40f   :  { %v2344_v16 = vmul.f32 %v5944_v33, %v2327_v5  ;;  %v2491_v62 = vadd.f32 %v2475_v1, %v5958_v37 }
 0x411   :  { %v2360_v10 = vadd.f32 %v2344_v16, %v2226_v42  ;;  %v2726_v42 = vand.u32 2147483647, %v2709_v36  ;;  %v3801_v36 = vld [vmem:[%s6493_s0 + $0x8] sm:$0xff]  ;;  %s3857_s0 = smov 8  }
 0x412   :  { %v2284_v11 = vpop.permute.xlu1 %2283 }
 0x413   :  { %v2313_v34 = vadd.f32 %v2284_v11, %v5933_v48  ;;  %v6222_v9 = vadd.f32 %v2478_v0, %v2360_v10  ;;  %v6236_v0 = vadd.f32 %v2738_v8, %v2620_v39  ;;  %v2743_v29 = vmul.f32 %v6079_v40, %v2726_v42  ;;  %v2682_v39 = vpop.permute.xlu0 %2681 }
 0x414   :  { %v2728_v10 = vand.u32 2147483647, %v2711_v43  ;;  %v2625_v11 = vadd.f32 %v2609_v17, %v2491_v62  ;;  %v2312_v8 = vadd.f32 %v6208_v61, %v5933_v48 }
 0x415   :  { %v2330_v25 = vand.u32 2147483647, %v2313_v34 }
 0x416   :  { %v2745_v49 = vmul.f32 %v6079_v40, %v2728_v10  ;;  %v6253_v15 = vadd.f32 %v2743_v29, %v2625_v11  ;;  %v2329_v53 = vand.u32 2147483647, %v2312_v8 }
 0x417   :  { %v2347_v51 = vmul.f32 %v5944_v33, %v2330_v25  ;;  %v2410_v30 = vpop.permute.xlu1 %2409 }
 0x418   :  { %v6257_v34 = vadd.f32 %v2745_v49, %v2627_v6  ;;  %v2445_v27 = vadd.f32 %v2410_v30, %v5986_v24  ;;  %v2346_v46 = vmul.f32 %v5944_v33, %v2329_v53  ;;  %v2714_v30 = vadd.f32 %v2682_v39, %v6057_v22 }
 0x419   :  { %v2363_v5 = vadd.f32 %v2347_v51, %v2229_v41  ;;  %v2580_v41 = vadd.f32 %v2548_v50, %v6025_v7 }
 0x41a   :  { %v2362_v43 = vadd.f32 %v2346_v46, %v5910_v28  ;;  %v2731_v62 = vand.u32 2147483647, %v2714_v30 }
 0x41b   :  { %v2414_v16 = vpop.permute.xlu1 %2413  ;;  %v6241_v52 = vadd.f32 %v2481_v19, %v2363_v5  ;;  %v2890_v19 = vpack.c.bf16 %v3801_v36, %v3801_v36  ;;  %v2462_v5 = vand.u32 2147483647, %v2445_v27  ;;  %v2597_v4 = vand.u32 2147483647, %v2580_v41 }
 0x41c   :  { %2770 = vmax.xlane.f32.xlu1 %v6236_v0  ;;  %v2446_v25 = vadd.f32 %v2414_v16, %v5986_v24  ;;  %v2748_v8 = vmul.f32 %v6079_v40, %v2731_v62 }
 0x41d   :  { %3497 = vmatprep.subr.bf16.mxu1 %v2890_v19  ;;  %v2479_v32 = vmul.f32 %v6010_v13, %v2462_v5  ;;  %v2614_v29 = vmul.f32 %v6065_v12, %v2597_v4 }
 0x41e   :  { %v2463_v51 = vand.u32 2147483647, %v2446_v25  ;;  %3498 = vmatpush3.bf16.xpose.msra.mxu1 %v2890_v19 }
 0x420   :  { %2776 = vmax.xlane.f32.xlu1 %v6248_v55  ;;  %v2020_v58 = vpop.permute.xlu1 %2019  ;;  %v2480_v1 = vmul.f32 %v6010_v13, %v2463_v51 }
 0x421   :  { %v2046_v41 = vadd.f32 %v2020_v58, %v5842_v2  ;;  %v2448_v58 = vadd.f32 %v6101_v47, %v5986_v24  ;;  %v6863_v47 = vld [vmem:[#allocation18_spill] sm:$0xff] }
 0x422   :  { %v2496_v10 = vadd.f32 %v2480_v1, %v2362_v43 }
 0x424   :  { %2780 = vmax.xlane.f32.xlu1 %v6253_v15  ;;  %v2630_v27 = vadd.f32 %v2614_v29, %v2496_v10  ;;  %v2465_v10 = vand.u32 2147483647, %v2448_v58 }
 0x425   :  { %v2540_v37 = vpop.permute.xlu1 %2539 }
 0x426   :  { %v2578_v18 = vadd.f32 %v2540_v37, %v6025_v7  ;;  %v6294_v39 = vadd.f32 %v2748_v8, %v2630_v27 }
 0x428   :  { %2784 = vmax.xlane.f32.xlu1 %v6257_v34  ;;  %v2595_v54 = vand.u32 2147483647, %v2578_v18 }
 0x429   :  { %v2544_v63 = vpop.permute.xlu1 %2543 }
 0x42a   :  { %v2579_v45 = vadd.f32 %v2544_v63, %v6025_v7  ;;  %v2612_v16 = vmul.f32 %v6065_v12, %v2595_v54  ;;  %v6862_v63 = vld [vmem:[#allocation20_spill] sm:$0xff] }
 0x42b   :  { %v2495_v50 = vadd.f32 %v2479_v32, %v6862_v63 }
 0x42c   :  { %v2596_v17 = vand.u32 2147483647, %v2579_v45  ;;  %v2628_v49 = vadd.f32 %v2612_v16, %v6222_v9 }
 0x42e   :  { %v6260_v21 = vpop.permute.xlu1 %2031  ;;  %v2613_v6 = vmul.f32 %v6065_v12, %v2596_v17 }
 0x430   :  { %v2629_v36 = vadd.f32 %v2613_v6, %v2495_v50 }
 0x433   :  { %v2552_v20 = vpop.permute.xlu1 %2551 }
 0x434   :  { %v2581_v25 = vadd.f32 %v2552_v20, %v6025_v7  ;;  %v2063_v20 = vand.u32 2147483647, %v2046_v41 }
 0x436   :  { %v2598_v51 = vand.u32 2147483647, %v2581_v25 }
 0x438   :  { %v2154_v61 = vpop.permute.xlu1 %2153  ;;  %v2615_v5 = vmul.f32 %v6065_v12, %v2598_v51 }
 0x439   :  { %v2180_v54 = vadd.f32 %v2154_v61, %v5861_v38  ;;  %v2049_v61 = vadd.f32 %v6260_v21, %v5842_v2 }
 0x43a   :  { %v2631_v43 = vadd.f32 %v2615_v5, %v6241_v52  ;;  %v2690_v5 = vpop.permute.xlu0 %2689 }
 0x43b   :  { %v2197_v4 = vand.u32 2147483647, %v2180_v54 }
 0x43d   :  { %v2674_v42 = vpop.permute.xlu1 %2673 }
 0x43e   :  { %v2712_v26 = vadd.f32 %v2674_v42, %v6057_v22  ;;  %v2080_v42 = vmul.f32 %v5863_v3, %v2063_v20  ;;  %v2702_v58 = vpop.permute.xlu0 %2701 }
 0x440   :  { %v2729_v31 = vand.u32 2147483647, %v2712_v26  ;;  %v2214_v26 = vmul.f32 %v5872_v35, %v2197_v4 }
 0x441   :  { %v2678_v11 = vpop.permute.xlu1 %2677 }
 0x442   :  { %v2746_v37 = vmul.f32 %v6079_v40, %v2729_v31  ;;  %v2713_v28 = vadd.f32 %v2678_v11, %v6057_v22  ;;  %v2096_v31 = vadd.f32 %v2080_v42, %v6863_v47  ;;  %v2066_v11 = vand.u32 2147483647, %v2049_v61 }
 0x444   :  { %v2730_v53 = vand.u32 2147483647, %v2713_v28  ;;  %v6289_v18 = vadd.f32 %v2746_v37, %v2628_v49  ;;  %v2230_v52 = vadd.f32 %v2214_v26, %v2096_v31  ;;  %v2482_v37 = vmul.f32 %v6010_v13, %v2465_v10 }
 0x445   :  { %v2083_v28 = vmul.f32 %v5863_v3, %v2066_v11  ;;  %v2583_v10 = vadd.f32 %v6264_v14, %v6025_v7 }
 0x446   :  { %v2747_v19 = vmul.f32 %v6079_v40, %v2730_v53  ;;  %2786 = vmax.xlane.f32.xlu0 %v6289_v18  ;;  %v2166_v9 = vpop.permute.xlu1 %2165 }
 0x447   :  { %v2183_v32 = vadd.f32 %v2166_v9, %v5861_v38  ;;  %v2451_v38 = vadd.f32 %v6116_v23, %v5986_v24  ;;  %v2600_v14 = vand.u32 2147483647, %v2583_v10 }
 0x448   :  { %v6296_v46 = vadd.f32 %v2747_v19, %v2629_v36  ;;  %v6864_v36 = vld [vmem:[#allocation31_spill] sm:$0xff] }
 0x449   :  { %v2200_v21 = vand.u32 2147483647, %v2183_v32  ;;  %v2468_v27 = vand.u32 2147483647, %v2451_v38  ;;  %v2099_v19 = vadd.f32 %v2083_v28, %v6864_v36 }
 0x44a   :  { %2790 = vmax.xlane.f32.xlu0 %v6294_v39  ;;  %2788 = vmax.xlane.f32.xlu1 %v6296_v46 }
 0x44b   :  { %v2686_v45 = vpop.permute.xlu1 %2685  ;;  %v2217_v8 = vmul.f32 %v5872_v35, %v2200_v21  ;;  %v2485_v20 = vmul.f32 %v6010_v13, %v2468_v27  ;;  %v2773_v47 = vpop.xlane.xlu0 %2772 }
 0x44c   :  { %v2715_v30 = vadd.f32 %v2686_v45, %v6057_v22 }
 0x44d   :  { %v2233_v41 = vadd.f32 %v2217_v8, %v2099_v19 }
 0x44e   :  { %v2732_v1 = vand.u32 2147483647, %v2715_v30  ;;  %v2716_v30 = vadd.f32 %v2690_v5, %v6057_v22 }
 0x450   :  { %v2749_v16 = vmul.f32 %v6079_v40, %v2732_v1  ;;  %v2288_v17 = vpop.permute.xlu1 %2287  ;;  %v2733_v4 = vand.u32 2147483647, %v2716_v30 }
 0x451   :  { %v2314_v62 = vadd.f32 %v2288_v17, %v5933_v48 }
 0x452   :  { %v6313_v29 = vadd.f32 %v2749_v16, %v2631_v43  ;;  %v2750_v16 = vmul.f32 %v6079_v40, %v2733_v4 }
 0x453   :  { %v2331_v49 = vand.u32 2147483647, %v2314_v62 }
 0x454   :  { %2792 = vmax.xlane.f32.xlu1 %v6313_v29  ;;  %v2296_v2 = vpop.permute.xlu1 %2295 }
 0x455   :  { %v2348_v6 = vmul.f32 %v5944_v33, %v2331_v49  ;;  %v2316_v17 = vadd.f32 %v2296_v2, %v5933_v48  ;;  %v2719_v2 = vadd.f32 %v2702_v58, %v6057_v22 }
 0x457   :  { %v2364_v63 = vadd.f32 %v2348_v6, %v2230_v52  ;;  %v2333_v49 = vand.u32 2147483647, %v2316_v17 }
 0x458   :  { %v2300_v50 = vpop.permute.xlu1 %2299 }
 0x459   :  { %v2317_v25 = vadd.f32 %v2300_v50, %v5933_v48  ;;  %v2498_v53 = vadd.f32 %v2482_v37, %v2364_v63  ;;  %v2803_v37 = vsub.f32 %v6097_v57, %v2773_v47 }
 0x45b   :  { %v2334_v9 = vand.u32 2147483647, %v2317_v25  ;;  %v2820_v27 = vmul.f32 1.442695, %v2803_v37 }
 0x45d   :  { %v2351_v51 = vmul.f32 %v5944_v33, %v2334_v9  ;;  %v2426_v54 = vpop.permute.xlu1 %2425  ;;  %v6865_v9 = vld [vmem:[#allocation36_spill] sm:$0xff]  ;;  %3632 = vpow2.f32 %v2820_v27 }
 0x45e   :  { %v2449_v42 = vadd.f32 %v2426_v54, %v5986_v24  ;;  %v2775_v58 = vpop.xlane.xlu0 %2774 }
 0x45f   :  { %v2367_v23 = vadd.f32 %v2351_v51, %v2233_v41 }
 0x460   :  { %v2466_v32 = vand.u32 2147483647, %v2449_v42  ;;  %v2804_v42 = vsub.f32 %v6146_v56, %v2775_v58 }
 0x461   :  { %v2430_v45 = vpop.permute.xlu1 %2429  ;;  %v2501_v3 = vadd.f32 %v2485_v20, %v2367_v23 }
 0x462   :  { %v2450_v31 = vadd.f32 %v2430_v45, %v5986_v24  ;;  %v2483_v6 = vmul.f32 %v6010_v13, %v2466_v32  ;;  %v2350_v24 = vmul.f32 %v5944_v33, %v2333_v49 }
 0x464   :  { %v2467_v38 = vand.u32 2147483647, %v2450_v31  ;;  %v2499_v50 = vadd.f32 %v2483_v6, %v6000_v60  ;;  %v2366_v41 = vadd.f32 %v2350_v24, %v6865_v9 }
 0x466   :  { %v2556_v35 = vpop.permute.xlu1 %2555  ;;  %v2484_v36 = vmul.f32 %v6010_v13, %v2467_v38 }
 0x467   :  { %v2582_v1 = vadd.f32 %v2556_v35, %v6025_v7 }
 0x468   :  { %v2500_v45 = vadd.f32 %v2484_v36, %v2366_v41 }
 0x469   :  { %v2599_v61 = vand.u32 2147483647, %v2582_v1 }
 0x46a   :  { %v2564_v43 = vpop.permute.xlu1 %2563 }
 0x46b   :  { %v2616_v26 = vmul.f32 %v6065_v12, %v2599_v61  ;;  %v2584_v48 = vadd.f32 %v2564_v43, %v6025_v7 }
 0x46d   :  { %v2632_v62 = vadd.f32 %v2616_v26, %v2498_v53  ;;  %v2601_v8 = vand.u32 2147483647, %v2584_v48  ;;  %v2736_v53 = vand.u32 2147483647, %v2719_v2 }
 0x46e   :  { %v2568_v11 = vpop.permute.xlu1 %2567 }
 0x46f   :  { %v2585_v52 = vadd.f32 %v2568_v11, %v6025_v7  ;;  %v6337_v21 = vadd.f32 %v2750_v16, %v2632_v62  ;;  %v2617_v7 = vmul.f32 %v6065_v12, %v2600_v14  ;;  %v2618_v33 = vmul.f32 %v6065_v12, %v2601_v8 }
 0x470   :  { %v2753_v23 = vmul.f32 %v6079_v40, %v2736_v53  ;;  %v2822_v16 = vmul.f32 1.442695, %v2804_v42 }
 0x471   :  { %2794 = vmax.xlane.f32.xlu0 %v6337_v21  ;;  %v2602_v28 = vand.u32 2147483647, %v2585_v52  ;;  %v2633_v20 = vadd.f32 %v2617_v7, %v2499_v50  ;;  %v2634_v35 = vadd.f32 %v2618_v33, %v2500_v45 }
 0x473   :  { %v2694_v63 = vpop.permute.xlu1 %2693  ;;  %v2619_v57 = vmul.f32 %v6065_v12, %v2602_v28 }
 0x474   :  { %v2717_v25 = vadd.f32 %v2694_v63, %v6057_v22 }
 0x475   :  { %v2635_v5 = vadd.f32 %v2619_v57, %v2501_v3 }
 0x476   :  { %v2734_v19 = vand.u32 2147483647, %v2717_v25 }
 0x477   :  { %v2698_v51 = vpop.permute.xlu1 %2697  ;;  %v6359_v1 = vadd.f32 %v2753_v23, %v2635_v5 }
 0x478   :  { %v2751_v54 = vmul.f32 %v6079_v40, %v2734_v19  ;;  %v2718_v60 = vadd.f32 %v2698_v51, %v6057_v22  ;;  %v3633_v22 = vpop.eup %3632 }
 0x47a   :  { %v2735_v30 = vand.u32 2147483647, %v2718_v60  ;;  %v6355_v13 = vadd.f32 %v2751_v54, %v2633_v20 }
 0x47c   :  { %v2752_v4 = vmul.f32 %v6079_v40, %v2735_v30  ;;  %2796 = vmax.xlane.f32.xlu1 %v6355_v13 }
 0x47e   :  { %v6361_v12 = vadd.f32 %v2752_v4, %v2634_v35 }
 0x480   :  { %2800 = vmax.xlane.f32.xlu1 %v6359_v1  ;;  %2798 = vmax.xlane.f32.xlu0 %v6361_v12 }
 0x484   :  { %2852 = vadd.xlane.f32.xlu1 %v3633_v22 }
 0x48d   :  { %v2779_v3 = vpop.xlane.xlu0 %2778 }
 0x48e   :  { %v2806_v17 = vsub.f32 %v6187_v44, %v2779_v3 }
 0x490   :  { %v2826_v47 = vmul.f32 1.442695, %v2806_v17 }
 0x491   :  { %v2783_v32 = vpop.xlane.xlu0 %2782 }
 0x492   :  { %v2808_v31 = vsub.f32 %v6191_v59, %v2783_v32 }
 0x4a9   :  { %v2771_v61 = vpop.xlane.xlu1 %2770 }
 0x4aa   :  { %v2802_v43 = vsub.f32 %v6236_v0, %v2771_v61  ;;  %v2830_v0 = vmul.f32 1.442695, %v2808_v31 }
 0x4ac   :  { %v2818_v40 = vmul.f32 1.442695, %v2802_v43 }
 0x4ad   :  { %v2777_v26 = vpop.xlane.xlu1 %2776 }
 0x4ae   :  { %3634 = vpow2.f32 %v2818_v40  ;;  %v2805_v62 = vsub.f32 %v6248_v55, %v2777_v26 }
 0x4af   :  { %3636 = vpow2.f32 %v2822_v16 }
 0x4b0   :  { %v2824_v10 = vmul.f32 1.442695, %v2805_v62 }
 0x4b1   :  { %v2781_v11 = vpop.xlane.xlu1 %2780 }
 0x4b2   :  { %3638 = vpow2.f32 %v2824_v10  ;;  %v2807_v56 = vsub.f32 %v6253_v15, %v2781_v11 }
 0x4b3   :  { %3640 = vpow2.f32 %v2826_v47 }
 0x4b4   :  { %v2828_v49 = vmul.f32 1.442695, %v2807_v56 }
 0x4b5   :  { %v2785_v52 = vpop.xlane.xlu1 %2784 }
 0x4b6   :  { %3642 = vpow2.f32 %v2828_v49  ;;  %v2809_v44 = vsub.f32 %v6257_v34, %v2785_v52 }
 0x4b7   :  { %3644 = vpow2.f32 %v2830_v0 }
 0x4b8   :  { %v3635_v6 = vpop.eup %3634  ;;  %v2832_v48 = vmul.f32 1.442695, %v2809_v44 }
 0x4b9   :  { %2850 = vadd.xlane.f32.xlu0 %v3635_v6  ;;  %v2882_v55 = vpack.c.bf16 %v3633_v22, %v3635_v6  ;;  %v3637_v2 = vpop.eup %3636 }
 0x4ba   :  { %3646 = vpow2.f32 %v2832_v48 }
 0x4bb   :  { %3499 = vmatprep.mubr.bf16.mxu1 %v2882_v55 }
 0x4bc   :  { %v3639_v59 = vpop.eup %3638 }
 0x4bd   :  { %2854 = vadd.xlane.f32.xlu0 %v3637_v2  ;;  %2856 = vadd.xlane.f32.xlu1 %v3639_v59  ;;  %v2883_v37 = vpack.c.bf16 %v3639_v59, %v3637_v2  ;;  %v3641_v15 = vpop.eup %3640 }
 0x4bf   :  { %3500 = vmatmul.mubr.bf16.vlgmr.msra.gmra.mrb[0].mxu1 %v2883_v37 }
 0x4c0   :  { %v3643_v14 = vpop.eup %3642 }
 0x4c1   :  { %2858 = vadd.xlane.f32.xlu0 %v3641_v15  ;;  %2860 = vadd.xlane.f32.xlu1 %v3643_v14  ;;  %v2884_v38 = vpack.c.bf16 %v3643_v14, %v3641_v15  ;;  %v3645_v28 = vpop.eup %3644 }
 0x4c3   :  { %3503 = vmatprep.mubr.bf16.mxu1 %v2884_v38 }
 0x4c4   :  { %v3647_v34 = vpop.eup %3646 }
 0x4c5   :  { %2862 = vadd.xlane.f32.xlu0 %v3645_v28  ;;  %2864 = vadd.xlane.f32.xlu1 %v3647_v34  ;;  %v2885_v24 = vpack.c.bf16 %v3647_v34, %v3645_v28 }
 0x4c7   :  { %3504 = vmatmul.mubr.bf16.gmra.mrb[4].mxu1 %v2885_v24 }
 0x4d3   :  { %v2787_v63 = vpop.xlane.xlu0 %2786 }
 0x4d4   :  { %v2810_v50 = vsub.f32 %v6289_v18, %v2787_v63 }
 0x4d6   :  { %v2834_v8 = vmul.f32 1.442695, %v2810_v50 }
 0x4d7   :  { %v2791_v25 = vpop.xlane.xlu0 %2790  ;;  %v2789_v53 = vpop.xlane.xlu1 %2788 }
 0x4d8   :  { %3648 = vpow2.f32 %v2834_v8  ;;  %v2812_v27 = vsub.f32 %v6294_v39, %v2791_v25  ;;  %v2811_v7 = vsub.f32 %v6296_v46, %v2789_v53 }
 0x4da   :  { %v2838_v36 = vmul.f32 1.442695, %v2812_v27  ;;  %v2836_v57 = vmul.f32 1.442695, %v2811_v7 }
 0x4dc   :  { %3650 = vpow2.f32 %v2838_v36 }
 0x4dd   :  { %3652 = vpow2.f32 %v2836_v57 }
 0x4e1   :  { %v2793_v19 = vpop.xlane.xlu1 %2792 }
 0x4e2   :  { %v3649_v9 = vpop.eup %3648  ;;  %v2813_v41 = vsub.f32 %v6313_v29, %v2793_v19 }
 0x4e3   :  { %2866 = vadd.xlane.f32.xlu0 %v3649_v9 }
 0x4e4   :  { %v2840_v51 = vmul.f32 1.442695, %v2813_v41 }
 0x4e6   :  { %v3651_v33 = vpop.eup %3650  ;;  %3654 = vpow2.f32 %v2840_v51 }
 0x4e7   :  { %v3653_v18 = vpop.eup %3652  ;;  %2870 = vadd.xlane.f32.xlu0 %v3651_v33 }
 0x4e8   :  { %2868 = vadd.xlane.f32.xlu1 %v3653_v18  ;;  %v2886_v54 = vpack.c.bf16 %v3653_v18, %v3649_v9 }
 0x4ea   :  { %3507 = vmatprep.mubr.bf16.mxu1 %v2886_v54 }
 0x4f0   :  { %v3655_v39 = vpop.eup %3654 }
 0x4f1   :  { %2872 = vadd.xlane.f32.xlu1 %v3655_v39  ;;  %v2887_v46 = vpack.c.bf16 %v3655_v39, %v3651_v33 }
 0x4f3   :  { %3508 = vmatmul.mubr.bf16.gmra.mrb[8].mxu1 %v2887_v46 }
 0x4fe   :  { %v2795_v60 = vpop.xlane.xlu0 %2794 }
 0x4ff   :  { %v2814_v20 = vsub.f32 %v6337_v21, %v2795_v60 }
 0x501   :  { %v2842_v23 = vmul.f32 1.442695, %v2814_v20 }
 0x503   :  { %3656 = vpow2.f32 %v2842_v23 }
 0x509   :  { %v2797_v45 = vpop.xlane.xlu1 %2796 }
 0x50a   :  { %v2815_v29 = vsub.f32 %v6355_v13, %v2797_v45 }
 0x50c   :  { %v2844_v5 = vmul.f32 1.442695, %v2815_v29 }
 0x50d   :  { %v3657_v30 = vpop.eup %3656  ;;  %v2799_v35 = vpop.xlane.xlu0 %2798 }
 0x50e   :  { %v2801_v4 = vpop.xlane.xlu1 %2800  ;;  %3658 = vpow2.f32 %v2844_v5  ;;  %v2816_v22 = vsub.f32 %v6361_v12, %v2799_v35  ;;  %2874 = vadd.xlane.f32.xlu0 %v3657_v30 }
 0x50f   :  { %v2817_v58 = vsub.f32 %v6359_v1, %v2801_v4 }
 0x510   :  { %v2846_v3 = vmul.f32 1.442695, %v2816_v22 }
 0x511   :  { %v2848_v42 = vmul.f32 1.442695, %v2817_v58 }
 0x512   :  { %3660 = vpow2.f32 %v2846_v3  ;;  %v2853_v17 = vpop.xlane.xlu1 %2852 }
 0x513   :  { %3662 = vpow2.f32 %v2848_v42 }
 0x518   :  { %v3659_v21 = vpop.eup %3658 }
 0x519   :  { %2876 = vadd.xlane.f32.xlu1 %v3659_v21  ;;  %v2888_v61 = vpack.c.bf16 %v3659_v21, %v3657_v30 }
 0x51b   :  { %3511 = vmatprep.mubr.bf16.mxu1 %v2888_v61 }
 0x51c   :  { %v3661_v43 = vpop.eup %3660 }
 0x51d   :  { %v3663_v13 = vpop.eup %3662  ;;  %2878 = vadd.xlane.f32.xlu0 %v3661_v43 }
 0x51e   :  { %2880 = vadd.xlane.f32.xlu1 %v3663_v13  ;;  %v2889_v40 = vpack.c.bf16 %v3663_v13, %v3661_v43 }
 0x520   :  { %3512 = vmatmul.mubr.bf16.gmra.mrb[12].mxu1 %v2889_v40 }
 0x546   :  { %v2851_v16 = vpop.xlane.xlu0 %2850 }
 0x547   :  { %3664 = vrcp.f32 %v2851_v16  ;;  %v6866_v16 = vld [vmem:[#allocation49_spill] sm:$0xff] }
 0x548   :  { %3666 = vrcp.f32 %v2853_v17  ;;  %v6867_v17 = vld [vmem:[#allocation51_spill] sm:$0xff] }
 0x54a   :  { %v2855_v12 = vpop.xlane.xlu0 %2854  ;;  %v2857_v26 = vpop.xlane.xlu1 %2856 }
 0x54b   :  { %3668 = vrcp.f32 %v2857_v26  ;;  %v6869_v26 = vld [vmem:[#allocation63_spill] sm:$0xff] }
 0x54c   :  { %3670 = vrcp.f32 %v2855_v12  ;;  %v6868_v12 = vld [vmem:[#allocation53_spill] sm:$0xff] }
 0x54e   :  { %v2859_v1 = vpop.xlane.xlu0 %2858  ;;  %v2861_v32 = vpop.xlane.xlu1 %2860 }
 0x54f   :  { %3672 = vrcp.f32 %v2859_v1  ;;  %v6870_v1 = vld [vmem:[#allocation56_spill] sm:$0xff] }
 0x550   :  { %3674 = vrcp.f32 %v2861_v32 }
 0x551   :  { %v3665_v10 = vpop.eup %3664 }
 0x552   :  { %v2863_v47 = vpop.xlane.xlu0 %2862  ;;  %v2865_v11 = vpop.xlane.xlu1 %2864 }
 0x553   :  { %v3667_v0 = vpop.eup %3666  ;;  %3676 = vrcp.f32 %v2863_v47 }
 0x554   :  { %3678 = vrcp.f32 %v2865_v11 }
 0x555   :  { %v3669_v6 = vpop.eup %3668 }
 0x556   :  { %v3671_v55 = vpop.eup %3670 }
 0x559   :  { %v3673_v15 = vpop.eup %3672 }
 0x55a   :  { %v3675_v38 = vpop.eup %3674 }
 0x55d   :  { %v3677_v63 = vpop.eup %3676 }
 0x55e   :  { %v3679_v50 = vpop.eup %3678 }
 0x570   :  { %v2867_v53 = vpop.xlane.xlu0 %2866 }
 0x571   :  { %3680 = vrcp.f32 %v2867_v53 }
 0x574   :  { %v2871_v7 = vpop.xlane.xlu0 %2870 }
 0x575   :  { %v2869_v27 = vpop.xlane.xlu1 %2868 }
 0x576   :  { %3682 = vrcp.f32 %v2869_v27 }
 0x577   :  { %3684 = vrcp.f32 %v2871_v7 }
 0x57b   :  { %v3681_v19 = vpop.eup %3680 }
 0x57e   :  { %v2873_v36 = vpop.xlane.xlu1 %2872 }
 0x57f   :  { %3686 = vrcp.f32 %v2873_v36 }
 0x580   :  { %v3683_v33 = vpop.eup %3682 }
 0x581   :  { %v3685_v39 = vpop.eup %3684 }
 0x589   :  { %v3687_v60 = vpop.eup %3686 }
 0x592   :  { %v3501_v62 = vpop.f32.mrb[0].mxu1 }
 0x593   :  { %v2925_v31 = vpop.f32.mrb[1].mxu1  ;;  %v3006_v2 = vmul.f32 %v3671_v55, %v3501_v62  ;;  %v6871_v62 = vld [vmem:[#allocation70_spill] sm:$0xff] }
 0x594   :  { %v3004_v56 = vmul.f32 %v3665_v10, %v2925_v31  ;;  %v3502_v49 = vpop.f32.mrb[2].mxu1  ;;  %v6872_v10 = vld [vmem:[#allocation81_spill] sm:$0xff]  ;;  %v6406_v31 = vld [vmem:[%s6499_s6] ss:$0 sm:$0xff]  ;;  %s3858_s6 = smov [#allocation5]  }
 0x595   :  { %v2928_v52 = vpop.f32.mrb[3].mxu1  ;;  %v3007_v48 = vmul.f32 %v3669_v6, %v3502_v49  ;;  %v6873_v49 = vld [vmem:[#allocation67_spill] sm:$0xff]  ;;  %s3322_s9 = sshll.u32 %s3858_s6, 4  ;;  %s3323_s9 = int_to_ptr.vmem [resolvable:$true] %s3322_s9 }
 0x596   :  { %v3005_v44 = vmul.f32 %v3667_v0, %v2928_v52  ;;  %3036 = vrot.lane.b32.xlu0 %v3004_v56, %s3857_s0  ;;  %v6874_v0 = vld [vmem:[#allocation83_spill] sm:$0xff]  ;;  %s3814_s5 = scalar_lea.vmem %s3323_s9, 1024  ;;  %p3819_p6 = scmp.lt.s32.totalorder %s3323_s9, %s3323_s9 }
 0x597   :  { %p3815_p5 = scmp.ne.s32.totalorder %s3323_s9, %s3814_s5  ;;  %p3820_p7 = scmp.lt.s32.totalorder %s3814_s5, %s3814_s5 }
 0x598   :  { %3038 = vrot.lane.b32.xlu1 %v3005_v44, %s3857_s0 }
 0x599   :  { %p3821_p8 = por %p3820_p7, %p3819_p6 }
 0x59a   :  { %v3505_v59 = vpop.f32.mrb[4].mxu1  ;;  %3042 = vrot.lane.b32.xlu0 %v3007_v48, %s3857_s0  ;;  %v6875_v48 = vld [vmem:[#allocation73_spill] sm:$0xff] }
 0x59b   :  { %v2941_v37 = vpop.f32.mrb[5].mxu1  ;;  %v3010_v8 = vmul.f32 %v3677_v63, %v3505_v59  ;;  %v2875_v23 = vpop.xlane.xlu0 %2874  ;;  %v6876_v59 = vld [vmem:[#allocation40_spill] sm:$0xff]  ;;  %p3822_p9 = pnand %p3821_p8, %p3815_p5 }
 0x59c   :  { %v3506_v14 = vpop.f32.mrb[6].mxu1  ;;  %3040 = vrot.lane.b32.xlu1 %v3006_v2, %s3857_s0  ;;  %v3008_v34 = vmul.f32 %v3673_v15, %v2941_v37  ;;  %3688 = vrcp.f32 %v2875_v23 }
 0x59d   :  { %v2944_v28 = vpop.f32.mrb[7].mxu1  ;;  %v3011_v25 = vmul.f32 %v3679_v50, %v3506_v14 }
 0x59e   :  { %v3009_v24 = vmul.f32 %v3675_v38, %v2944_v28 }
 0x5a0   :  { %3044 = vrot.lane.b32.xlu1 %v3008_v34, %s3857_s0  ;;  %3046 = vrot.lane.b32.xlu0 %v3009_v24, %s3857_s0  ;;  %v6877_v24 = vld [vmem:[#allocation37_spill] sm:$0xff] }
 0x5a4   :  { %3048 = vrot.lane.b32.xlu1 %v3010_v8, %s3857_s0  ;;  %3050 = vrot.lane.b32.xlu0 %v3011_v25, %s3857_s0 }
 0x5a6   :  { %v2877_v45 = vpop.xlane.xlu1 %2876  ;;  %v3689_v35 = vpop.eup %3688 }
 0x5a7   :  { %3690 = vrcp.f32 %v2877_v45 }
 0x5aa   :  { %v2879_v29 = vpop.xlane.xlu0 %2878 }
 0x5ab   :  { %v2881_v5 = vpop.xlane.xlu1 %2880  ;;  %3692 = vrcp.f32 %v2879_v29 }
 0x5ac   :  { %3694 = vrcp.f32 %v2881_v5 }
 0x5ad   :  { %3696 = vrcp.f32 %v6866_v16 }
 0x5ae   :  { %3698 = vrcp.f32 %v6867_v17 }
 0x5af   :  { %3700 = vrcp.f32 %v6868_v12 }
 0x5b0   :  { %3702 = vrcp.f32 %v6869_v26 }
 0x5b1   :  { %v3691_v3 = vpop.eup %3690  ;;  %3704 = vrcp.f32 %v6870_v1 }
 0x5b2   :  { %3706 = vrcp.f32 %v6871_v62 }
 0x5b3   :  { %3708 = vrcp.f32 %v6873_v49 }
 0x5b4   :  { %3710 = vrcp.f32 %v6875_v48 }
 0x5b5   :  { %v3693_v61 = vpop.eup %3692 }
 0x5b6   :  { %v3695_v13 = vpop.eup %3694 }
 0x5b7   :  { %v3697_v32 = vpop.eup %3696 }
 0x5b8   :  { %v1582_v47 = vmul.f32 %v3697_v32, %v6872_v10  ;;  %v3699_v11 = vpop.eup %3698 }
 0x5b9   :  { %v1583_v52 = vmul.f32 %v3699_v11, %v6874_v0  ;;  %v3701_v6 = vpop.eup %3700 }
 0x5ba   :  { %v1585_v37 = vmul.f32 %v3701_v6, %v6876_v59  ;;  %v3703_v14 = vpop.eup %3702 }
 0x5bb   :  { %v1584_v63 = vmul.f32 %v3703_v14, %v6877_v24  ;;  %v3705_v7 = vpop.eup %3704 }
 0x5c6   :  { %v3509_v57 = vpop.f32.mrb[8].mxu1 }
 0x5c7   :  { %v2957_v9 = vpop.f32.mrb[9].mxu1  ;;  %v3014_v46 = vmul.f32 %v3685_v39, %v3509_v57  ;;  %v3707_v57 = vpop.eup %3706 }
 0x5c8   :  { %v3012_v41 = vmul.f32 %v3681_v19, %v2957_v9  ;;  %v3510_v51 = vpop.f32.mrb[10].mxu1 }
 0x5c9   :  { %v2960_v18 = vpop.f32.mrb[11].mxu1  ;;  %v3015_v20 = vmul.f32 %v3687_v60, %v3510_v51 }
 0x5ca   :  { %v3013_v54 = vmul.f32 %v3683_v33, %v2960_v18  ;;  %3052 = vrot.lane.b32.xlu1 %v3012_v41, %s3857_s0  ;;  %v6878_v41 = vld [vmem:[#allocation21_spill] sm:$0xff]  ;;  %v6879_v33 = vld [vmem:[#allocation24_spill] sm:$0xff] }
 0x5cb   :  { %v1586_v51 = vmul.f32 %v3705_v7, %v6878_v41  ;;  %v1587_v18 = vmul.f32 %v3707_v57, %v6879_v33 }
 0x5cc   :  { %3054 = vrot.lane.b32.xlu0 %v3013_v54, %s3857_s0 }
 0x5ce   :  { %3056 = vrot.lane.b32.xlu1 %v3014_v46, %s3857_s0 }
 0x5d0   :  { %3058 = vrot.lane.b32.xlu0 %v3015_v20, %s3857_s0  ;;  %v3709_v20 = vpop.eup %3708 }
 0x5d1   :  { %v3711_v5 = vpop.eup %3710 }
 0x5f3   :  { %v3513_v30 = vpop.f32.mrb[12].mxu1 }
 0x5f4   :  { %v2973_v4 = vpop.f32.mrb[13].mxu1  ;;  %v3018_v43 = vmul.f32 %v3693_v61, %v3513_v30 }
 0x5f5   :  { %v3016_v22 = vmul.f32 %v3689_v35, %v2973_v4  ;;  %v3514_v58 = vpop.f32.mrb[14].mxu1  ;;  %v6880_v4 = vld [vmem:[#allocation9_spill] sm:$0xff] }
 0x5f6   :  { %v2976_v42 = vpop.f32.mrb[15].mxu1  ;;  %v3019_v40 = vmul.f32 %v3695_v13, %v3514_v58  ;;  %v6881_v58 = vld [vmem:[#allocation28_spill] sm:$0xff] }
 0x5f7   :  { %v3017_v21 = vmul.f32 %v3691_v3, %v2976_v42  ;;  %3060 = vrot.lane.b32.xlu1 %v3016_v22, %s3857_s0  ;;  %v1588_v22 = vmul.f32 %v3709_v20, %v6880_v4  ;;  %v1589_v3 = vmul.f32 %v3711_v5, %v6881_v58  ;;  %v6883_v20 = vld [vmem:[#allocation57_spill] sm:$0xff] }
 0x5f8   :  { %v6886_v5 = vld [vmem:[#allocation29_spill] sm:$0xff] }
 0x5f9   :  { %3062 = vrot.lane.b32.xlu0 %v3017_v21, %s3857_s0 }
 0x5fb   :  { %3064 = vrot.lane.b32.xlu1 %v3018_v43, %s3857_s0 }
 0x5fd   :  { %3066 = vrot.lane.b32.xlu0 %v3019_v40, %s3857_s0 }
 0x608   :  { %v3037_v56 = vpop.permute.xlu0 %3036 }
 0x609   :  { %v3085_v44 = vsel %vm3084_vm0, %v1582_v47, %v3037_v56 }
 0x60a   :  { %v3108_v55 = vadd.f32 %v6406_v31, %v3085_v44  ;;  %v3039_v2 = vpop.permute.xlu1 %3038 }
 0x60b   :  { %v3086_v15 = vsel %vm3084_vm0, %v1583_v52, %v3039_v2 }
 0x60c   :  { %v3140_v38 = vmin.f32 %v3108_v55, 0.0  ;;  %v3109_v28 = vadd.f32 %v6406_v31, %v3086_v15  ;;  %v3043_v34 = vpop.permute.xlu0 %3042  ;;  %vm3124_vm1 = vcmp.gt.f32.partialorder %v3108_v55, 0.0 }
 0x60d   :  { %v3088_v50 = vsel %vm3084_vm0, %v1585_v37, %v3043_v34 }
 0x60e   :  { %v3156_v8 = vmul.f32 1.442695, %v3140_v38  ;;  %v3141_v25 = vmin.f32 %v3109_v28, 0.0  ;;  %v3111_v53 = vadd.f32 %v6406_v31, %v3088_v50  ;;  %v3041_v27 = vpop.permute.xlu1 %3040  ;;  %vm3125_vm3 = vcmp.gt.f32.partialorder %v3109_v28, 0.0 }
 0x60f   :  { %v3087_v36 = vsel %vm3084_vm0, %v1584_v63, %v3041_v27 }
 0x610   :  { %3712 = vpow2.f32 %v3156_v8  ;;  %v3158_v19 = vmul.f32 1.442695, %v3141_v25  ;;  %v3143_v9 = vmin.f32 %v3111_v53, 0.0  ;;  %v3110_v54 = vadd.f32 %v6406_v31, %v3087_v36 }
 0x611   :  { %vm3127_vm4 = vcmp.gt.f32.partialorder %v3111_v53, 0.0 }
 0x612   :  { %3714 = vpow2.f32 %v3158_v19  ;;  %v3162_v39 = vmul.f32 1.442695, %v3143_v9  ;;  %v3047_v46 = vpop.permute.xlu0 %3046  ;;  %v3045_v60 = vpop.permute.xlu1 %3044  ;;  %v3142_v23 = vmin.f32 %v3110_v54, 0.0  ;;  %vm3126_vm5 = vcmp.gt.f32.partialorder %v3110_v54, 0.0 }
 0x613   :  { %v3090_v45 = vsel %vm3084_vm0, %v1587_v18, %v3047_v46  ;;  %v3089_v29 = vsel %vm3084_vm0, %v1586_v51, %v3045_v60  ;;  %v6882_v60 = vld [vmem:[#allocation80_spill] sm:$0xff] }
 0x614   :  { %3716 = vpow2.f32 %v3162_v39  ;;  %v3113_v30 = vadd.f32 %v6406_v31, %v3090_v45  ;;  %v3112_v35 = vadd.f32 %v6406_v31, %v3089_v29  ;;  %v3160_v42 = vmul.f32 1.442695, %v3142_v23  ;;  %v6884_v23 = vld [vmem:[#allocation82_spill] sm:$0xff] }
 0x615   :  { %v6885_v45 = vld [vmem:[#allocation22_spill] sm:$0xff] }
 0x616   :  { %v3145_v21 = vmin.f32 %v3113_v30, 0.0  ;;  %v3144_v61 = vmin.f32 %v3112_v35, 0.0  ;;  %v3051_v43 = vpop.permute.xlu0 %3050  ;;  %v3049_v13 = vpop.permute.xlu1 %3048  ;;  %3718 = vpow2.f32 %v3160_v42  ;;  %vm3129_vm6 = vcmp.gt.f32.partialorder %v3113_v30, 0.0 }
 0x617   :  { %v3092_v40 = vsel %vm3084_vm0, %v1589_v3, %v3051_v43  ;;  %v3091_v16 = vsel %vm3084_vm0, %v1588_v22, %v3049_v13  ;;  %vm3128_vm7 = vcmp.gt.f32.partialorder %v3112_v35, 0.0  ;;  %v6887_v22 = vld [vmem:[#allocation11_spill] sm:$0xff]  ;;  %v6888_v43 = vld [vmem:[#allocation10_spill] sm:$0xff] }
 0x618   :  { %v3166_v17 = vmul.f32 1.442695, %v3145_v21  ;;  %v3164_v12 = vmul.f32 1.442695, %v3144_v61  ;;  %v3115_v26 = vadd.f32 %v6406_v31, %v3092_v40  ;;  %v3114_v1 = vadd.f32 %v6406_v31, %v3091_v16 }
 0x61a   :  { %v3713_v32 = vpop.eup %3712  ;;  %3720 = vpow2.f32 %v3166_v17  ;;  %v3147_v62 = vmin.f32 %v3115_v26, 0.0  ;;  %v3146_v47 = vmin.f32 %v3114_v1, 0.0  ;;  %vm3131_vm8 = vcmp.gt.f32.partialorder %v3115_v26, 0.0 }
 0x61b   :  { %v3366_v10 = vadd.f32 -1.0, %v3713_v32  ;;  %3722 = vpow2.f32 %v3164_v12  ;;  %vm3130_vm9 = vcmp.gt.f32.partialorder %v3114_v1, 0.0 }
 0x61c   :  { %v3715_v11 = vpop.eup %3714  ;;  %v3170_v56 = vmul.f32 1.442695, %v3147_v62  ;;  %v3168_v52 = vmul.f32 1.442695, %v3146_v47 }
 0x61d   :  { %v3204_v49 = vsel %vm3124_vm1, %v3108_v55, %v3366_v10  ;;  %v3367_v0 = vadd.f32 -1.0, %v3715_v11 }
 0x61e   :  { %v3717_v44 = vpop.eup %3716  ;;  %3724 = vpow2.f32 %v3170_v56  ;;  %v3221_v2 = vsel %vm3220_vm2, %v3204_v49, 0.0 }
 0x61f   :  { %v3205_v6 = vsel %vm3125_vm3, %v3109_v28, %v3367_v0  ;;  %v3369_v48 = vadd.f32 -1.0, %v3717_v44  ;;  %3726 = vpow2.f32 %v3168_v52 }
 0x620   :  { %v3222_v59 = vsel %vm3220_vm2, %v3205_v6, 0.0  ;;  %v3719_v37 = vpop.eup %3718  ;;  %3728 = vrcp.f32 %v6882_v60  ;;  %v6895_v60 = vld [vmem:[#allocation33_spill] sm:$0xff] }
 0x621   :  { %v3417_v15 = vpack.c.bf16 %v3222_v59, %v3221_v2  ;;  %v3207_v14 = vsel %vm3127_vm4, %v3111_v53, %v3369_v48  ;;  %v3368_v38 = vadd.f32 -1.0, %v3719_v37  ;;  %3730 = vrcp.f32 %v6883_v20 }
 0x622   :  { %v3224_v63 = vsel %vm3220_vm2, %v3207_v14, 0.0  ;;  %3732 = vrcp.f32 %v6884_v23 }
 0x623   :  { %3418 = vst [vmem:[#allocation5] sm:$0xff] %v3417_v15   ;;  %v3206_v34 = vsel %vm3126_vm5, %v3110_v54, %v3368_v38  ;;  %3734 = vrcp.f32 %v6885_v45 }
 0x624   :  { %v3721_v55 = vpop.eup %3720  ;;  %v3223_v28 = vsel %vm3220_vm2, %v3206_v34, 0.0 }
 0x625   :  { %v3723_v24 = vpop.eup %3722  ;;  %v3371_v50 = vadd.f32 -1.0, %v3721_v55  ;;  %v3422_v8 = vpack.c.bf16 %v3224_v63, %v3223_v28 }
 0x626   :  { %v3370_v25 = vadd.f32 -1.0, %v3723_v24 }
 0x627   :  { %v3209_v27 = vsel %vm3129_vm6, %v3113_v30, %v3371_v50  ;;  %3454 = vst [vmem:[#allocation5 + $0x8] sm:$0xff] %v3422_v8  }
 0x628   :  { %v3725_v7 = vpop.eup %3724  ;;  %v3226_v53 = vsel %vm3220_vm2, %v3209_v27, 0.0  ;;  %v3208_v36 = vsel %vm3128_vm7, %v3112_v35, %v3370_v25 }
 0x629   :  { %v3727_v57 = vpop.eup %3726  ;;  %v3225_v19 = vsel %vm3220_vm2, %v3208_v36, 0.0  ;;  %v3373_v9 = vadd.f32 -1.0, %v3725_v7 }
 0x62a   :  { %v3427_v41 = vpack.c.bf16 %v3226_v53, %v3225_v19  ;;  %v3372_v51 = vadd.f32 -1.0, %v3727_v57  ;;  %v3729_v29 = vpop.eup %3728  ;;  %v6890_v19 = vld [vmem:[#allocation15_spill] sm:$0xff] }
 0x62b   :  { %v3211_v33 = vsel %vm3131_vm8, %v3115_v26, %v3373_v9  ;;  %v1590_v30 = vmul.f32 %v3729_v29, %v6886_v5  ;;  %v3731_v35 = vpop.eup %3730  ;;  %v6891_v9 = vld [vmem:[#allocation39_spill] sm:$0xff] }
 0x62c   :  { %3455 = vst [vmem:[#allocation5 + $0x10] sm:$0xff] %v3427_v41   ;;  %v3228_v18 = vsel %vm3220_vm2, %v3211_v33, 0.0  ;;  %v3210_v54 = vsel %vm3130_vm9, %v3114_v1, %v3372_v51  ;;  %v1591_v58 = vmul.f32 %v3731_v35, %v6887_v22  ;;  %v3733_v42 = vpop.eup %3732  ;;  %v6889_v1 = vld [vmem:[#allocation23_spill] sm:$0xff]  ;;  %v6892_v41 = vld [vmem:[#allocation17_spill] sm:$0xff]  ;;  %v6893_v51 = vld [vmem:[#allocation16_spill] sm:$0xff] }
 0x62d   :  { %v3227_v39 = vsel %vm3220_vm2, %v3210_v54, 0.0  ;;  %v1592_v13 = vmul.f32 %v3733_v42, %v6888_v43  ;;  %v3735_v16 = vpop.eup %3734 }
 0x62e   :  { %v3432_v46 = vpack.c.bf16 %v3228_v18, %v3227_v39  ;;  %v1593_v32 = vmul.f32 %v3735_v16, %v6889_v1  ;;  %v6894_v18 = vld [vmem:[#allocation27_spill] sm:$0xff] }
 0x630   :  { %3456 = vst [vmem:[#allocation5 + $0x18] sm:$0xff] %v3432_v46  }
 0x63c   :  { %v3053_v4 = vpop.permute.xlu1 %3052 }
 0x63d   :  { %v3093_v3 = vsel %vm3084_vm0, %v1590_v30, %v3053_v4  ;;  %v6896_v30 = vld [vmem:[#allocation30_spill] sm:$0xff] }
 0x63e   :  { %v3116_v21 = vadd.f32 %v6406_v31, %v3093_v3  ;;  %v3055_v61 = vpop.permute.xlu0 %3054 }
 0x63f   :  { %v3094_v40 = vsel %vm3084_vm0, %v1591_v58, %v3055_v61 }
 0x640   :  { %v3148_v17 = vmin.f32 %v3116_v21, 0.0  ;;  %v3117_v12 = vadd.f32 %v6406_v31, %v3094_v40  ;;  %v3057_v26 = vpop.permute.xlu1 %3056  ;;  %vm3132_vm10 = vcmp.gt.f32.partialorder %v3116_v21, 0.0 }
 0x641   :  { %v3095_v62 = vsel %vm3084_vm0, %v1592_v13, %v3057_v26 }
 0x642   :  { %v3172_v10 = vmul.f32 1.442695, %v3148_v17  ;;  %v3149_v47 = vmin.f32 %v3117_v12, 0.0  ;;  %v3118_v11 = vadd.f32 %v6406_v31, %v3095_v62  ;;  %v3059_v56 = vpop.permute.xlu0 %3058  ;;  %vm3133_vm11 = vcmp.gt.f32.partialorder %v3117_v12, 0.0 }
 0x643   :  { %v3096_v49 = vsel %vm3084_vm0, %v1593_v32, %v3059_v56 }
 0x644   :  { %3736 = vpow2.f32 %v3172_v10  ;;  %v3174_v0 = vmul.f32 1.442695, %v3149_v47  ;;  %v3150_v52 = vmin.f32 %v3118_v11, 0.0  ;;  %v3119_v44 = vadd.f32 %v6406_v31, %v3096_v49 }
 0x645   :  { %vm3134_vm12 = vcmp.gt.f32.partialorder %v3118_v11, 0.0 }
 0x646   :  { %3738 = vpow2.f32 %v3174_v0  ;;  %v3176_v6 = vmul.f32 1.442695, %v3150_v52  ;;  %v3151_v48 = vmin.f32 %v3119_v44, 0.0  ;;  %vm3135_vm13 = vcmp.gt.f32.partialorder %v3119_v44, 0.0 }
 0x648   :  { %3740 = vpow2.f32 %v3176_v6  ;;  %v3178_v2 = vmul.f32 1.442695, %v3151_v48 }
 0x64a   :  { %3742 = vpow2.f32 %v3178_v2 }
 0x64b   :  { %3744 = vrcp.f32 %v6890_v19 }
 0x64c   :  { %3746 = vrcp.f32 %v6891_v9 }
 0x64d   :  { %3748 = vrcp.f32 %v6892_v41 }
 0x64e   :  { %v3737_v59 = vpop.eup %3736  ;;  %3750 = vrcp.f32 %v6893_v51 }
 0x64f   :  { %v3374_v37 = vadd.f32 -1.0, %v3737_v59 }
 0x650   :  { %v3739_v15 = vpop.eup %3738 }
 0x651   :  { %v3212_v14 = vsel %vm3132_vm10, %v3116_v21, %v3374_v37  ;;  %v3375_v38 = vadd.f32 -1.0, %v3739_v15  ;;  %v6897_v21 = vld [vmem:[#allocation12_spill] sm:$0xff] }
 0x652   :  { %v3741_v55 = vpop.eup %3740  ;;  %v3229_v63 = vsel %vm3220_vm2, %v3212_v14, 0.0 }
 0x653   :  { %v3213_v34 = vsel %vm3133_vm11, %v3117_v12, %v3375_v38  ;;  %v3376_v24 = vadd.f32 -1.0, %v3741_v55 }
 0x654   :  { %v3230_v28 = vsel %vm3220_vm2, %v3213_v34, 0.0  ;;  %v3743_v50 = vpop.eup %3742 }
 0x655   :  { %v3437_v8 = vpack.c.bf16 %v3230_v28, %v3229_v63  ;;  %v3214_v25 = vsel %vm3134_vm12, %v3118_v11, %v3376_v24  ;;  %v3377_v27 = vadd.f32 -1.0, %v3743_v50  ;;  %v3745_v33 = vpop.eup %3744 }
 0x656   :  { %v3231_v53 = vsel %vm3220_vm2, %v3214_v25, 0.0  ;;  %v1594_v54 = vmul.f32 %v3745_v33, %v6894_v18  ;;  %v3747_v39 = vpop.eup %3746 }
 0x657   :  { %3457 = vst [vmem:[#allocation5 + $0x20] sm:$0xff] %v3437_v8   ;;  %v3215_v7 = vsel %vm3135_vm13, %v3119_v44, %v3377_v27  ;;  %v1595_v20 = vmul.f32 %v3747_v39, %v6895_v60  ;;  %v3749_v45 = vpop.eup %3748 }
 0x658   :  { %v3232_v36 = vsel %vm3220_vm2, %v3215_v7, 0.0  ;;  %v1596_v35 = vmul.f32 %v3749_v45, %v6896_v30  ;;  %v3751_v22 = vpop.eup %3750 }
 0x659   :  { %v3442_v57 = vpack.c.bf16 %v3232_v36, %v3231_v53  ;;  %v1597_v61 = vmul.f32 %v3751_v22, %v6897_v21 }
 0x65b   :  { %3458 = vst [vmem:[#allocation5 + $0x28] sm:$0xff] %v3442_v57  }
 0x669   :  { %v3061_v46 = vpop.permute.xlu1 %3060 }
 0x66a   :  { %v3097_v23 = vsel %vm3084_vm0, %v1594_v54, %v3061_v46 }
 0x66b   :  { %v3120_v29 = vadd.f32 %v6406_v31, %v3097_v23  ;;  %v3063_v5 = vpop.permute.xlu0 %3062 }
 0x66c   :  { %v3098_v4 = vsel %vm3084_vm0, %v1595_v20, %v3063_v5 }
 0x66d   :  { %v3152_v58 = vmin.f32 %v3120_v29, 0.0  ;;  %v3121_v3 = vadd.f32 %v6406_v31, %v3098_v4  ;;  %v3065_v42 = vpop.permute.xlu1 %3064  ;;  %vm3136_vm14 = vcmp.gt.f32.partialorder %v3120_v29, 0.0 }
 0x66e   :  { %v3099_v43 = vsel %vm3084_vm0, %v1596_v35, %v3065_v42 }
 0x66f   :  { %v3180_v13 = vmul.f32 1.442695, %v3152_v58  ;;  %v3153_v40 = vmin.f32 %v3121_v3, 0.0  ;;  %v3122_v16 = vadd.f32 %v6406_v31, %v3099_v43  ;;  %v3067_v17 = vpop.permute.xlu0 %3066  ;;  %vm3137_vm15 = vcmp.gt.f32.partialorder %v3121_v3, 0.0 }
 0x670   :  { %v3100_v12 = vsel %vm3084_vm0, %v1597_v61, %v3067_v17 }
 0x671   :  { %3752 = vpow2.f32 %v3180_v13  ;;  %v3182_v26 = vmul.f32 1.442695, %v3153_v40  ;;  %v3154_v1 = vmin.f32 %v3122_v16, 0.0  ;;  %v3123_v32 = vadd.f32 %v6406_v31, %v3100_v12 }
 0x672   :  { %vm3138_vm0 = vcmp.gt.f32.partialorder %v3122_v16, 0.0 }
 0x673   :  { %3754 = vpow2.f32 %v3182_v26  ;;  %v3184_v62 = vmul.f32 1.442695, %v3154_v1  ;;  %v3155_v10 = vmin.f32 %v3123_v32, 0.0  ;;  %vm3139_vm1 = vcmp.gt.f32.partialorder %v3123_v32, 0.0 }
 0x675   :  { %3756 = vpow2.f32 %v3184_v62  ;;  %v3186_v47 = vmul.f32 1.442695, %v3155_v10 }
 0x677   :  { %3758 = vpow2.f32 %v3186_v47 }
 0x67b   :  { %v3753_v11 = vpop.eup %3752 }
 0x67c   :  { %v3378_v56 = vadd.f32 -1.0, %v3753_v11 }
 0x67d   :  { %v3755_v49 = vpop.eup %3754 }
 0x67e   :  { %v3216_v0 = vsel %vm3136_vm14, %v3120_v29, %v3378_v56  ;;  %v3379_v52 = vadd.f32 -1.0, %v3755_v49 }
 0x67f   :  { %v3757_v44 = vpop.eup %3756  ;;  %v3233_v2 = vsel %vm3220_vm2, %v3216_v0, 0.0 }
 0x680   :  { %v3217_v6 = vsel %vm3137_vm15, %v3121_v3, %v3379_v52  ;;  %v3380_v48 = vadd.f32 -1.0, %v3757_v44 }
 0x681   :  { %v3234_v31 = vsel %vm3220_vm2, %v3217_v6, 0.0  ;;  %v3759_v59 = vpop.eup %3758 }
 0x682   :  { %v3447_v37 = vpack.c.bf16 %v3234_v31, %v3233_v2  ;;  %v3218_v15 = vsel %vm3138_vm0, %v3122_v16, %v3380_v48  ;;  %v3381_v14 = vadd.f32 -1.0, %v3759_v59 }
 0x683   :  { %v3235_v55 = vsel %vm3220_vm2, %v3218_v15, 0.0 }
 0x684   :  { %3459 = vst [vmem:[#allocation5 + $0x30] sm:$0xff] %v3447_v37   ;;  %v3219_v38 = vsel %vm3139_vm1, %v3123_v32, %v3381_v14 }
 0x685   :  { %v3236_v34 = vsel %vm3220_vm2, %v3219_v38, 0.0 }
 0x686   :  { %v3452_v24 = vpack.c.bf16 %v3236_v34, %v3235_v55 }
 0x688   :  { %3460 = vst [vmem:[#allocation5 + $0x38] sm:$0xff] %v3452_v24  }
 0x689   :  { %3825 = shalt.err (!%p3822_p9)
}
 0x68a   :  { %s3826_s11 = scalar_lea.hbm %s6500_s7, 1024 }
 0x68b   :  { %p3827_p10 = scmp.ne.s32.totalorder %s6500_s7, %s3826_s11  ;;  %p3830_p11 = scmp.lt.u32.totalorder %s3826_s11, %s6500_s7 }
 0x68d   :  { %p3832_p12 = pnand %p3830_p11, %p3827_p10 }
 0x68f   :  { %3835 = shalt.err (!%p3832_p12)
}
 0x690   :  { %s3859_s15 = smov 64   ;;  %s3860_s16 = smov 4  }
 0x691   :  { %3328 = dma.vmem_to_hbm [thread:$0]  %s3323_s9, 1024, %s6500_s7, [#allocation3], %s3859_s15, %s3859_s15, %s3860_s16  }
 0x692   :  { %3838 = dma.done.wait [#allocation3], 1024  }
 0x693   :  { %3839 = vsyncadd [#allocation3], 4294966272 }
 0x694   :  { %3332 = vsyncpa [#allocation3], 1 }
 0x695   :  { %3333 = vsyncpa [#allocation4], 1 }

</bundles_post_ra>
